<compile_context>
chip_gen: v7x
topology: tpu7x:2x2x1
jax: 0.10.0
libtpu: 0.0.40
codegen_flags: <defaults>
</compile_context>

<pallas_src>
import functools

import jax
import jax.numpy as jnp
from jax import lax
from jax.experimental import pallas as pl
from jax.experimental.pallas import tpu as pltpu
import numpy as np

GP = 128  # lane width of one padded gate block


def _seq2seq_kernel(x_ref,            # (T_in*B, I)      time-major flattened input
                    enc_wih_ref,      # (I, 4*GP)        gate-padded, i/f/o cols pre-scaled by 0.5
                    enc_whh_ref,      # (GP, 4*GP)
                    enc_b_ref,        # (1, 4*GP)
                    dec_wih_ref,      # (I, 4*GP)
                    dec_whh_ref,      # (GP, 4*GP)
                    dec_b_ref,        # (1, 4*GP)
                    lin_w_ref,        # (T_out*GP, T_out*O)  block-diagonal head
                    lin_b_ref,        # (1, T_out*O)
                    out_ref,          # (B, T_out*O)
                    xproj_ref,        # VMEM scratch (T_in*B, 4*GP)
                    hs_ref,           # VMEM scratch (B, T_out*GP)
                    *, T_in, T_out, B):
    f32 = jnp.float32

    def cell(z, c):
        # One tanh pass over the whole gate slab (sigmoid gates arrive pre-scaled
        # by 0.5, so sigmoid(x) = 0.5*tanh(x/2) + 0.5 costs only VPU mul/add extra).
        t = jnp.tanh(z)
        i = 0.5 * t[:, 0 * GP:1 * GP] + 0.5
        f = 0.5 * t[:, 1 * GP:2 * GP] + 0.5
        g = t[:, 2 * GP:3 * GP]
        o = 0.5 * t[:, 3 * GP:4 * GP] + 0.5
        c_new = f * c + i * g
        h_new = o * jnp.tanh(c_new)
        return h_new, c_new

    # ---------------- encoder ----------------
    # One batched MXU call for all T_in input projections, staged in VMEM.
    xproj_ref[...] = (jnp.dot(x_ref[...], enc_wih_ref[...], preferred_element_type=f32)
                      + enc_b_ref[...])

    h = jnp.zeros((B, GP), f32)   # PyTorch zero init; lanes [H:GP] stay 0
    c = jnp.zeros((B, GP), f32)

    # Fully unrolled recurrence (T_in = 8); (h, c) live in vregs.
    for t in range(T_in):
        gates = (xproj_ref[t * B:(t + 1) * B, :]              # sublane-aligned slice
                 + jnp.dot(h, enc_whh_ref[...], preferred_element_type=f32))
        h, c = cell(gates, c)

    # ---------------- decoder ----------------
    # Constant decoder input = last raw encoder timestep; projection hoisted.
    x_last = x_ref[(T_in - 1) * B:T_in * B, :]                # (B, I)
    x_contrib = (jnp.dot(x_last, dec_wih_ref[...], preferred_element_type=f32)
                 + dec_b_ref[...])                            # (B, 4*GP)

    for t in range(T_out):
        gates = x_contrib + jnp.dot(h, dec_whh_ref[...], preferred_element_type=f32)
        h, c = cell(gates, c)
        hs_ref[:, t * GP:(t + 1) * GP] = h                    # lane-aligned full-vreg store

    # Batched, lane-dense linear head: one block-diagonal matmul, one dense store.
    y = jnp.dot(hs_ref[...], lin_w_ref[...], preferred_element_type=f32) + lin_b_ref[...]
    out_ref[...] = y.astype(out_ref.dtype)


def init_params(key, input_size, hidden_size, output_size):
    """Deterministic synthetic parameters (PyTorch LSTM/Linear shapes)."""
    ks = jax.random.split(key, 10)
    H, I, O = hidden_size, input_size, output_size
    s = 1.0 / np.sqrt(H)

    def u(k, shape):
        return jax.random.uniform(k, shape, jnp.float32, -s, s)

    return {
        # encoder LSTM
        "enc_w_ih": u(ks[0], (4 * H, I)),
        "enc_w_hh": u(ks[1], (4 * H, H)),
        "enc_b_ih": u(ks[2], (4 * H,)),
        "enc_b_hh": u(ks[3], (4 * H,)),
        # decoder LSTM
        "dec_w_ih": u(ks[4], (4 * H, I)),
        "dec_w_hh": u(ks[5], (4 * H, H)),
        "dec_b_ih": u(ks[6], (4 * H,)),
        "dec_b_hh": u(ks[7], (4 * H,)),
        # decoder linear head
        "lin_w": u(ks[8], (O, H)),
        "lin_b": u(ks[9], (O,)),
    }


def _prep_lstm(w_ih, w_hh, b_ih, b_hh, H, I):
    """Gate-padded, transposed LSTM weights.

    Gate k (PyTorch order [i, f, g, o]) occupies lanes [k*GP, k*GP + H); the
    remaining lanes / rows are zero.  Sigmoid gates (i, f, o) are pre-scaled by
    0.5 so the kernel can use sigmoid(x) = 0.5*tanh(x/2) + 0.5 with a single tanh.
    """
    b = (b_ih + b_hh).astype(jnp.float32)
    wih_p = jnp.zeros((I, 4 * GP), jnp.float32)
    whh_p = jnp.zeros((GP, 4 * GP), jnp.float32)
    b_p = jnp.zeros((1, 4 * GP), jnp.float32)
    for k in range(4):
        scale = 1.0 if k == 2 else 0.5       # g (tanh gate) unscaled; i/f/o scaled
        wih_k = scale * w_ih[k * H:(k + 1) * H, :].T.astype(jnp.float32)   # (I, H)
        whh_k = scale * w_hh[k * H:(k + 1) * H, :].T.astype(jnp.float32)   # (H, H)
        b_k = scale * b[k * H:(k + 1) * H]
        wih_p = wih_p.at[:, k * GP:k * GP + H].set(wih_k)
        whh_p = whh_p.at[:H, k * GP:k * GP + H].set(whh_k)
        b_p = b_p.at[0, k * GP:k * GP + H].set(b_k)
    return wih_p, whh_p, b_p


def seq2seq_pallas(x, params, target_seq_length):
    """x: (B, T_in, input_size) float32 -> (B, target_seq_length, output_size)."""
    B, T_in, I = x.shape
    H = params["enc_w_hh"].shape[1]
    O = params["lin_w"].shape[0]
    T_out = int(target_seq_length)
    assert H <= GP, "hidden_size must fit in one padded gate block"

    # Pad batch up to a sublane multiple (8) so all in-kernel row slices are
    # tile-aligned. Padded rows are zeros and discarded below.
    B_pad = max(8, ((B + 7) // 8) * 8)
    x_p = jnp.zeros((B_pad, T_in, I), jnp.float32).at[:B].set(x.astype(jnp.float32))
    # time-major, flattened: rows [t*B_pad : (t+1)*B_pad] = timestep t
    x_flat = jnp.transpose(x_p, (1, 0, 2)).reshape(T_in * B_pad, I)

    enc_wih_p, enc_whh_p, enc_b_p = _prep_lstm(
        params["enc_w_ih"], params["enc_w_hh"], params["enc_b_ih"], params["enc_b_hh"], H, I)
    dec_wih_p, dec_whh_p, dec_b_p = _prep_lstm(
        params["dec_w_ih"], params["dec_w_hh"], params["dec_b_ih"], params["dec_b_hh"], H, I)

    # Block-diagonal head: timestep t's hidden block (lanes [t*GP, t*GP+H)) maps
    # to output lanes [t*O, (t+1)*O) -> single lane-dense (B, T_out*O) result.
    lin_w_T = params["lin_w"].T.astype(jnp.float32)                       # (H, O)
    lin_w_big = jnp.zeros((T_out * GP, T_out * O), jnp.float32)
    for t in range(T_out):
        lin_w_big = lin_w_big.at[t * GP:t * GP + H, t * O:(t + 1) * O].set(lin_w_T)
    lin_b_big = jnp.tile(params["lin_b"].reshape(1, O).astype(jnp.float32), (1, T_out))

    kernel = functools.partial(_seq2seq_kernel, T_in=T_in, T_out=T_out, B=B_pad)
    vmem = pl.BlockSpec(memory_space=pltpu.MemorySpace.VMEM)

    out_flat = pl.pallas_call(
        kernel,
        out_shape=jax.ShapeDtypeStruct((B_pad, T_out * O), jnp.float32),
        in_specs=[vmem] * 9,
        out_specs=vmem,
        scratch_shapes=[
            pltpu.VMEM((T_in * B_pad, 4 * GP), jnp.float32),   # batched encoder x-projections
            pltpu.VMEM((B_pad, T_out * GP), jnp.float32),      # decoder hidden states
        ],
    )(x_flat, enc_wih_p, enc_whh_p, enc_b_p,
      dec_wih_p, dec_whh_p, dec_b_p, lin_w_big, lin_b_big)

    # (B_pad, T_out*O) -> (B, T_out, O); already batch-major, no transpose needed.
    return out_flat[:B].reshape(B, T_out, O)


# ----------------- pure-JAX reference (for correctness check) -----------------
def _lstm_ref(x_bti, wih, whh, b_ih, b_hh, h0, c0):
    wih_T, whh_T = wih.T, whh.T
    b = b_ih + b_hh
    H = whh.shape[1]

    def step(carry, x_t):
        h, c = carry
        gates = x_t @ wih_T + h @ whh_T + b
        i = jax.nn.sigmoid(gates[:, 0 * H:1 * H])
        f = jax.nn.sigmoid(gates[:, 1 * H:2 * H])
        g = jnp.tanh(gates[:, 2 * H:3 * H])
        o = jax.nn.sigmoid(gates[:, 3 * H:4 * H])
        c = f * c + i * g
        h = o * jnp.tanh(c)
        return (h, c), h

    (h, c), hs = lax.scan(step, (h0, c0), jnp.transpose(x_bti, (1, 0, 2)))
    return jnp.transpose(hs, (1, 0, 2)), (h, c)


def seq2seq_ref(x, params, target_seq_length):
    B, T_in, I = x.shape
    H = params["enc_w_hh"].shape[1]
    h0 = jnp.zeros((B, H), jnp.float32)
    c0 = jnp.zeros((B, H), jnp.float32)
    _, (h_enc, c_enc) = _lstm_ref(x, params["enc_w_ih"], params["enc_w_hh"],
                                  params["enc_b_ih"], params["enc_b_hh"], h0, c0)
    dec_in = jnp.repeat(x[:, -1:, :], target_seq_length, axis=1)
    hs, _ = _lstm_ref(dec_in, params["dec_w_ih"], params["dec_w_hh"],
                      params["dec_b_ih"], params["dec_b_hh"], h_enc, c_enc)
    return hs @ params["lin_w"].T + params["lin_b"]


if __name__ == "__main__":
    B, T_IN, T_OUT = 2, 8, 8
    INPUT_SIZE, HIDDEN_SIZE, OUTPUT_SIZE = 16, 32, 16

    key = jax.random.PRNGKey(0)
    k_x, k_p = jax.random.split(key)
    x = jax.random.normal(k_x, (B, T_IN, INPUT_SIZE), jnp.float32)
    params = init_params(k_p, INPUT_SIZE, HIDDEN_SIZE, OUTPUT_SIZE)

    out = seq2seq_pallas(x, params, T_OUT)
    out = jax.block_until_ready(out)

    ref = jax.block_until_ready(seq2seq_ref(x, params, T_OUT))
    np.testing.assert_allclose(np.asarray(out), np.asarray(ref), rtol=1e-4, atol=1e-4)

    print("KERNEL_OK")
</pallas_src>

<mosaic_0001>
module attributes {stable_mosaic.version = 11 : i64} {
  func.func @_seq2seq_kernel(%arg0: memref<64x16xf32, #tpu.memory_space<vmem>>, %arg1: memref<16x512xf32, #tpu.memory_space<vmem>>, %arg2: memref<128x512xf32, #tpu.memory_space<vmem>>, %arg3: memref<1x512xf32, #tpu.memory_space<vmem>>, %arg4: memref<16x512xf32, #tpu.memory_space<vmem>>, %arg5: memref<128x512xf32, #tpu.memory_space<vmem>>, %arg6: memref<1x512xf32, #tpu.memory_space<vmem>>, %arg7: memref<1024x128xf32, #tpu.memory_space<vmem>>, %arg8: memref<1x128xf32, #tpu.memory_space<vmem>>, %arg9: memref<8x128xf32, #tpu.memory_space<vmem>>, %arg10: memref<64x512xf32, #tpu.memory_space<vmem>>, %arg11: memref<8x1024xf32, #tpu.memory_space<vmem>>) attributes {dimension_semantics = [], scalar_prefetch = 0 : i64, scratch_operands = 2 : i64, tpu.core_type = #tpu.core_type<tc>} {
    %c0 = arith.constant 0 : index
    %c0_0 = arith.constant 0 : index
    %0 = vector.load %arg0[%c0, %c0_0] : memref<64x16xf32, #tpu.memory_space<vmem>>, vector<64x16xf32>
    %c0_1 = arith.constant 0 : index
    %c0_2 = arith.constant 0 : index
    %1 = vector.load %arg1[%c0_1, %c0_2] : memref<16x512xf32, #tpu.memory_space<vmem>>, vector<16x512xf32>
    %cst = arith.constant dense<0.000000e+00> : vector<64x512xf32>
    %2 = tpu.matmul %0, %1, %cst {dimension_numbers = #tpu.dot_dimension_numbers<[1], [0], [0], [1], [0, 0, 1, 1], [], []>} : vector<64x16xf32>, vector<16x512xf32>, vector<64x512xf32> -> vector<64x512xf32>
    %c0_3 = arith.constant 0 : index
    %c0_4 = arith.constant 0 : index
    %3 = vector.load %arg3[%c0_3, %c0_4] : memref<1x512xf32, #tpu.memory_space<vmem>>, vector<1x512xf32>
    %4 = vector.broadcast %3 : vector<1x512xf32> to vector<64x512xf32>
    %5 = arith.addf %2, %4 : vector<64x512xf32>
    %c0_5 = arith.constant 0 : index
    %c0_6 = arith.constant 0 : index
    %6 = vector.load %arg10[%c0_5, %c0_6] : memref<64x512xf32, #tpu.memory_space<vmem>>, vector<64x512xf32>
    tpu.vector_store %arg10[%c0_5, %c0_6], %5 {strides = array<i32>} : memref<64x512xf32, #tpu.memory_space<vmem>>, vector<64x512xf32>,
    %cst_7 = arith.constant 0.000000e+00 : f32
    %7 = vector.broadcast %cst_7 : f32 to vector<8x128xf32>
    %cst_8 = arith.constant 0.000000e+00 : f32
    %8 = vector.broadcast %cst_8 : f32 to vector<8x128xf32>
    %c0_9 = arith.constant 0 : index
    %c0_10 = arith.constant 0 : index
    %9 = vector.load %arg10[%c0_9, %c0_10] : memref<64x512xf32, #tpu.memory_space<vmem>>, vector<8x512xf32>
    %c0_11 = arith.constant 0 : index
    %c0_12 = arith.constant 0 : index
    %10 = vector.load %arg2[%c0_11, %c0_12] : memref<128x512xf32, #tpu.memory_space<vmem>>, vector<128x512xf32>
    %cst_13 = arith.constant dense<0.000000e+00> : vector<8x512xf32>
    %11 = tpu.matmul %7, %10, %cst_13 {dimension_numbers = #tpu.dot_dimension_numbers<[1], [0], [0], [1], [0, 0, 1, 1], [], []>} : vector<8x128xf32>, vector<128x512xf32>, vector<8x512xf32> -> vector<8x512xf32>
    %12 = arith.addf %9, %11 : vector<8x512xf32>
    %13 = math.tanh %12 : vector<8x512xf32>
    %14 = vector.extract_strided_slice %13 {offsets = [0, 0], sizes = [8, 128], strides = [1, 1]} : vector<8x512xf32> to vector<8x128xf32>
    %cst_14 = arith.constant 5.000000e-01 : f32
    %15 = vector.broadcast %cst_14 : f32 to vector<8x128xf32>
    %16 = arith.mulf %15, %14 : vector<8x128xf32>
    %cst_15 = arith.constant 5.000000e-01 : f32
    %17 = vector.broadcast %cst_15 : f32 to vector<8x128xf32>
    %18 = arith.addf %16, %17 : vector<8x128xf32>
    %19 = vector.extract_strided_slice %13 {offsets = [0, 128], sizes = [8, 128], strides = [1, 1]} : vector<8x512xf32> to vector<8x128xf32>
    %cst_16 = arith.constant 5.000000e-01 : f32
    %20 = vector.broadcast %cst_16 : f32 to vector<8x128xf32>
    %21 = arith.mulf %20, %19 : vector<8x128xf32>
    %cst_17 = arith.constant 5.000000e-01 : f32
    %22 = vector.broadcast %cst_17 : f32 to vector<8x128xf32>
    %23 = arith.addf %21, %22 : vector<8x128xf32>
    %24 = vector.extract_strided_slice %13 {offsets = [0, 256], sizes = [8, 128], strides = [1, 1]} : vector<8x512xf32> to vector<8x128xf32>
    %25 = vector.extract_strided_slice %13 {offsets = [0, 384], sizes = [8, 128], strides = [1, 1]} : vector<8x512xf32> to vector<8x128xf32>
    %cst_18 = arith.constant 5.000000e-01 : f32
    %26 = vector.broadcast %cst_18 : f32 to vector<8x128xf32>
    %27 = arith.mulf %26, %25 : vector<8x128xf32>
    %cst_19 = arith.constant 5.000000e-01 : f32
    %28 = vector.broadcast %cst_19 : f32 to vector<8x128xf32>
    %29 = arith.addf %27, %28 : vector<8x128xf32>
    %30 = arith.mulf %23, %8 : vector<8x128xf32>
    %31 = arith.mulf %18, %24 : vector<8x128xf32>
    %32 = arith.addf %30, %31 : vector<8x128xf32>
    %33 = math.tanh %32 : vector<8x128xf32>
    %34 = arith.mulf %29, %33 : vector<8x128xf32>
    %c8 = arith.constant 8 : index
    %c0_20 = arith.constant 0 : index
    %35 = vector.load %arg10[%c8, %c0_20] : memref<64x512xf32, #tpu.memory_space<vmem>>, vector<8x512xf32>
    %c0_21 = arith.constant 0 : index
    %c0_22 = arith.constant 0 : index
    %36 = vector.load %arg2[%c0_21, %c0_22] : memref<128x512xf32, #tpu.memory_space<vmem>>, vector<128x512xf32>
    %cst_23 = arith.constant dense<0.000000e+00> : vector<8x512xf32>
    %37 = tpu.matmul %34, %36, %cst_23 {dimension_numbers = #tpu.dot_dimension_numbers<[1], [0], [0], [1], [0, 0, 1, 1], [], []>} : vector<8x128xf32>, vector<128x512xf32>, vector<8x512xf32> -> vector<8x512xf32>
    %38 = arith.addf %35, %37 : vector<8x512xf32>
    %39 = math.tanh %38 : vector<8x512xf32>
    %40 = vector.extract_strided_slice %39 {offsets = [0, 0], sizes = [8, 128], strides = [1, 1]} : vector<8x512xf32> to vector<8x128xf32>
    %cst_24 = arith.constant 5.000000e-01 : f32
    %41 = vector.broadcast %cst_24 : f32 to vector<8x128xf32>
    %42 = arith.mulf %41, %40 : vector<8x128xf32>
    %cst_25 = arith.constant 5.000000e-01 : f32
    %43 = vector.broadcast %cst_25 : f32 to vector<8x128xf32>
    %44 = arith.addf %42, %43 : vector<8x128xf32>
    %45 = vector.extract_strided_slice %39 {offsets = [0, 128], sizes = [8, 128], strides = [1, 1]} : vector<8x512xf32> to vector<8x128xf32>
    %cst_26 = arith.constant 5.000000e-01 : f32
    %46 = vector.broadcast %cst_26 : f32 to vector<8x128xf32>
    %47 = arith.mulf %46, %45 : vector<8x128xf32>
    %cst_27 = arith.constant 5.000000e-01 : f32
    %48 = vector.broadcast %cst_27 : f32 to vector<8x128xf32>
    %49 = arith.addf %47, %48 : vector<8x128xf32>
    %50 = vector.extract_strided_slice %39 {offsets = [0, 256], sizes = [8, 128], strides = [1, 1]} : vector<8x512xf32> to vector<8x128xf32>
    %51 = vector.extract_strided_slice %39 {offsets = [0, 384], sizes = [8, 128], strides = [1, 1]} : vector<8x512xf32> to vector<8x128xf32>
    %cst_28 = arith.constant 5.000000e-01 : f32
    %52 = vector.broadcast %cst_28 : f32 to vector<8x128xf32>
    %53 = arith.mulf %52, %51 : vector<8x128xf32>
    %cst_29 = arith.constant 5.000000e-01 : f32
    %54 = vector.broadcast %cst_29 : f32 to vector<8x128xf32>
    %55 = arith.addf %53, %54 : vector<8x128xf32>
    %56 = arith.mulf %49, %32 : vector<8x128xf32>
    %57 = arith.mulf %44, %50 : vector<8x128xf32>
    %58 = arith.addf %56, %57 : vector<8x128xf32>
    %59 = math.tanh %58 : vector<8x128xf32>
    %60 = arith.mulf %55, %59 : vector<8x128xf32>
    %c16 = arith.constant 16 : index
    %c0_30 = arith.constant 0 : index
    %61 = vector.load %arg10[%c16, %c0_30] : memref<64x512xf32, #tpu.memory_space<vmem>>, vector<8x512xf32>
    %c0_31 = arith.constant 0 : index
    %c0_32 = arith.constant 0 : index
    %62 = vector.load %arg2[%c0_31, %c0_32] : memref<128x512xf32, #tpu.memory_space<vmem>>, vector<128x512xf32>
    %cst_33 = arith.constant dense<0.000000e+00> : vector<8x512xf32>
    %63 = tpu.matmul %60, %62, %cst_33 {dimension_numbers = #tpu.dot_dimension_numbers<[1], [0], [0], [1], [0, 0, 1, 1], [], []>} : vector<8x128xf32>, vector<128x512xf32>, vector<8x512xf32> -> vector<8x512xf32>
    %64 = arith.addf %61, %63 : vector<8x512xf32>
    %65 = math.tanh %64 : vector<8x512xf32>
    %66 = vector.extract_strided_slice %65 {offsets = [0, 0], sizes = [8, 128], strides = [1, 1]} : vector<8x512xf32> to vector<8x128xf32>
    %cst_34 = arith.constant 5.000000e-01 : f32
    %67 = vector.broadcast %cst_34 : f32 to vector<8x128xf32>
    %68 = arith.mulf %67, %66 : vector<8x128xf32>
    %cst_35 = arith.constant 5.000000e-01 : f32
    %69 = vector.broadcast %cst_35 : f32 to vector<8x128xf32>
    %70 = arith.addf %68, %69 : vector<8x128xf32>
    %71 = vector.extract_strided_slice %65 {offsets = [0, 128], sizes = [8, 128], strides = [1, 1]} : vector<8x512xf32> to vector<8x128xf32>
    %cst_36 = arith.constant 5.000000e-01 : f32
    %72 = vector.broadcast %cst_36 : f32 to vector<8x128xf32>
    %73 = arith.mulf %72, %71 : vector<8x128xf32>
    %cst_37 = arith.constant 5.000000e-01 : f32
    %74 = vector.broadcast %cst_37 : f32 to vector<8x128xf32>
    %75 = arith.addf %73, %74 : vector<8x128xf32>
    %76 = vector.extract_strided_slice %65 {offsets = [0, 256], sizes = [8, 128], strides = [1, 1]} : vector<8x512xf32> to vector<8x128xf32>
    %77 = vector.extract_strided_slice %65 {offsets = [0, 384], sizes = [8, 128], strides = [1, 1]} : vector<8x512xf32> to vector<8x128xf32>
    %cst_38 = arith.constant 5.000000e-01 : f32
    %78 = vector.broadcast %cst_38 : f32 to vector<8x128xf32>
    %79 = arith.mulf %78, %77 : vector<8x128xf32>
    %cst_39 = arith.constant 5.000000e-01 : f32
    %80 = vector.broadcast %cst_39 : f32 to vector<8x128xf32>
    %81 = arith.addf %79, %80 : vector<8x128xf32>
    %82 = arith.mulf %75, %58 : vector<8x128xf32>
    %83 = arith.mulf %70, %76 : vector<8x128xf32>
    %84 = arith.addf %82, %83 : vector<8x128xf32>
    %85 = math.tanh %84 : vector<8x128xf32>
    %86 = arith.mulf %81, %85 : vector<8x128xf32>
    %c24 = arith.constant 24 : index
    %c0_40 = arith.constant 0 : index
    %87 = vector.load %arg10[%c24, %c0_40] : memref<64x512xf32, #tpu.memory_space<vmem>>, vector<8x512xf32>
    %c0_41 = arith.constant 0 : index
    %c0_42 = arith.constant 0 : index
    %88 = vector.load %arg2[%c0_41, %c0_42] : memref<128x512xf32, #tpu.memory_space<vmem>>, vector<128x512xf32>
    %cst_43 = arith.constant dense<0.000000e+00> : vector<8x512xf32>
    %89 = tpu.matmul %86, %88, %cst_43 {dimension_numbers = #tpu.dot_dimension_numbers<[1], [0], [0], [1], [0, 0, 1, 1], [], []>} : vector<8x128xf32>, vector<128x512xf32>, vector<8x512xf32> -> vector<8x512xf32>
    %90 = arith.addf %87, %89 : vector<8x512xf32>
    %91 = math.tanh %90 : vector<8x512xf32>
    %92 = vector.extract_strided_slice %91 {offsets = [0, 0], sizes = [8, 128], strides = [1, 1]} : vector<8x512xf32> to vector<8x128xf32>
    %cst_44 = arith.constant 5.000000e-01 : f32
    %93 = vector.broadcast %cst_44 : f32 to vector<8x128xf32>
    %94 = arith.mulf %93, %92 : vector<8x128xf32>
    %cst_45 = arith.constant 5.000000e-01 : f32
    %95 = vector.broadcast %cst_45 : f32 to vector<8x128xf32>
    %96 = arith.addf %94, %95 : vector<8x128xf32>
    %97 = vector.extract_strided_slice %91 {offsets = [0, 128], sizes = [8, 128], strides = [1, 1]} : vector<8x512xf32> to vector<8x128xf32>
    %cst_46 = arith.constant 5.000000e-01 : f32
    %98 = vector.broadcast %cst_46 : f32 to vector<8x128xf32>
    %99 = arith.mulf %98, %97 : vector<8x128xf32>
    %cst_47 = arith.constant 5.000000e-01 : f32
    %100 = vector.broadcast %cst_47 : f32 to vector<8x128xf32>
    %101 = arith.addf %99, %100 : vector<8x128xf32>
    %102 = vector.extract_strided_slice %91 {offsets = [0, 256], sizes = [8, 128], strides = [1, 1]} : vector<8x512xf32> to vector<8x128xf32>
    %103 = vector.extract_strided_slice %91 {offsets = [0, 384], sizes = [8, 128], strides = [1, 1]} : vector<8x512xf32> to vector<8x128xf32>
    %cst_48 = arith.constant 5.000000e-01 : f32
    %104 = vector.broadcast %cst_48 : f32 to vector<8x128xf32>
    %105 = arith.mulf %104, %103 : vector<8x128xf32>
    %cst_49 = arith.constant 5.000000e-01 : f32
    %106 = vector.broadcast %cst_49 : f32 to vector<8x128xf32>
    %107 = arith.addf %105, %106 : vector<8x128xf32>
    %108 = arith.mulf %101, %84 : vector<8x128xf32>
    %109 = arith.mulf %96, %102 : vector<8x128xf32>
    %110 = arith.addf %108, %109 : vector<8x128xf32>
    %111 = math.tanh %110 : vector<8x128xf32>
    %112 = arith.mulf %107, %111 : vector<8x128xf32>
    %c32 = arith.constant 32 : index
    %c0_50 = arith.constant 0 : index
    %113 = vector.load %arg10[%c32, %c0_50] : memref<64x512xf32, #tpu.memory_space<vmem>>, vector<8x512xf32>
    %c0_51 = arith.constant 0 : index
    %c0_52 = arith.constant 0 : index
    %114 = vector.load %arg2[%c0_51, %c0_52] : memref<128x512xf32, #tpu.memory_space<vmem>>, vector<128x512xf32>
    %cst_53 = arith.constant dense<0.000000e+00> : vector<8x512xf32>
    %115 = tpu.matmul %112, %114, %cst_53 {dimension_numbers = #tpu.dot_dimension_numbers<[1], [0], [0], [1], [0, 0, 1, 1], [], []>} : vector<8x128xf32>, vector<128x512xf32>, vector<8x512xf32> -> vector<8x512xf32>
    %116 = arith.addf %113, %115 : vector<8x512xf32>
    %117 = math.tanh %116 : vector<8x512xf32>
    %118 = vector.extract_strided_slice %117 {offsets = [0, 0], sizes = [8, 128], strides = [1, 1]} : vector<8x512xf32> to vector<8x128xf32>
    %cst_54 = arith.constant 5.000000e-01 : f32
    %119 = vector.broadcast %cst_54 : f32 to vector<8x128xf32>
    %120 = arith.mulf %119, %118 : vector<8x128xf32>
    %cst_55 = arith.constant 5.000000e-01 : f32
    %121 = vector.broadcast %cst_55 : f32 to vector<8x128xf32>
    %122 = arith.addf %120, %121 : vector<8x128xf32>
    %123 = vector.extract_strided_slice %117 {offsets = [0, 128], sizes = [8, 128], strides = [1, 1]} : vector<8x512xf32> to vector<8x128xf32>
    %cst_56 = arith.constant 5.000000e-01 : f32
    %124 = vector.broadcast %cst_56 : f32 to vector<8x128xf32>
    %125 = arith.mulf %124, %123 : vector<8x128xf32>
    %cst_57 = arith.constant 5.000000e-01 : f32
    %126 = vector.broadcast %cst_57 : f32 to vector<8x128xf32>
    %127 = arith.addf %125, %126 : vector<8x128xf32>
    %128 = vector.extract_strided_slice %117 {offsets = [0, 256], sizes = [8, 128], strides = [1, 1]} : vector<8x512xf32> to vector<8x128xf32>
    %129 = vector.extract_strided_slice %117 {offsets = [0, 384], sizes = [8, 128], strides = [1, 1]} : vector<8x512xf32> to vector<8x128xf32>
    %cst_58 = arith.constant 5.000000e-01 : f32
    %130 = vector.broadcast %cst_58 : f32 to vector<8x128xf32>
    %131 = arith.mulf %130, %129 : vector<8x128xf32>
    %cst_59 = arith.constant 5.000000e-01 : f32
    %132 = vector.broadcast %cst_59 : f32 to vector<8x128xf32>
    %133 = arith.addf %131, %132 : vector<8x128xf32>
    %134 = arith.mulf %127, %110 : vector<8x128xf32>
    %135 = arith.mulf %122, %128 : vector<8x128xf32>
    %136 = arith.addf %134, %135 : vector<8x128xf32>
    %137 = math.tanh %136 : vector<8x128xf32>
    %138 = arith.mulf %133, %137 : vector<8x128xf32>
    %c40 = arith.constant 40 : index
    %c0_60 = arith.constant 0 : index
    %139 = vector.load %arg10[%c40, %c0_60] : memref<64x512xf32, #tpu.memory_space<vmem>>, vector<8x512xf32>
    %c0_61 = arith.constant 0 : index
    %c0_62 = arith.constant 0 : index
    %140 = vector.load %arg2[%c0_61, %c0_62] : memref<128x512xf32, #tpu.memory_space<vmem>>, vector<128x512xf32>
    %cst_63 = arith.constant dense<0.000000e+00> : vector<8x512xf32>
    %141 = tpu.matmul %138, %140, %cst_63 {dimension_numbers = #tpu.dot_dimension_numbers<[1], [0], [0], [1], [0, 0, 1, 1], [], []>} : vector<8x128xf32>, vector<128x512xf32>, vector<8x512xf32> -> vector<8x512xf32>
    %142 = arith.addf %139, %141 : vector<8x512xf32>
    %143 = math.tanh %142 : vector<8x512xf32>
    %144 = vector.extract_strided_slice %143 {offsets = [0, 0], sizes = [8, 128], strides = [1, 1]} : vector<8x512xf32> to vector<8x128xf32>
    %cst_64 = arith.constant 5.000000e-01 : f32
    %145 = vector.broadcast %cst_64 : f32 to vector<8x128xf32>
    %146 = arith.mulf %145, %144 : vector<8x128xf32>
    %cst_65 = arith.constant 5.000000e-01 : f32
    %147 = vector.broadcast %cst_65 : f32 to vector<8x128xf32>
    %148 = arith.addf %146, %147 : vector<8x128xf32>
    %149 = vector.extract_strided_slice %143 {offsets = [0, 128], sizes = [8, 128], strides = [1, 1]} : vector<8x512xf32> to vector<8x128xf32>
    %cst_66 = arith.constant 5.000000e-01 : f32
    %150 = vector.broadcast %cst_66 : f32 to vector<8x128xf32>
    %151 = arith.mulf %150, %149 : vector<8x128xf32>
    %cst_67 = arith.constant 5.000000e-01 : f32
    %152 = vector.broadcast %cst_67 : f32 to vector<8x128xf32>
    %153 = arith.addf %151, %152 : vector<8x128xf32>
    %154 = vector.extract_strided_slice %143 {offsets = [0, 256], sizes = [8, 128], strides = [1, 1]} : vector<8x512xf32> to vector<8x128xf32>
    %155 = vector.extract_strided_slice %143 {offsets = [0, 384], sizes = [8, 128], strides = [1, 1]} : vector<8x512xf32> to vector<8x128xf32>
    %cst_68 = arith.constant 5.000000e-01 : f32
    %156 = vector.broadcast %cst_68 : f32 to vector<8x128xf32>
    %157 = arith.mulf %156, %155 : vector<8x128xf32>
    %cst_69 = arith.constant 5.000000e-01 : f32
    %158 = vector.broadcast %cst_69 : f32 to vector<8x128xf32>
    %159 = arith.addf %157, %158 : vector<8x128xf32>
    %160 = arith.mulf %153, %136 : vector<8x128xf32>
    %161 = arith.mulf %148, %154 : vector<8x128xf32>
    %162 = arith.addf %160, %161 : vector<8x128xf32>
    %163 = math.tanh %162 : vector<8x128xf32>
    %164 = arith.mulf %159, %163 : vector<8x128xf32>
    %c48 = arith.constant 48 : index
    %c0_70 = arith.constant 0 : index
    %165 = vector.load %arg10[%c48, %c0_70] : memref<64x512xf32, #tpu.memory_space<vmem>>, vector<8x512xf32>
    %c0_71 = arith.constant 0 : index
    %c0_72 = arith.constant 0 : index
    %166 = vector.load %arg2[%c0_71, %c0_72] : memref<128x512xf32, #tpu.memory_space<vmem>>, vector<128x512xf32>
    %cst_73 = arith.constant dense<0.000000e+00> : vector<8x512xf32>
    %167 = tpu.matmul %164, %166, %cst_73 {dimension_numbers = #tpu.dot_dimension_numbers<[1], [0], [0], [1], [0, 0, 1, 1], [], []>} : vector<8x128xf32>, vector<128x512xf32>, vector<8x512xf32> -> vector<8x512xf32>
    %168 = arith.addf %165, %167 : vector<8x512xf32>
    %169 = math.tanh %168 : vector<8x512xf32>
    %170 = vector.extract_strided_slice %169 {offsets = [0, 0], sizes = [8, 128], strides = [1, 1]} : vector<8x512xf32> to vector<8x128xf32>
    %cst_74 = arith.constant 5.000000e-01 : f32
    %171 = vector.broadcast %cst_74 : f32 to vector<8x128xf32>
    %172 = arith.mulf %171, %170 : vector<8x128xf32>
    %cst_75 = arith.constant 5.000000e-01 : f32
    %173 = vector.broadcast %cst_75 : f32 to vector<8x128xf32>
    %174 = arith.addf %172, %173 : vector<8x128xf32>
    %175 = vector.extract_strided_slice %169 {offsets = [0, 128], sizes = [8, 128], strides = [1, 1]} : vector<8x512xf32> to vector<8x128xf32>
    %cst_76 = arith.constant 5.000000e-01 : f32
    %176 = vector.broadcast %cst_76 : f32 to vector<8x128xf32>
    %177 = arith.mulf %176, %175 : vector<8x128xf32>
    %cst_77 = arith.constant 5.000000e-01 : f32
    %178 = vector.broadcast %cst_77 : f32 to vector<8x128xf32>
    %179 = arith.addf %177, %178 : vector<8x128xf32>
    %180 = vector.extract_strided_slice %169 {offsets = [0, 256], sizes = [8, 128], strides = [1, 1]} : vector<8x512xf32> to vector<8x128xf32>
    %181 = vector.extract_strided_slice %169 {offsets = [0, 384], sizes = [8, 128], strides = [1, 1]} : vector<8x512xf32> to vector<8x128xf32>
    %cst_78 = arith.constant 5.000000e-01 : f32
    %182 = vector.broadcast %cst_78 : f32 to vector<8x128xf32>
    %183 = arith.mulf %182, %181 : vector<8x128xf32>
    %cst_79 = arith.constant 5.000000e-01 : f32
    %184 = vector.broadcast %cst_79 : f32 to vector<8x128xf32>
    %185 = arith.addf %183, %184 : vector<8x128xf32>
    %186 = arith.mulf %179, %162 : vector<8x128xf32>
    %187 = arith.mulf %174, %180 : vector<8x128xf32>
    %188 = arith.addf %186, %187 : vector<8x128xf32>
    %189 = math.tanh %188 : vector<8x128xf32>
    %190 = arith.mulf %185, %189 : vector<8x128xf32>
    %c56 = arith.constant 56 : index
    %c0_80 = arith.constant 0 : index
    %191 = vector.load %arg10[%c56, %c0_80] : memref<64x512xf32, #tpu.memory_space<vmem>>, vector<8x512xf32>
    %c0_81 = arith.constant 0 : index
    %c0_82 = arith.constant 0 : index
    %192 = vector.load %arg2[%c0_81, %c0_82] : memref<128x512xf32, #tpu.memory_space<vmem>>, vector<128x512xf32>
    %cst_83 = arith.constant dense<0.000000e+00> : vector<8x512xf32>
    %193 = tpu.matmul %190, %192, %cst_83 {dimension_numbers = #tpu.dot_dimension_numbers<[1], [0], [0], [1], [0, 0, 1, 1], [], []>} : vector<8x128xf32>, vector<128x512xf32>, vector<8x512xf32> -> vector<8x512xf32>
    %194 = arith.addf %191, %193 : vector<8x512xf32>
    %195 = math.tanh %194 : vector<8x512xf32>
    %196 = vector.extract_strided_slice %195 {offsets = [0, 0], sizes = [8, 128], strides = [1, 1]} : vector<8x512xf32> to vector<8x128xf32>
    %cst_84 = arith.constant 5.000000e-01 : f32
    %197 = vector.broadcast %cst_84 : f32 to vector<8x128xf32>
    %198 = arith.mulf %197, %196 : vector<8x128xf32>
    %cst_85 = arith.constant 5.000000e-01 : f32
    %199 = vector.broadcast %cst_85 : f32 to vector<8x128xf32>
    %200 = arith.addf %198, %199 : vector<8x128xf32>
    %201 = vector.extract_strided_slice %195 {offsets = [0, 128], sizes = [8, 128], strides = [1, 1]} : vector<8x512xf32> to vector<8x128xf32>
    %cst_86 = arith.constant 5.000000e-01 : f32
    %202 = vector.broadcast %cst_86 : f32 to vector<8x128xf32>
    %203 = arith.mulf %202, %201 : vector<8x128xf32>
    %cst_87 = arith.constant 5.000000e-01 : f32
    %204 = vector.broadcast %cst_87 : f32 to vector<8x128xf32>
    %205 = arith.addf %203, %204 : vector<8x128xf32>
    %206 = vector.extract_strided_slice %195 {offsets = [0, 256], sizes = [8, 128], strides = [1, 1]} : vector<8x512xf32> to vector<8x128xf32>
    %207 = vector.extract_strided_slice %195 {offsets = [0, 384], sizes = [8, 128], strides = [1, 1]} : vector<8x512xf32> to vector<8x128xf32>
    %cst_88 = arith.constant 5.000000e-01 : f32
    %208 = vector.broadcast %cst_88 : f32 to vector<8x128xf32>
    %209 = arith.mulf %208, %207 : vector<8x128xf32>
    %cst_89 = arith.constant 5.000000e-01 : f32
    %210 = vector.broadcast %cst_89 : f32 to vector<8x128xf32>
    %211 = arith.addf %209, %210 : vector<8x128xf32>
    %212 = arith.mulf %205, %188 : vector<8x128xf32>
    %213 = arith.mulf %200, %206 : vector<8x128xf32>
    %214 = arith.addf %212, %213 : vector<8x128xf32>
    %215 = math.tanh %214 : vector<8x128xf32>
    %216 = arith.mulf %211, %215 : vector<8x128xf32>
    %c56_90 = arith.constant 56 : index
    %c0_91 = arith.constant 0 : index
    %217 = vector.load %arg0[%c56_90, %c0_91] : memref<64x16xf32, #tpu.memory_space<vmem>>, vector<8x16xf32>
    %c0_92 = arith.constant 0 : index
    %c0_93 = arith.constant 0 : index
    %218 = vector.load %arg4[%c0_92, %c0_93] : memref<16x512xf32, #tpu.memory_space<vmem>>, vector<16x512xf32>
    %cst_94 = arith.constant dense<0.000000e+00> : vector<8x512xf32>
    %219 = tpu.matmul %217, %218, %cst_94 {dimension_numbers = #tpu.dot_dimension_numbers<[1], [0], [0], [1], [0, 0, 1, 1], [], []>} : vector<8x16xf32>, vector<16x512xf32>, vector<8x512xf32> -> vector<8x512xf32>
    %c0_95 = arith.constant 0 : index
    %c0_96 = arith.constant 0 : index
    %220 = vector.load %arg6[%c0_95, %c0_96] : memref<1x512xf32, #tpu.memory_space<vmem>>, vector<1x512xf32>
    %221 = vector.broadcast %220 : vector<1x512xf32> to vector<8x512xf32>
    %222 = arith.addf %219, %221 : vector<8x512xf32>
    %c0_97 = arith.constant 0 : index
    %c0_98 = arith.constant 0 : index
    %223 = vector.load %arg5[%c0_97, %c0_98] : memref<128x512xf32, #tpu.memory_space<vmem>>, vector<128x512xf32>
    %cst_99 = arith.constant dense<0.000000e+00> : vector<8x512xf32>
    %224 = tpu.matmul %216, %223, %cst_99 {dimension_numbers = #tpu.dot_dimension_numbers<[1], [0], [0], [1], [0, 0, 1, 1], [], []>} : vector<8x128xf32>, vector<128x512xf32>, vector<8x512xf32> -> vector<8x512xf32>
    %225 = arith.addf %222, %224 : vector<8x512xf32>
    %226 = math.tanh %225 : vector<8x512xf32>
    %227 = vector.extract_strided_slice %226 {offsets = [0, 0], sizes = [8, 128], strides = [1, 1]} : vector<8x512xf32> to vector<8x128xf32>
    %cst_100 = arith.constant 5.000000e-01 : f32
    %228 = vector.broadcast %cst_100 : f32 to vector<8x128xf32>
    %229 = arith.mulf %228, %227 : vector<8x128xf32>
    %cst_101 = arith.constant 5.000000e-01 : f32
    %230 = vector.broadcast %cst_101 : f32 to vector<8x128xf32>
    %231 = arith.addf %229, %230 : vector<8x128xf32>
    %232 = vector.extract_strided_slice %226 {offsets = [0, 128], sizes = [8, 128], strides = [1, 1]} : vector<8x512xf32> to vector<8x128xf32>
    %cst_102 = arith.constant 5.000000e-01 : f32
    %233 = vector.broadcast %cst_102 : f32 to vector<8x128xf32>
    %234 = arith.mulf %233, %232 : vector<8x128xf32>
    %cst_103 = arith.constant 5.000000e-01 : f32
    %235 = vector.broadcast %cst_103 : f32 to vector<8x128xf32>
    %236 = arith.addf %234, %235 : vector<8x128xf32>
    %237 = vector.extract_strided_slice %226 {offsets = [0, 256], sizes = [8, 128], strides = [1, 1]} : vector<8x512xf32> to vector<8x128xf32>
    %238 = vector.extract_strided_slice %226 {offsets = [0, 384], sizes = [8, 128], strides = [1, 1]} : vector<8x512xf32> to vector<8x128xf32>
    %cst_104 = arith.constant 5.000000e-01 : f32
    %239 = vector.broadcast %cst_104 : f32 to vector<8x128xf32>
    %240 = arith.mulf %239, %238 : vector<8x128xf32>
    %cst_105 = arith.constant 5.000000e-01 : f32
    %241 = vector.broadcast %cst_105 : f32 to vector<8x128xf32>
    %242 = arith.addf %240, %241 : vector<8x128xf32>
    %243 = arith.mulf %236, %214 : vector<8x128xf32>
    %244 = arith.mulf %231, %237 : vector<8x128xf32>
    %245 = arith.addf %243, %244 : vector<8x128xf32>
    %246 = math.tanh %245 : vector<8x128xf32>
    %247 = arith.mulf %242, %246 : vector<8x128xf32>
    %c0_106 = arith.constant 0 : index
    %c0_107 = arith.constant 0 : index
    %248 = vector.load %arg11[%c0_106, %c0_107] : memref<8x1024xf32, #tpu.memory_space<vmem>>, vector<8x128xf32>
    tpu.vector_store %arg11[%c0_106, %c0_107], %247 {strides = array<i32>} : memref<8x1024xf32, #tpu.memory_space<vmem>>, vector<8x128xf32>,
    %c0_108 = arith.constant 0 : index
    %c0_109 = arith.constant 0 : index
    %249 = vector.load %arg5[%c0_108, %c0_109] : memref<128x512xf32, #tpu.memory_space<vmem>>, vector<128x512xf32>
    %cst_110 = arith.constant dense<0.000000e+00> : vector<8x512xf32>
    %250 = tpu.matmul %247, %249, %cst_110 {dimension_numbers = #tpu.dot_dimension_numbers<[1], [0], [0], [1], [0, 0, 1, 1], [], []>} : vector<8x128xf32>, vector<128x512xf32>, vector<8x512xf32> -> vector<8x512xf32>
    %251 = arith.addf %222, %250 : vector<8x512xf32>
    %252 = math.tanh %251 : vector<8x512xf32>
    %253 = vector.extract_strided_slice %252 {offsets = [0, 0], sizes = [8, 128], strides = [1, 1]} : vector<8x512xf32> to vector<8x128xf32>
    %cst_111 = arith.constant 5.000000e-01 : f32
    %254 = vector.broadcast %cst_111 : f32 to vector<8x128xf32>
    %255 = arith.mulf %254, %253 : vector<8x128xf32>
    %cst_112 = arith.constant 5.000000e-01 : f32
    %256 = vector.broadcast %cst_112 : f32 to vector<8x128xf32>
    %257 = arith.addf %255, %256 : vector<8x128xf32>
    %258 = vector.extract_strided_slice %252 {offsets = [0, 128], sizes = [8, 128], strides = [1, 1]} : vector<8x512xf32> to vector<8x128xf32>
    %cst_113 = arith.constant 5.000000e-01 : f32
    %259 = vector.broadcast %cst_113 : f32 to vector<8x128xf32>
    %260 = arith.mulf %259, %258 : vector<8x128xf32>
    %cst_114 = arith.constant 5.000000e-01 : f32
    %261 = vector.broadcast %cst_114 : f32 to vector<8x128xf32>
    %262 = arith.addf %260, %261 : vector<8x128xf32>
    %263 = vector.extract_strided_slice %252 {offsets = [0, 256], sizes = [8, 128], strides = [1, 1]} : vector<8x512xf32> to vector<8x128xf32>
    %264 = vector.extract_strided_slice %252 {offsets = [0, 384], sizes = [8, 128], strides = [1, 1]} : vector<8x512xf32> to vector<8x128xf32>
    %cst_115 = arith.constant 5.000000e-01 : f32
    %265 = vector.broadcast %cst_115 : f32 to vector<8x128xf32>
    %266 = arith.mulf %265, %264 : vector<8x128xf32>
    %cst_116 = arith.constant 5.000000e-01 : f32
    %267 = vector.broadcast %cst_116 : f32 to vector<8x128xf32>
    %268 = arith.addf %266, %267 : vector<8x128xf32>
    %269 = arith.mulf %262, %245 : vector<8x128xf32>
    %270 = arith.mulf %257, %263 : vector<8x128xf32>
    %271 = arith.addf %269, %270 : vector<8x128xf32>
    %272 = math.tanh %271 : vector<8x128xf32>
    %273 = arith.mulf %268, %272 : vector<8x128xf32>
    %c0_117 = arith.constant 0 : index
    %c128 = arith.constant 128 : index
    %274 = vector.load %arg11[%c0_117, %c128] : memref<8x1024xf32, #tpu.memory_space<vmem>>, vector<8x128xf32>
    tpu.vector_store %arg11[%c0_117, %c128], %273 {strides = array<i32>} : memref<8x1024xf32, #tpu.memory_space<vmem>>, vector<8x128xf32>,
    %c0_118 = arith.constant 0 : index
    %c0_119 = arith.constant 0 : index
    %275 = vector.load %arg5[%c0_118, %c0_119] : memref<128x512xf32, #tpu.memory_space<vmem>>, vector<128x512xf32>
    %cst_120 = arith.constant dense<0.000000e+00> : vector<8x512xf32>
    %276 = tpu.matmul %273, %275, %cst_120 {dimension_numbers = #tpu.dot_dimension_numbers<[1], [0], [0], [1], [0, 0, 1, 1], [], []>} : vector<8x128xf32>, vector<128x512xf32>, vector<8x512xf32> -> vector<8x512xf32>
    %277 = arith.addf %222, %276 : vector<8x512xf32>
    %278 = math.tanh %277 : vector<8x512xf32>
    %279 = vector.extract_strided_slice %278 {offsets = [0, 0], sizes = [8, 128], strides = [1, 1]} : vector<8x512xf32> to vector<8x128xf32>
    %cst_121 = arith.constant 5.000000e-01 : f32
    %280 = vector.broadcast %cst_121 : f32 to vector<8x128xf32>
    %281 = arith.mulf %280, %279 : vector<8x128xf32>
    %cst_122 = arith.constant 5.000000e-01 : f32
    %282 = vector.broadcast %cst_122 : f32 to vector<8x128xf32>
    %283 = arith.addf %281, %282 : vector<8x128xf32>
    %284 = vector.extract_strided_slice %278 {offsets = [0, 128], sizes = [8, 128], strides = [1, 1]} : vector<8x512xf32> to vector<8x128xf32>
    %cst_123 = arith.constant 5.000000e-01 : f32
    %285 = vector.broadcast %cst_123 : f32 to vector<8x128xf32>
    %286 = arith.mulf %285, %284 : vector<8x128xf32>
    %cst_124 = arith.constant 5.000000e-01 : f32
    %287 = vector.broadcast %cst_124 : f32 to vector<8x128xf32>
    %288 = arith.addf %286, %287 : vector<8x128xf32>
    %289 = vector.extract_strided_slice %278 {offsets = [0, 256], sizes = [8, 128], strides = [1, 1]} : vector<8x512xf32> to vector<8x128xf32>
    %290 = vector.extract_strided_slice %278 {offsets = [0, 384], sizes = [8, 128], strides = [1, 1]} : vector<8x512xf32> to vector<8x128xf32>
    %cst_125 = arith.constant 5.000000e-01 : f32
    %291 = vector.broadcast %cst_125 : f32 to vector<8x128xf32>
    %292 = arith.mulf %291, %290 : vector<8x128xf32>
    %cst_126 = arith.constant 5.000000e-01 : f32
    %293 = vector.broadcast %cst_126 : f32 to vector<8x128xf32>
    %294 = arith.addf %292, %293 : vector<8x128xf32>
    %295 = arith.mulf %288, %271 : vector<8x128xf32>
    %296 = arith.mulf %283, %289 : vector<8x128xf32>
    %297 = arith.addf %295, %296 : vector<8x128xf32>
    %298 = math.tanh %297 : vector<8x128xf32>
    %299 = arith.mulf %294, %298 : vector<8x128xf32>
    %c0_127 = arith.constant 0 : index
    %c256 = arith.constant 256 : index
    %300 = vector.load %arg11[%c0_127, %c256] : memref<8x1024xf32, #tpu.memory_space<vmem>>, vector<8x128xf32>
    tpu.vector_store %arg11[%c0_127, %c256], %299 {strides = array<i32>} : memref<8x1024xf32, #tpu.memory_space<vmem>>, vector<8x128xf32>,
    %c0_128 = arith.constant 0 : index
    %c0_129 = arith.constant 0 : index
    %301 = vector.load %arg5[%c0_128, %c0_129] : memref<128x512xf32, #tpu.memory_space<vmem>>, vector<128x512xf32>
    %cst_130 = arith.constant dense<0.000000e+00> : vector<8x512xf32>
    %302 = tpu.matmul %299, %301, %cst_130 {dimension_numbers = #tpu.dot_dimension_numbers<[1], [0], [0], [1], [0, 0, 1, 1], [], []>} : vector<8x128xf32>, vector<128x512xf32>, vector<8x512xf32> -> vector<8x512xf32>
    %303 = arith.addf %222, %302 : vector<8x512xf32>
    %304 = math.tanh %303 : vector<8x512xf32>
    %305 = vector.extract_strided_slice %304 {offsets = [0, 0], sizes = [8, 128], strides = [1, 1]} : vector<8x512xf32> to vector<8x128xf32>
    %cst_131 = arith.constant 5.000000e-01 : f32
    %306 = vector.broadcast %cst_131 : f32 to vector<8x128xf32>
    %307 = arith.mulf %306, %305 : vector<8x128xf32>
    %cst_132 = arith.constant 5.000000e-01 : f32
    %308 = vector.broadcast %cst_132 : f32 to vector<8x128xf32>
    %309 = arith.addf %307, %308 : vector<8x128xf32>
    %310 = vector.extract_strided_slice %304 {offsets = [0, 128], sizes = [8, 128], strides = [1, 1]} : vector<8x512xf32> to vector<8x128xf32>
    %cst_133 = arith.constant 5.000000e-01 : f32
    %311 = vector.broadcast %cst_133 : f32 to vector<8x128xf32>
    %312 = arith.mulf %311, %310 : vector<8x128xf32>
    %cst_134 = arith.constant 5.000000e-01 : f32
    %313 = vector.broadcast %cst_134 : f32 to vector<8x128xf32>
    %314 = arith.addf %312, %313 : vector<8x128xf32>
    %315 = vector.extract_strided_slice %304 {offsets = [0, 256], sizes = [8, 128], strides = [1, 1]} : vector<8x512xf32> to vector<8x128xf32>
    %316 = vector.extract_strided_slice %304 {offsets = [0, 384], sizes = [8, 128], strides = [1, 1]} : vector<8x512xf32> to vector<8x128xf32>
    %cst_135 = arith.constant 5.000000e-01 : f32
    %317 = vector.broadcast %cst_135 : f32 to vector<8x128xf32>
    %318 = arith.mulf %317, %316 : vector<8x128xf32>
    %cst_136 = arith.constant 5.000000e-01 : f32
    %319 = vector.broadcast %cst_136 : f32 to vector<8x128xf32>
    %320 = arith.addf %318, %319 : vector<8x128xf32>
    %321 = arith.mulf %314, %297 : vector<8x128xf32>
    %322 = arith.mulf %309, %315 : vector<8x128xf32>
    %323 = arith.addf %321, %322 : vector<8x128xf32>
    %324 = math.tanh %323 : vector<8x128xf32>
    %325 = arith.mulf %320, %324 : vector<8x128xf32>
    %c0_137 = arith.constant 0 : index
    %c384 = arith.constant 384 : index
    %326 = vector.load %arg11[%c0_137, %c384] : memref<8x1024xf32, #tpu.memory_space<vmem>>, vector<8x128xf32>
    tpu.vector_store %arg11[%c0_137, %c384], %325 {strides = array<i32>} : memref<8x1024xf32, #tpu.memory_space<vmem>>, vector<8x128xf32>,
    %c0_138 = arith.constant 0 : index
    %c0_139 = arith.constant 0 : index
    %327 = vector.load %arg5[%c0_138, %c0_139] : memref<128x512xf32, #tpu.memory_space<vmem>>, vector<128x512xf32>
    %cst_140 = arith.constant dense<0.000000e+00> : vector<8x512xf32>
    %328 = tpu.matmul %325, %327, %cst_140 {dimension_numbers = #tpu.dot_dimension_numbers<[1], [0], [0], [1], [0, 0, 1, 1], [], []>} : vector<8x128xf32>, vector<128x512xf32>, vector<8x512xf32> -> vector<8x512xf32>
    %329 = arith.addf %222, %328 : vector<8x512xf32>
    %330 = math.tanh %329 : vector<8x512xf32>
    %331 = vector.extract_strided_slice %330 {offsets = [0, 0], sizes = [8, 128], strides = [1, 1]} : vector<8x512xf32> to vector<8x128xf32>
    %cst_141 = arith.constant 5.000000e-01 : f32
    %332 = vector.broadcast %cst_141 : f32 to vector<8x128xf32>
    %333 = arith.mulf %332, %331 : vector<8x128xf32>
    %cst_142 = arith.constant 5.000000e-01 : f32
    %334 = vector.broadcast %cst_142 : f32 to vector<8x128xf32>
    %335 = arith.addf %333, %334 : vector<8x128xf32>
    %336 = vector.extract_strided_slice %330 {offsets = [0, 128], sizes = [8, 128], strides = [1, 1]} : vector<8x512xf32> to vector<8x128xf32>
    %cst_143 = arith.constant 5.000000e-01 : f32
    %337 = vector.broadcast %cst_143 : f32 to vector<8x128xf32>
    %338 = arith.mulf %337, %336 : vector<8x128xf32>
    %cst_144 = arith.constant 5.000000e-01 : f32
    %339 = vector.broadcast %cst_144 : f32 to vector<8x128xf32>
    %340 = arith.addf %338, %339 : vector<8x128xf32>
    %341 = vector.extract_strided_slice %330 {offsets = [0, 256], sizes = [8, 128], strides = [1, 1]} : vector<8x512xf32> to vector<8x128xf32>
    %342 = vector.extract_strided_slice %330 {offsets = [0, 384], sizes = [8, 128], strides = [1, 1]} : vector<8x512xf32> to vector<8x128xf32>
    %cst_145 = arith.constant 5.000000e-01 : f32
    %343 = vector.broadcast %cst_145 : f32 to vector<8x128xf32>
    %344 = arith.mulf %343, %342 : vector<8x128xf32>
    %cst_146 = arith.constant 5.000000e-01 : f32
    %345 = vector.broadcast %cst_146 : f32 to vector<8x128xf32>
    %346 = arith.addf %344, %345 : vector<8x128xf32>
    %347 = arith.mulf %340, %323 : vector<8x128xf32>
    %348 = arith.mulf %335, %341 : vector<8x128xf32>
    %349 = arith.addf %347, %348 : vector<8x128xf32>
    %350 = math.tanh %349 : vector<8x128xf32>
    %351 = arith.mulf %346, %350 : vector<8x128xf32>
    %c0_147 = arith.constant 0 : index
    %c512 = arith.constant 512 : index
    %352 = vector.load %arg11[%c0_147, %c512] : memref<8x1024xf32, #tpu.memory_space<vmem>>, vector<8x128xf32>
    tpu.vector_store %arg11[%c0_147, %c512], %351 {strides = array<i32>} : memref<8x1024xf32, #tpu.memory_space<vmem>>, vector<8x128xf32>,
    %c0_148 = arith.constant 0 : index
    %c0_149 = arith.constant 0 : index
    %353 = vector.load %arg5[%c0_148, %c0_149] : memref<128x512xf32, #tpu.memory_space<vmem>>, vector<128x512xf32>
    %cst_150 = arith.constant dense<0.000000e+00> : vector<8x512xf32>
    %354 = tpu.matmul %351, %353, %cst_150 {dimension_numbers = #tpu.dot_dimension_numbers<[1], [0], [0], [1], [0, 0, 1, 1], [], []>} : vector<8x128xf32>, vector<128x512xf32>, vector<8x512xf32> -> vector<8x512xf32>
    %355 = arith.addf %222, %354 : vector<8x512xf32>
    %356 = math.tanh %355 : vector<8x512xf32>
    %357 = vector.extract_strided_slice %356 {offsets = [0, 0], sizes = [8, 128], strides = [1, 1]} : vector<8x512xf32> to vector<8x128xf32>
    %cst_151 = arith.constant 5.000000e-01 : f32
    %358 = vector.broadcast %cst_151 : f32 to vector<8x128xf32>
    %359 = arith.mulf %358, %357 : vector<8x128xf32>
    %cst_152 = arith.constant 5.000000e-01 : f32
    %360 = vector.broadcast %cst_152 : f32 to vector<8x128xf32>
    %361 = arith.addf %359, %360 : vector<8x128xf32>
    %362 = vector.extract_strided_slice %356 {offsets = [0, 128], sizes = [8, 128], strides = [1, 1]} : vector<8x512xf32> to vector<8x128xf32>
    %cst_153 = arith.constant 5.000000e-01 : f32
    %363 = vector.broadcast %cst_153 : f32 to vector<8x128xf32>
    %364 = arith.mulf %363, %362 : vector<8x128xf32>
    %cst_154 = arith.constant 5.000000e-01 : f32
    %365 = vector.broadcast %cst_154 : f32 to vector<8x128xf32>
    %366 = arith.addf %364, %365 : vector<8x128xf32>
    %367 = vector.extract_strided_slice %356 {offsets = [0, 256], sizes = [8, 128], strides = [1, 1]} : vector<8x512xf32> to vector<8x128xf32>
    %368 = vector.extract_strided_slice %356 {offsets = [0, 384], sizes = [8, 128], strides = [1, 1]} : vector<8x512xf32> to vector<8x128xf32>
    %cst_155 = arith.constant 5.000000e-01 : f32
    %369 = vector.broadcast %cst_155 : f32 to vector<8x128xf32>
    %370 = arith.mulf %369, %368 : vector<8x128xf32>
    %cst_156 = arith.constant 5.000000e-01 : f32
    %371 = vector.broadcast %cst_156 : f32 to vector<8x128xf32>
    %372 = arith.addf %370, %371 : vector<8x128xf32>
    %373 = arith.mulf %366, %349 : vector<8x128xf32>
    %374 = arith.mulf %361, %367 : vector<8x128xf32>
    %375 = arith.addf %373, %374 : vector<8x128xf32>
    %376 = math.tanh %375 : vector<8x128xf32>
    %377 = arith.mulf %372, %376 : vector<8x128xf32>
    %c0_157 = arith.constant 0 : index
    %c640 = arith.constant 640 : index
    %378 = vector.load %arg11[%c0_157, %c640] : memref<8x1024xf32, #tpu.memory_space<vmem>>, vector<8x128xf32>
    tpu.vector_store %arg11[%c0_157, %c640], %377 {strides = array<i32>} : memref<8x1024xf32, #tpu.memory_space<vmem>>, vector<8x128xf32>,
    %c0_158 = arith.constant 0 : index
    %c0_159 = arith.constant 0 : index
    %379 = vector.load %arg5[%c0_158, %c0_159] : memref<128x512xf32, #tpu.memory_space<vmem>>, vector<128x512xf32>
    %cst_160 = arith.constant dense<0.000000e+00> : vector<8x512xf32>
    %380 = tpu.matmul %377, %379, %cst_160 {dimension_numbers = #tpu.dot_dimension_numbers<[1], [0], [0], [1], [0, 0, 1, 1], [], []>} : vector<8x128xf32>, vector<128x512xf32>, vector<8x512xf32> -> vector<8x512xf32>
    %381 = arith.addf %222, %380 : vector<8x512xf32>
    %382 = math.tanh %381 : vector<8x512xf32>
    %383 = vector.extract_strided_slice %382 {offsets = [0, 0], sizes = [8, 128], strides = [1, 1]} : vector<8x512xf32> to vector<8x128xf32>
    %cst_161 = arith.constant 5.000000e-01 : f32
    %384 = vector.broadcast %cst_161 : f32 to vector<8x128xf32>
    %385 = arith.mulf %384, %383 : vector<8x128xf32>
    %cst_162 = arith.constant 5.000000e-01 : f32
    %386 = vector.broadcast %cst_162 : f32 to vector<8x128xf32>
    %387 = arith.addf %385, %386 : vector<8x128xf32>
    %388 = vector.extract_strided_slice %382 {offsets = [0, 128], sizes = [8, 128], strides = [1, 1]} : vector<8x512xf32> to vector<8x128xf32>
    %cst_163 = arith.constant 5.000000e-01 : f32
    %389 = vector.broadcast %cst_163 : f32 to vector<8x128xf32>
    %390 = arith.mulf %389, %388 : vector<8x128xf32>
    %cst_164 = arith.constant 5.000000e-01 : f32
    %391 = vector.broadcast %cst_164 : f32 to vector<8x128xf32>
    %392 = arith.addf %390, %391 : vector<8x128xf32>
    %393 = vector.extract_strided_slice %382 {offsets = [0, 256], sizes = [8, 128], strides = [1, 1]} : vector<8x512xf32> to vector<8x128xf32>
    %394 = vector.extract_strided_slice %382 {offsets = [0, 384], sizes = [8, 128], strides = [1, 1]} : vector<8x512xf32> to vector<8x128xf32>
    %cst_165 = arith.constant 5.000000e-01 : f32
    %395 = vector.broadcast %cst_165 : f32 to vector<8x128xf32>
    %396 = arith.mulf %395, %394 : vector<8x128xf32>
    %cst_166 = arith.constant 5.000000e-01 : f32
    %397 = vector.broadcast %cst_166 : f32 to vector<8x128xf32>
    %398 = arith.addf %396, %397 : vector<8x128xf32>
    %399 = arith.mulf %392, %375 : vector<8x128xf32>
    %400 = arith.mulf %387, %393 : vector<8x128xf32>
    %401 = arith.addf %399, %400 : vector<8x128xf32>
    %402 = math.tanh %401 : vector<8x128xf32>
    %403 = arith.mulf %398, %402 : vector<8x128xf32>
    %c0_167 = arith.constant 0 : index
    %c768 = arith.constant 768 : index
    %404 = vector.load %arg11[%c0_167, %c768] : memref<8x1024xf32, #tpu.memory_space<vmem>>, vector<8x128xf32>
    tpu.vector_store %arg11[%c0_167, %c768], %403 {strides = array<i32>} : memref<8x1024xf32, #tpu.memory_space<vmem>>, vector<8x128xf32>,
    %c0_168 = arith.constant 0 : index
    %c0_169 = arith.constant 0 : index
    %405 = vector.load %arg5[%c0_168, %c0_169] : memref<128x512xf32, #tpu.memory_space<vmem>>, vector<128x512xf32>
    %cst_170 = arith.constant dense<0.000000e+00> : vector<8x512xf32>
    %406 = tpu.matmul %403, %405, %cst_170 {dimension_numbers = #tpu.dot_dimension_numbers<[1], [0], [0], [1], [0, 0, 1, 1], [], []>} : vector<8x128xf32>, vector<128x512xf32>, vector<8x512xf32> -> vector<8x512xf32>
    %407 = arith.addf %222, %406 : vector<8x512xf32>
    %408 = math.tanh %407 : vector<8x512xf32>
    %409 = vector.extract_strided_slice %408 {offsets = [0, 0], sizes = [8, 128], strides = [1, 1]} : vector<8x512xf32> to vector<8x128xf32>
    %cst_171 = arith.constant 5.000000e-01 : f32
    %410 = vector.broadcast %cst_171 : f32 to vector<8x128xf32>
    %411 = arith.mulf %410, %409 : vector<8x128xf32>
    %cst_172 = arith.constant 5.000000e-01 : f32
    %412 = vector.broadcast %cst_172 : f32 to vector<8x128xf32>
    %413 = arith.addf %411, %412 : vector<8x128xf32>
    %414 = vector.extract_strided_slice %408 {offsets = [0, 128], sizes = [8, 128], strides = [1, 1]} : vector<8x512xf32> to vector<8x128xf32>
    %cst_173 = arith.constant 5.000000e-01 : f32
    %415 = vector.broadcast %cst_173 : f32 to vector<8x128xf32>
    %416 = arith.mulf %415, %414 : vector<8x128xf32>
    %cst_174 = arith.constant 5.000000e-01 : f32
    %417 = vector.broadcast %cst_174 : f32 to vector<8x128xf32>
    %418 = arith.addf %416, %417 : vector<8x128xf32>
    %419 = vector.extract_strided_slice %408 {offsets = [0, 256], sizes = [8, 128], strides = [1, 1]} : vector<8x512xf32> to vector<8x128xf32>
    %420 = vector.extract_strided_slice %408 {offsets = [0, 384], sizes = [8, 128], strides = [1, 1]} : vector<8x512xf32> to vector<8x128xf32>
    %cst_175 = arith.constant 5.000000e-01 : f32
    %421 = vector.broadcast %cst_175 : f32 to vector<8x128xf32>
    %422 = arith.mulf %421, %420 : vector<8x128xf32>
    %cst_176 = arith.constant 5.000000e-01 : f32
    %423 = vector.broadcast %cst_176 : f32 to vector<8x128xf32>
    %424 = arith.addf %422, %423 : vector<8x128xf32>
    %425 = arith.mulf %418, %401 : vector<8x128xf32>
    %426 = arith.mulf %413, %419 : vector<8x128xf32>
    %427 = arith.addf %425, %426 : vector<8x128xf32>
    %428 = math.tanh %427 : vector<8x128xf32>
    %429 = arith.mulf %424, %428 : vector<8x128xf32>
    %c0_177 = arith.constant 0 : index
    %c896 = arith.constant 896 : index
    %430 = vector.load %arg11[%c0_177, %c896] : memref<8x1024xf32, #tpu.memory_space<vmem>>, vector<8x128xf32>
    tpu.vector_store %arg11[%c0_177, %c896], %429 {strides = array<i32>} : memref<8x1024xf32, #tpu.memory_space<vmem>>, vector<8x128xf32>,
    %c0_178 = arith.constant 0 : index
    %c0_179 = arith.constant 0 : index
    %431 = vector.load %arg11[%c0_178, %c0_179] : memref<8x1024xf32, #tpu.memory_space<vmem>>, vector<8x1024xf32>
    %c0_180 = arith.constant 0 : index
    %c0_181 = arith.constant 0 : index
    %432 = vector.load %arg7[%c0_180, %c0_181] : memref<1024x128xf32, #tpu.memory_space<vmem>>, vector<1024x128xf32>
    %cst_182 = arith.constant dense<0.000000e+00> : vector<8x128xf32>
    %433 = tpu.matmul %431, %432, %cst_182 {dimension_numbers = #tpu.dot_dimension_numbers<[1], [0], [0], [1], [0, 0, 1, 1], [], []>} : vector<8x1024xf32>, vector<1024x128xf32>, vector<8x128xf32> -> vector<8x128xf32>
    %c0_183 = arith.constant 0 : index
    %c0_184 = arith.constant 0 : index
    %434 = vector.load %arg8[%c0_183, %c0_184] : memref<1x128xf32, #tpu.memory_space<vmem>>, vector<1x128xf32>
    %435 = vector.broadcast %434 : vector<1x128xf32> to vector<8x128xf32>
    %436 = arith.addf %433, %435 : vector<8x128xf32>
    %c0_185 = arith.constant 0 : index
    %c0_186 = arith.constant 0 : index
    %437 = vector.load %arg9[%c0_185, %c0_186] : memref<8x128xf32, #tpu.memory_space<vmem>>, vector<8x128xf32>
    tpu.vector_store %arg9[%c0_185, %c0_186], %436 {strides = array<i32>} : memref<8x128xf32, #tpu.memory_space<vmem>>, vector<8x128xf32>,
    return
  }
}

</mosaic_0001>

<bundles_post_ra>
// kernel: tpu_custom_call.1
= control target key start
LH: loop header
LB: loop body
LE: loop exit
PB: predicated region body
PF: predicated region fallthrough
CT: control target
= control target key end

     0   :  { %14 = vsyncpa [#allocation5], 0  ;;  %s7066_s0 = inlined_call_operand.vmem [shape: f32[64,16], index: 0, kind: input, shape index: {}]   ;;  %s7067_s1 = inlined_call_operand.vmem [shape: f32[16,512], index: 1, kind: input, shape index: {}]   ;;  %s7068_s2 = inlined_call_operand.hbm [shape: f32[128,512], index: 2, kind: input, shape index: {}]   ;;  %s7069_s3 = inlined_call_operand.vmem [shape: f32[1,512], index: 3, kind: input, shape index: {}]   ;;  %s7070_s4 = inlined_call_operand.hbm [shape: f32[16,512], index: 4, kind: input, shape index: {}]   ;;  %s7071_s5 = inlined_call_operand.hbm [shape: f32[128,512], index: 5, kind: input, shape index: {}]   ;;  %s7072_s6 = inlined_call_operand.vmem [shape: f32[1,512], index: 6, kind: input, shape index: {}]   ;;  %s7073_s7 = inlined_call_operand.hbm [shape: f32[1024,128], index: 7, kind: input, shape index: {}]   ;;  %s7074_s8 = inlined_call_operand.vmem [shape: f32[1,128], index: 8, kind: input, shape index: {}]   ;;  %s7075_s9 = inlined_call_operand.hbm [shape: f32[8,128], index: 9, kind: output, shape index: {}]  }
   0x1   :  { %15 = vsyncpa [#allocation8], 0 }
   0x2   :  { %16 = vsyncpa [#allocation11], 0 }
   0x3   :  { %17 = vsyncpa [#allocation6], 0  ;;  %s5897_s30 = smov [#allocation7]   ;;  %s5898_s11 = smov [#allocation4]  }
   0x4   :  { %s41_s10 = sshll.u32 %s5897_s30, 4  ;;  %s27_s12 = sshll.u32 %s5898_s11, 4  ;;  %s42_s10 = int_to_ptr.vmem [resolvable:$true] %s41_s10  ;;  %s5957_s12 = int_to_ptr.vmem [resolvable:$true] %s27_s12 }
   0x5   :  { %s5779_s15 = scalar_lea.hbm %s7070_s4, 1024 }
   0x6   :  { %p5780_p0 = scmp.ne.s32.totalorder %s7070_s4, %s5779_s15  ;;  %p5783_p1 = scmp.lt.u32.totalorder %s5779_s15, %s7070_s4 }
   0x8   :  { %p5785_p2 = pnand %p5783_p1, %p5780_p0 }
   0xa   :  { %5788 = shalt.err (!%p5785_p2)
}
   0xb   :  { %s5789_s20 = scalar_lea.vmem %s42_s10, 1024  ;;  %p5794_p4 = scmp.lt.s32.totalorder %s42_s10, %s42_s10 }
   0xc   :  { %p5790_p3 = scmp.ne.s32.totalorder %s42_s10, %s5789_s20  ;;  %p5795_p5 = scmp.lt.s32.totalorder %s5789_s20, %s5789_s20 }
   0xe   :  { %p5796_p6 = por %p5795_p5, %p5794_p4 }
  0x10   :  { %p5797_p7 = pnand %p5796_p6, %p5790_p3 }
  0x12   :  { %5800 = shalt.err (!%p5797_p7)
}
  0x13   :  { %s5899_s21 = smov 512   ;;  %s5900_s22 = smov 32  }
  0x14   :  { %47 = dma.hbm_to_vmem [thread:$0]  %s7070_s4, 1024, %s42_s10, [#allocation8], %s5899_s21, %s5899_s21, %s5900_s22  }
  0x15   :  { %s5801_s27 = scalar_lea.hbm %s7068_s2, 8192 }
  0x16   :  { %p5802_p8 = scmp.ne.s32.totalorder %s7068_s2, %s5801_s27  ;;  %p5805_p9 = scmp.lt.u32.totalorder %s5801_s27, %s7068_s2 }
  0x18   :  { %p5807_p10 = pnand %p5805_p9, %p5802_p8 }
  0x1a   :  { %5810 = shalt.err (!%p5807_p10)
}
  0x1b   :  { %s5811_s13 = scalar_lea.vmem %s5957_s12, 8192  ;;  %p5816_p12 = scmp.lt.s32.totalorder %s5957_s12, %s5957_s12 }
  0x1c   :  { %p5812_p11 = scmp.ne.s32.totalorder %s5957_s12, %s5811_s13  ;;  %p5817_p13 = scmp.lt.s32.totalorder %s5811_s13, %s5811_s13 }
  0x1e   :  { %p5818_p0 = por %p5817_p13, %p5816_p12 }
  0x20   :  { %p5819_p1 = pnand %p5818_p0, %p5812_p11 }
  0x22   :  { %5822 = shalt.err (!%p5819_p1)
}
  0x23   :  { %33 = dma.hbm_to_vmem [thread:$0]  %s7068_s2, 8192, %s5957_s12, [#allocation5], %s5899_s21, %s5899_s21, %s5900_s22  }
  0x24   :  { %s5901_s14 = smov [#allocation9]   ;;  %s5902_s16 = smov [#allocation10]  }
  0x25   :  { %s53_s15 = sshll.u32 %s5901_s14, 4  ;;  %s67_s17 = sshll.u32 %s5902_s16, 4  ;;  %s54_s15 = int_to_ptr.vmem [resolvable:$true] %s53_s15  ;;  %s5994_s17 = int_to_ptr.vmem [resolvable:$true] %s67_s17 }
  0x26   :  { %s5823_s20 = scalar_lea.hbm %s7071_s5, 8192 }
  0x27   :  { %p5824_p2 = scmp.ne.s32.totalorder %s7071_s5, %s5823_s20  ;;  %p5827_p3 = scmp.lt.u32.totalorder %s5823_s20, %s7071_s5 }
  0x29   :  { %p5829_p4 = pnand %p5827_p3, %p5824_p2 }
  0x2b   :  { %5832 = shalt.err (!%p5829_p4)
}
  0x2c   :  { %s5833_s2 = scalar_lea.vmem %s54_s15, 8192  ;;  %p5838_p6 = scmp.lt.s32.totalorder %s54_s15, %s54_s15 }
  0x2d   :  { %p5834_p5 = scmp.ne.s32.totalorder %s54_s15, %s5833_s2  ;;  %p5839_p7 = scmp.lt.s32.totalorder %s5833_s2, %s5833_s2 }
  0x2f   :  { %p5840_p8 = por %p5839_p7, %p5838_p6 }
  0x31   :  { %p5841_p9 = pnand %p5840_p8, %p5834_p5 }
  0x33   :  { %5844 = shalt.err (!%p5841_p9)
}
  0x34   :  { %59 = dma.hbm_to_vmem [thread:$0]  %s7071_s5, 8192, %s54_s15, [#allocation8], %s5899_s21, %s5899_s21, %s5900_s22  }
  0x35   :  { %s5845_s30 = scalar_lea.hbm %s7073_s7, 16384 }
  0x36   :  { %p5846_p10 = scmp.ne.s32.totalorder %s7073_s7, %s5845_s30  ;;  %p5849_p11 = scmp.lt.u32.totalorder %s5845_s30, %s7073_s7 }
  0x38   :  { %p5851_p12 = pnand %p5849_p11, %p5846_p10 }
  0x3a   :  { %5854 = shalt.err (!%p5851_p12)
}
  0x3b   :  { %s5855_s14 = scalar_lea.vmem %s5994_s17, 16384  ;;  %p5860_p0 = scmp.lt.s32.totalorder %s5994_s17, %s5994_s17 }
  0x3c   :  { %p5856_p13 = scmp.ne.s32.totalorder %s5994_s17, %s5855_s14  ;;  %p5861_p1 = scmp.lt.s32.totalorder %s5855_s14, %s5855_s14 }
  0x3e   :  { %p5862_p2 = por %p5861_p1, %p5860_p0 }
  0x40   :  { %p5863_p3 = pnand %p5862_p2, %p5856_p13 }
  0x42   :  { %5866 = shalt.err (!%p5863_p3)
}
  0x43   :  { %s5903_s5 = smov 128   ;;  %s5904_s21 = smov 8  }
  0x44   :  { %73 = dma.hbm_to_vmem [thread:$0]  %s7073_s7, 16384, %s5994_s17, [#allocation11], %s5903_s5, %s5903_s5, %s5904_s21  }
  0x45   :  { %5889 = dma.done.wait [#allocation5], 8192  }
  0x46   :  { %5890 = vsyncadd [#allocation5], 4294959104 }
  0x47   :  { %5891 = dma.done.wait [#allocation8], 9216  }
  0x48   :  { %5892 = vsyncadd [#allocation8], 4294958080 }
  0x49   :  { %5893 = dma.done.wait [#allocation11], 16384  }
  0x4a   :  { %5894 = vsyncadd [#allocation11], 4294950912  ;;  %v5905_v0 = vmov 0.0   ;;  %v97_v1 = vld [vmem:[%s7067_s1 + $0x8] sm:$0xff]  ;;  %v99_v3 = vld [vmem:[%s7067_s1 + $0x18] sm:$0xff]  ;;  %vm126_vm0 = vcmask 130048  }
  0x4b   :  { %215 = vmatprep.mubr.f32.mxu0 %v5905_v0  ;;  %328 = vmatprep.mubr.f32.mxu1 %v5905_v0  ;;  %v101_v2 = vld [vmem:[%s7067_s1 + $0x28] sm:$0xff]  ;;  %v103_v5 = vld [vmem:[%s7067_s1 + $0x38] sm:$0xff]  ;;  %v96_v6 = vld [vmem:[%s7067_s1] sm:$0xff]  ;;  %s5906_s26 = smov [#allocation12]  }
  0x4c   :  { %v4377_v4 = vpack.c.bf16 %v101_v2, %v97_v1  ;;  %v100_v7 = vld [vmem:[%s7067_s1 + $0x20] sm:$0xff]  ;;  %v4381_v8 = vpack.c.bf16 %v103_v5, %v99_v3  ;;  %v98_v10 = vld [vmem:[%s7067_s1 + $0x10] sm:$0xff]  ;;  %v414_v14 = vld [vmem:[#allocation4 + $0x8] sm:$0xff]  ;;  %s4207_s2 = sshll.u32 %s5906_s26, 4  ;;  %s4208_s2 = int_to_ptr.vmem [resolvable:$true] %s4207_s2 }
  0x4d   :  { %v4379_v9 = vpack.c.bf16 %v100_v7, %v96_v6  ;;  %v102_v11 = vld [vmem:[%s7067_s1 + $0x30] sm:$0xff]  ;;  %v88_v12 = vld [vmem:[%s7066_s0] sm:$0xff]  ;;  %v418_v15 = vld [vmem:[#allocation4 + $0x28] sm:$0xff]  ;;  %p5872_p5 = scmp.lt.s32.totalorder %s4208_s2, %s4208_s2 }
  0x4e   :  { %4378 = vmatprep.subr.bf16.mxu0 %v4377_v4  ;;  %v4383_v13 = vpack.c.bf16 %v102_v11, %v98_v10  ;;  %v416_v16 = vld [vmem:[#allocation4 + $0x18] sm:$0xff]  ;;  %4382 = vmatprep.subr.bf16.mxu1 %v4381_v8  ;;  %v6057_v17 = vpack.c.bf16 %v418_v15, %v414_v14  ;;  %v413_v19 = vld [vmem:[#allocation4] sm:$0xff]  ;;  %v415_v23 = vld [vmem:[#allocation4 + $0x10] sm:$0xff] }
  0x4f   :  { %4380 = vmatpush1.bf16.msra.mxu0 %v4379_v9  ;;  %v420_v18 = vld [vmem:[#allocation4 + $0x38] sm:$0xff]  ;;  %v417_v20 = vld [vmem:[#allocation4 + $0x20] sm:$0xff]  ;;  %v419_v24 = vld [vmem:[#allocation4 + $0x30] sm:$0xff] }
  0x50   :  { %4384 = vmatpush1.bf16.msra.mxu1 %v4383_v13  ;;  %v6059_v21 = vpack.c.bf16 %v420_v18, %v416_v16  ;;  %v6061_v22 = vpack.c.bf16 %v417_v20, %v413_v19  ;;  %4386 = vmatprep.subr.bf16.mxu0 %v6057_v17  ;;  %v6064_v25 = vpack.c.bf16 %v419_v24, %v415_v23  ;;  %v422_v26 = vld [vmem:[#allocation4 + $0x48] sm:$0xff]  ;;  %v424_v28 = vld [vmem:[#allocation4 + $0x58] sm:$0xff]  ;;  %v421_v31 = vld [vmem:[#allocation4 + $0x40] sm:$0xff] }
  0x51   :  { %v426_v27 = vld [vmem:[#allocation4 + $0x68] sm:$0xff]  ;;  %v428_v30 = vld [vmem:[#allocation4 + $0x78] sm:$0xff]  ;;  %v425_v32 = vld [vmem:[#allocation4 + $0x60] sm:$0xff] }
  0x52   :  { %4218 = vmatmul.mubr.msk.f32.vlgmr.msra.gmra.mrb[0].mxu0 %vm126_vm0, %v88_v12  ;;  %4418 = vmatprep.subr.bf16.mxu1 %v6059_v21  ;;  %v6068_v29 = vpack.c.bf16 %v426_v27, %v422_v26  ;;  %v89_v33 = vld [vmem:[%s7066_s0 + $0x8] sm:$0xff]  ;;  %v6075_v34 = vpack.c.bf16 %v428_v30, %v424_v28  ;;  %v6077_v35 = vpack.c.bf16 %v425_v32, %v421_v31  ;;  %v423_v36 = vld [vmem:[#allocation4 + $0x50] sm:$0xff]  ;;  %v432_v41 = vld [vmem:[#allocation4 + $0x98] sm:$0xff] }
  0x53   :  { %4226 = vmatmul.mubr.msk.f32.vlgmr.msra.gmra.mrb[0].mxu1 %vm126_vm0, %v88_v12  ;;  %4388 = vmatpush1.bf16.msra.mxu0 %v6061_v22  ;;  %v427_v37 = vld [vmem:[#allocation4 + $0x70] sm:$0xff]  ;;  %v430_v39 = vld [vmem:[#allocation4 + $0x88] sm:$0xff]  ;;  %v436_v43 = vld [vmem:[#allocation4 + $0xb8] sm:$0xff] }
  0x54   :  { %4420 = vmatpush1.bf16.msra.mxu1 %v6064_v25  ;;  %221 = vmatprep.mubr.f32.mxu0 %v5905_v0  ;;  %v6081_v38 = vpack.c.bf16 %v427_v37, %v423_v36  ;;  %v434_v40 = vld [vmem:[#allocation4 + $0xa8] sm:$0xff]  ;;  %v429_v44 = vld [vmem:[#allocation4 + $0x80] sm:$0xff]  ;;  %v90_v46 = vld [vmem:[%s7066_s0 + $0x10] sm:$0xff]  ;;  %v6092_v47 = vpack.c.bf16 %v436_v43, %v432_v41 }
  0x55   :  { %334 = vmatprep.mubr.f32.mxu1 %v5905_v0  ;;  %4390 = vmatprep.subr.bf16.mxu0 %v6068_v29  ;;  %v6085_v42 = vpack.c.bf16 %v434_v40, %v430_v39  ;;  %v433_v45 = vld [vmem:[#allocation4 + $0xa0] sm:$0xff]  ;;  %v431_v48 = vld [vmem:[#allocation4 + $0x90] sm:$0xff]  ;;  %v438_v51 = vld [vmem:[#allocation4 + $0xc8] sm:$0xff] }
  0x56   :  { %4219 = vmatmul.mubr.msk.f32.gmra.mrb[2].mxu0 %vm126_vm0, %v89_v33  ;;  %4422 = vmatprep.subr.bf16.mxu1 %v6075_v34  ;;  %v435_v49 = vld [vmem:[#allocation4 + $0xb0] sm:$0xff]  ;;  %v6096_v50 = vpack.c.bf16 %v433_v45, %v429_v44  ;;  %v442_v52 = vld [vmem:[#allocation4 + $0xe8] sm:$0xff]  ;;  %v440_v53 = vld [vmem:[#allocation4 + $0xd8] sm:$0xff] }
  0x57   :  { %4227 = vmatmul.mubr.msk.f32.gmra.mrb[2].mxu1 %vm126_vm0, %v89_v33  ;;  %4392 = vmatpush1.bf16.msra.mxu0 %v6077_v35  ;;  %v6100_v54 = vpack.c.bf16 %v435_v49, %v431_v48  ;;  %v444_v55 = vld [vmem:[#allocation4 + $0xf8] sm:$0xff]  ;;  %v437_v56 = vld [vmem:[#allocation4 + $0xc0] sm:$0xff]  ;;  %v6104_v58 = vpack.c.bf16 %v442_v52, %v438_v51  ;;  %v439_v59 = vld [vmem:[#allocation4 + $0xd0] sm:$0xff] }
  0x58   :  { %4424 = vmatpush1.bf16.msra.mxu1 %v6081_v38  ;;  %227 = vmatprep.mubr.f32.mxu0 %v5905_v0  ;;  %v441_v57 = vld [vmem:[#allocation4 + $0xe0] sm:$0xff]  ;;  %v443_v60 = vld [vmem:[#allocation4 + $0xf0] sm:$0xff]  ;;  %v6108_v61 = vpack.c.bf16 %v444_v55, %v440_v53  ;;  %v446_v62 = vld [vmem:[#allocation4 + $0x108] sm:$0xff] }
  0x59   :  { %340 = vmatprep.mubr.f32.mxu1 %v5905_v0  ;;  %4394 = vmatprep.subr.bf16.mxu0 %v6085_v42  ;;  %v450_v63 = vld [vmem:[#allocation4 + $0x128] sm:$0xff]  ;;  %v91_v1 = vld [vmem:[%s7066_s0 + $0x18] sm:$0xff]  ;;  %v6115_v2 = vpack.c.bf16 %v441_v57, %v437_v56  ;;  %v6119_v5 = vpack.c.bf16 %v443_v60, %v439_v59  ;;  %v445_v6 = vld [vmem:[#allocation4 + $0x100] sm:$0xff] }
  0x5a   :  { %4220 = vmatmul.mubr.msk.f32.gmra.mrb[4].mxu0 %vm126_vm0, %v90_v46  ;;  %4426 = vmatprep.subr.bf16.mxu1 %v6092_v47  ;;  %v448_v3 = vld [vmem:[#allocation4 + $0x118] sm:$0xff]  ;;  %v449_v7 = vld [vmem:[#allocation4 + $0x120] sm:$0xff]  ;;  %v6123_v8 = vpack.c.bf16 %v450_v63, %v446_v62  ;;  %v447_v9 = vld [vmem:[#allocation4 + $0x110] sm:$0xff] }
  0x5b   :  { %4228 = vmatmul.mubr.msk.f32.gmra.mrb[4].mxu1 %vm126_vm0, %v90_v46  ;;  %4396 = vmatpush1.bf16.msra.mxu0 %v6096_v50  ;;  %v452_v4 = vld [vmem:[#allocation4 + $0x138] sm:$0xff]  ;;  %v451_v10 = vld [vmem:[#allocation4 + $0x130] sm:$0xff]  ;;  %v454_v12 = vld [vmem:[#allocation4 + $0x148] sm:$0xff]  ;;  %v6134_v15 = vpack.c.bf16 %v449_v7, %v445_v6  ;;  %v106_v7 = vlaneseq }
  0x5c   :  { %4428 = vmatpush1.bf16.msra.mxu1 %v6100_v54  ;;  %233 = vmatprep.mubr.f32.mxu0 %v5905_v0  ;;  %v6127_v11 = vpack.c.bf16 %v452_v4, %v448_v3  ;;  %v458_v13 = vld [vmem:[#allocation4 + $0x168] sm:$0xff]  ;;  %v92_v14 = vld [vmem:[%s7066_s0 + $0x20] sm:$0xff]  ;;  %v456_v16 = vld [vmem:[#allocation4 + $0x158] sm:$0xff]  ;;  %v6138_v19 = vpack.c.bf16 %v451_v10, %v447_v9 }
  0x5d   :  { %346 = vmatprep.mubr.f32.mxu1 %v5905_v0  ;;  %4398 = vmatprep.subr.bf16.mxu0 %v6104_v58  ;;  %v460_v18 = vld [vmem:[#allocation4 + $0x178] sm:$0xff]  ;;  %v453_v20 = vld [vmem:[#allocation4 + $0x140] sm:$0xff]  ;;  %v6142_v24 = vpack.c.bf16 %v458_v13, %v454_v12  ;;  %v455_v26 = vld [vmem:[#allocation4 + $0x150] sm:$0xff]  ;;  %v6248_v9 = vshrl.u32 %v106_v7, 7 }
  0x5e   :  { %4221 = vmatmul.mubr.msk.f32.gmra.mrb[6].mxu0 %vm126_vm0, %v91_v1  ;;  %4430 = vmatprep.subr.bf16.mxu1 %v6108_v61  ;;  %v457_v23 = vld [vmem:[#allocation4 + $0x160] sm:$0xff]  ;;  %v459_v27 = vld [vmem:[#allocation4 + $0x170] sm:$0xff]  ;;  %v6146_v28 = vpack.c.bf16 %v460_v18, %v456_v16  ;;  %v462_v30 = vld [vmem:[#allocation4 + $0x188] sm:$0xff] }
  0x5f   :  { %4229 = vmatmul.mubr.msk.f32.gmra.mrb[6].mxu1 %vm126_vm0, %v91_v1  ;;  %4400 = vmatpush1.bf16.msra.mxu0 %v6115_v2  ;;  %v466_v31 = vld [vmem:[#allocation4 + $0x1a8] sm:$0xff]  ;;  %v6153_v33 = vpack.c.bf16 %v457_v23, %v453_v20  ;;  %v464_v36 = vld [vmem:[#allocation4 + $0x198] sm:$0xff]  ;;  %v6157_v39 = vpack.c.bf16 %v459_v27, %v455_v26  ;;  %v461_v40 = vld [vmem:[#allocation4 + $0x180] sm:$0xff]  ;;  %v108_v10 = vsub.s32 0, %v6248_v9  ;;  %v112_v13 = vsub.s32 1, %v6248_v9 }
  0x60   :  { %4432 = vmatpush1.bf16.msra.mxu1 %v6119_v5  ;;  %239 = vmatprep.mubr.f32.mxu0 %v5905_v0  ;;  %v93_v32 = vld [vmem:[%s7066_s0 + $0x28] sm:$0xff]  ;;  %v468_v37 = vld [vmem:[#allocation4 + $0x1b8] sm:$0xff]  ;;  %v465_v41 = vld [vmem:[#allocation4 + $0x1a0] sm:$0xff]  ;;  %v6161_v43 = vpack.c.bf16 %v466_v31, %v462_v30 }
  0x61   :  { %352 = vmatprep.mubr.f32.mxu1 %v5905_v0  ;;  %4402 = vmatprep.subr.bf16.mxu0 %v6123_v8  ;;  %v463_v44 = vld [vmem:[#allocation4 + $0x190] sm:$0xff]  ;;  %v6165_v46 = vpack.c.bf16 %v468_v37, %v464_v36  ;;  %v470_v48 = vld [vmem:[#allocation4 + $0x1c8] sm:$0xff]  ;;  %v6172_v52 = vpack.c.bf16 %v465_v41, %v461_v40  ;;  %v472_v53 = vld [vmem:[#allocation4 + $0x1d8] sm:$0xff]  ;;  %v120_v37 = vsub.s32 3, %v6248_v9 }
  0x62   :  { %4222 = vmatmul.mubr.msk.f32.gmra.mrb[8].mxu0 %vm126_vm0, %v92_v14  ;;  %4434 = vmatprep.subr.bf16.mxu1 %v6127_v11  ;;  %v467_v45 = vld [vmem:[#allocation4 + $0x1b0] sm:$0xff]  ;;  %v474_v49 = vld [vmem:[#allocation4 + $0x1e8] sm:$0xff]  ;;  %v476_v55 = vld [vmem:[#allocation4 + $0x1f8] sm:$0xff] }
  0x63   :  { %4230 = vmatmul.mubr.msk.f32.gmra.mrb[8].mxu1 %vm126_vm0, %v92_v14  ;;  %4404 = vmatpush1.bf16.msra.mxu0 %v6134_v15  ;;  %v94_v51 = vld [vmem:[%s7066_s0 + $0x30] sm:$0xff]  ;;  %v6176_v56 = vpack.c.bf16 %v467_v45, %v463_v44  ;;  %v469_v57 = vld [vmem:[#allocation4 + $0x1c0] sm:$0xff]  ;;  %v6180_v60 = vpack.c.bf16 %v474_v49, %v470_v48  ;;  %v6184_v1 = vpack.c.bf16 %v476_v55, %v472_v53  ;;  %v6191_v3 = vld [vmem:[%s7066_s0 + $0x38] sm:$0xff]  ;;  %v116_v14 = vsub.s32 2, %v6248_v9 }
  0x64   :  { %4436 = vmatpush1.bf16.msra.mxu1 %v6138_v19  ;;  %245 = vmatprep.mubr.f32.mxu0 %v5905_v0  ;;  %v473_v59 = vld [vmem:[#allocation4 + $0x1e0] sm:$0xff]  ;;  %v471_v62 = vld [vmem:[#allocation4 + $0x1d0] sm:$0xff] }
  0x65   :  { %358 = vmatprep.mubr.f32.mxu1 %v5905_v0  ;;  %4406 = vmatprep.subr.bf16.mxu0 %v6142_v24  ;;  %v475_v63 = vld [vmem:[#allocation4 + $0x1f0] sm:$0xff]  ;;  %v6193_v4 = vpack.c.bf16 %v473_v59, %v469_v57  ;;  %v104_v12 = vld [vmem:[%s7069_s3] sm:$0xf] }
  0x66   :  { %4223 = vmatmul.mubr.msk.f32.gmra.mrb[10].mxu0 %vm126_vm0, %v93_v32  ;;  %4438 = vmatprep.subr.bf16.mxu1 %v6146_v28  ;;  %v6197_v6 = vpack.c.bf16 %v475_v63, %v471_v62  ;;  %v6258_v16 = vrot.slane %v104_v12, %v108_v10  ;;  %v6262_v18 = vrot.slane %v104_v12, %v112_v13 }
  0x67   :  { %4231 = vmatmul.mubr.msk.f32.gmra.mrb[10].mxu1 %vm126_vm0, %v93_v32  ;;  %4408 = vmatpush1.bf16.msra.mxu0 %v6153_v33  ;;  %v6266_v20 = vrot.slane %v104_v12, %v116_v14  ;;  %v6274_v40 = vrot.slane %v104_v12, %v120_v37 }
  0x68   :  { %4440 = vmatpush1.bf16.msra.mxu1 %v6157_v39  ;;  %251 = vmatprep.mubr.f32.mxu0 %v5905_v0 }
  0x69   :  { %364 = vmatprep.mubr.f32.mxu1 %v5905_v0  ;;  %4410 = vmatprep.subr.bf16.mxu0 %v6161_v43 }
  0x6a   :  { %4224 = vmatmul.mubr.msk.f32.gmra.mrb[12].mxu0 %vm126_vm0, %v94_v51  ;;  %4442 = vmatprep.subr.bf16.mxu1 %v6165_v46 }
  0x6b   :  { %4232 = vmatmul.mubr.msk.f32.gmra.mrb[12].mxu1 %vm126_vm0, %v94_v51  ;;  %4412 = vmatpush1.bf16.msra.mxu0 %v6172_v52 }
  0x6c   :  { %4444 = vmatpush1.bf16.msra.mxu1 %v6176_v56  ;;  %257 = vmatprep.mubr.f32.mxu0 %v5905_v0 }
  0x6d   :  { %370 = vmatprep.mubr.f32.mxu1 %v5905_v0  ;;  %4414 = vmatprep.subr.bf16.mxu0 %v6180_v60 }
  0x6e   :  { %4225 = vmatmul.mubr.msk.f32.gmra.mrb[14].mxu0 %vm126_vm0, %v6191_v3  ;;  %4446 = vmatprep.subr.bf16.mxu1 %v6184_v1 }
  0x6f   :  { %4233 = vmatmul.mubr.msk.f32.gmra.mrb[14].mxu1 %vm126_vm0, %v6191_v3  ;;  %4416 = vmatpush1.bf16.msra.mxu0 %v6193_v4 }
  0x70   :  { %4448 = vmatpush1.bf16.msra.mxu1 %v6197_v6  ;;  %541 = vmatprep.mubr.f32.mxu0 %v5905_v0 }
  0x71   :  { %612 = vmatprep.mubr.f32.mxu1 %v5905_v0  ;;  %4450 = vmatprep.subr.bf16.mxu0 %v6057_v17 }
  0x72   :  { %542 = vmatmul.mubr.f32.vlgmr.msra.gmra.mrb[0].mxu0 %v5905_v0  ;;  %4482 = vmatprep.subr.bf16.mxu1 %v6059_v21 }
  0x73   :  { %613 = vmatmul.mubr.f32.vlgmr.msra.gmra.mrb[0].mxu1 %v5905_v0  ;;  %4452 = vmatpush1.bf16.msra.mxu0 %v6061_v22 }
  0x74   :  { %4484 = vmatpush1.bf16.msra.mxu1 %v6064_v25  ;;  %4454 = vmatprep.subr.bf16.mxu0 %v6068_v29 }
  0x75   :  { %4486 = vmatprep.subr.bf16.mxu1 %v6075_v34  ;;  %706 = vmatprep.mubr.f32.mxu0 %v5905_v0 }
  0x76   :  { %777 = vmatprep.mubr.f32.mxu1 %v5905_v0 }
  0x77   :  { %4456 = vmatpush1.bf16.msra.mxu0 %v6077_v35 }
  0x78   :  { %4488 = vmatpush1.bf16.msra.mxu1 %v6081_v38  ;;  %4458 = vmatprep.subr.bf16.mxu0 %v6085_v42 }
  0x79   :  { %4490 = vmatprep.subr.bf16.mxu1 %v6092_v47 }
  0x7b   :  { %4460 = vmatpush1.bf16.msra.mxu0 %v6096_v50 }
  0x7c   :  { %4492 = vmatpush1.bf16.msra.mxu1 %v6100_v54  ;;  %4462 = vmatprep.subr.bf16.mxu0 %v6104_v58 }
  0x7d   :  { %4494 = vmatprep.subr.bf16.mxu1 %v6108_v61 }
  0x7f   :  { %4464 = vmatpush1.bf16.msra.mxu0 %v6115_v2 }
  0x80   :  { %4496 = vmatpush1.bf16.msra.mxu1 %v6119_v5  ;;  %4466 = vmatprep.subr.bf16.mxu0 %v6123_v8 }
  0x81   :  { %4498 = vmatprep.subr.bf16.mxu1 %v6127_v11 }
  0x83   :  { %4468 = vmatpush1.bf16.msra.mxu0 %v6134_v15 }
  0x84   :  { %4500 = vmatpush1.bf16.msra.mxu1 %v6138_v19  ;;  %4470 = vmatprep.subr.bf16.mxu0 %v6142_v24 }
  0x85   :  { %4502 = vmatprep.subr.bf16.mxu1 %v6146_v28 }
  0x87   :  { %4472 = vmatpush1.bf16.msra.mxu0 %v6153_v33 }
  0x88   :  { %4504 = vmatpush1.bf16.msra.mxu1 %v6157_v39  ;;  %4474 = vmatprep.subr.bf16.mxu0 %v6161_v43 }
  0x89   :  { %4506 = vmatprep.subr.bf16.mxu1 %v6165_v46 }
  0x8b   :  { %4476 = vmatpush1.bf16.msra.mxu0 %v6172_v52 }
  0x8c   :  { %4508 = vmatpush1.bf16.msra.mxu1 %v6176_v56  ;;  %4478 = vmatprep.subr.bf16.mxu0 %v6180_v60 }
  0x8d   :  { %4510 = vmatprep.subr.bf16.mxu1 %v6184_v1 }
  0x8f   :  { %4480 = vmatpush1.bf16.msra.mxu0 %v6193_v4 }
  0x90   :  { %4512 = vmatpush1.bf16.msra.mxu1 %v6197_v6  ;;  %4514 = vmatprep.subr.bf16.mxu0 %v6057_v17 }
  0x91   :  { %4546 = vmatprep.subr.bf16.mxu1 %v6059_v21 }
 0x145   :  { %v543_v23 = vpop.f32.mrb[0].mxu0 }
 0x146   :  { %v5545_v26 = vadd.f32 %v543_v23, %v6258_v16  ;;  %v614_v27 = vpop.f32.mrb[0].mxu1  ;;  %v545_v30 = vpop.f32.mrb[1].mxu0 }
 0x147   :  { %v5546_v31 = vadd.f32 %v545_v30, %v6262_v18  ;;  %v616_v32 = vpop.f32.mrb[1].mxu1  ;;  %v5561_v36 = vadd.f32 %v614_v27, %v6266_v20 }
 0x148   :  { %5619 = vtanh.f32 %v5545_v26  ;;  %v5562_v41 = vadd.f32 %v616_v32, %v6274_v40 }
 0x149   :  { %5621 = vtanh.f32 %v5546_v31 }
 0x14a   :  { %5623 = vtanh.f32 %v5561_v36 }
 0x14b   :  { %5625 = vtanh.f32 %v5562_v41 }
 0x152   :  { %v5620_v44 = vpop.eup %5619 }
 0x153   :  { %v627_v45 = vmul.f32 0.5, %v5620_v44  ;;  %v5622_v48 = vpop.eup %5621 }
 0x154   :  { %v629_v51 = vmul.f32 0.5, %v5622_v48  ;;  %v5624_v53 = vpop.eup %5623 }
 0x155   :  { %v628_v49 = vadd.f32 0.5, %v627_v45  ;;  %v5626_v63 = vpop.eup %5625 }
 0x156   :  { %v630_v55 = vadd.f32 0.5, %v629_v51  ;;  %v631_v7 = vmul.f32 0.5, %v5626_v63 }
 0x157   :  { %v634_v57 = vmul.f32 %v5624_v53, %v628_v49 }
 0x158   :  { %v633_v59 = vmul.f32 0.0, %v630_v55  ;;  %v632_v12 = vadd.f32 0.5, %v631_v7 }
 0x15a   :  { %v6277_v62 = vadd.f32 %v634_v57, %v633_v59 }
 0x15c   :  { %5627 = vtanh.f32 %v6277_v62 }
 0x166   :  { %v5628_v23 = vpop.eup %5627 }
 0x167   :  { %v637_v26 = vmul.f32 %v5628_v23, %v632_v12 }
 0x169   :  { %707 = vmatmul.mubr.f32.vlgmr.msra.gmra.mrb[2].mxu0 %v637_v26  ;;  %778 = vmatmul.mubr.f32.vlgmr.msra.gmra.mrb[2].mxu1 %v637_v26 }
 0x16a   :  { %4516 = vmatpush1.bf16.msra.mxu0 %v6061_v22  ;;  %4548 = vmatpush1.bf16.msra.mxu1 %v6064_v25 }
 0x16b   :  { %4518 = vmatprep.subr.bf16.mxu0 %v6068_v29  ;;  %4550 = vmatprep.subr.bf16.mxu1 %v6075_v34 }
 0x16c   :  { %871 = vmatprep.mubr.f32.mxu0 %v5905_v0  ;;  %942 = vmatprep.mubr.f32.mxu1 %v5905_v0 }
 0x16e   :  { %4520 = vmatpush1.bf16.msra.mxu0 %v6077_v35  ;;  %4552 = vmatpush1.bf16.msra.mxu1 %v6081_v38 }
 0x16f   :  { %4522 = vmatprep.subr.bf16.mxu0 %v6085_v42  ;;  %4554 = vmatprep.subr.bf16.mxu1 %v6092_v47 }
 0x172   :  { %4524 = vmatpush1.bf16.msra.mxu0 %v6096_v50  ;;  %4556 = vmatpush1.bf16.msra.mxu1 %v6100_v54 }
 0x173   :  { %4526 = vmatprep.subr.bf16.mxu0 %v6104_v58  ;;  %4558 = vmatprep.subr.bf16.mxu1 %v6108_v61 }
 0x176   :  { %4528 = vmatpush1.bf16.msra.mxu0 %v6115_v2  ;;  %4560 = vmatpush1.bf16.msra.mxu1 %v6119_v5 }
 0x177   :  { %4530 = vmatprep.subr.bf16.mxu0 %v6123_v8  ;;  %4562 = vmatprep.subr.bf16.mxu1 %v6127_v11 }
 0x17a   :  { %4532 = vmatpush1.bf16.msra.mxu0 %v6134_v15  ;;  %4564 = vmatpush1.bf16.msra.mxu1 %v6138_v19 }
 0x17b   :  { %4534 = vmatprep.subr.bf16.mxu0 %v6142_v24  ;;  %4566 = vmatprep.subr.bf16.mxu1 %v6146_v28 }
 0x17e   :  { %4536 = vmatpush1.bf16.msra.mxu0 %v6153_v33  ;;  %4568 = vmatpush1.bf16.msra.mxu1 %v6157_v39 }
 0x17f   :  { %4538 = vmatprep.subr.bf16.mxu0 %v6161_v43  ;;  %4570 = vmatprep.subr.bf16.mxu1 %v6165_v46 }
 0x182   :  { %4540 = vmatpush1.bf16.msra.mxu0 %v6172_v52  ;;  %4572 = vmatpush1.bf16.msra.mxu1 %v6176_v56 }
 0x183   :  { %4542 = vmatprep.subr.bf16.mxu0 %v6180_v60  ;;  %4574 = vmatprep.subr.bf16.mxu1 %v6184_v1 }
 0x186   :  { %4544 = vmatpush1.bf16.msra.mxu0 %v6193_v4  ;;  %4576 = vmatpush1.bf16.msra.mxu1 %v6197_v6 }
 0x187   :  { %4578 = vmatprep.subr.bf16.mxu0 %v6057_v17  ;;  %4610 = vmatprep.subr.bf16.mxu1 %v6059_v21 }
 0x23c   :  { %v708_v27 = vpop.f32.mrb[2].mxu0  ;;  %v779_v30 = vpop.f32.mrb[2].mxu1 }
 0x23d   :  { %v5547_v31 = vadd.f32 %v708_v27, %v6258_v16  ;;  %v710_v32 = vpop.f32.mrb[3].mxu0  ;;  %v781_v36 = vpop.f32.mrb[3].mxu1  ;;  %v5563_v44 = vadd.f32 %v779_v30, %v6266_v20 }
 0x23e   :  { %v5548_v41 = vadd.f32 %v710_v32, %v6262_v18  ;;  %v5564_v45 = vadd.f32 %v781_v36, %v6274_v40 }
 0x23f   :  { %5629 = vtanh.f32 %v5547_v31 }
 0x240   :  { %5631 = vtanh.f32 %v5548_v41 }
 0x241   :  { %5633 = vtanh.f32 %v5563_v44 }
 0x242   :  { %5635 = vtanh.f32 %v5564_v45 }
 0x249   :  { %v5630_v48 = vpop.eup %5629 }
 0x24a   :  { %v792_v49 = vmul.f32 0.5, %v5630_v48  ;;  %v5632_v51 = vpop.eup %5631 }
 0x24b   :  { %v794_v55 = vmul.f32 0.5, %v5632_v51  ;;  %v5634_v57 = vpop.eup %5633 }
 0x24c   :  { %v793_v53 = vadd.f32 0.5, %v792_v49  ;;  %v5636_v23 = vpop.eup %5635 }
 0x24d   :  { %v795_v59 = vadd.f32 0.5, %v794_v55  ;;  %v796_v26 = vmul.f32 0.5, %v5636_v23 }
 0x24e   :  { %v799_v63 = vmul.f32 %v5634_v57, %v793_v53 }
 0x24f   :  { %v798_v7 = vmul.f32 %v795_v59, %v6277_v62  ;;  %v797_v27 = vadd.f32 0.5, %v796_v26 }
 0x251   :  { %v6319_v12 = vadd.f32 %v799_v63, %v798_v7 }
 0x253   :  { %5637 = vtanh.f32 %v6319_v12 }
 0x25d   :  { %v5638_v30 = vpop.eup %5637 }
 0x25e   :  { %v802_v31 = vmul.f32 %v5638_v30, %v797_v27 }
 0x260   :  { %872 = vmatmul.mubr.f32.vlgmr.msra.gmra.mrb[4].mxu0 %v802_v31  ;;  %943 = vmatmul.mubr.f32.vlgmr.msra.gmra.mrb[4].mxu1 %v802_v31 }
 0x261   :  { %4580 = vmatpush1.bf16.msra.mxu0 %v6061_v22  ;;  %4612 = vmatpush1.bf16.msra.mxu1 %v6064_v25 }
 0x262   :  { %4582 = vmatprep.subr.bf16.mxu0 %v6068_v29  ;;  %4614 = vmatprep.subr.bf16.mxu1 %v6075_v34 }
 0x263   :  { %1036 = vmatprep.mubr.f32.mxu0 %v5905_v0  ;;  %1107 = vmatprep.mubr.f32.mxu1 %v5905_v0 }
 0x265   :  { %4584 = vmatpush1.bf16.msra.mxu0 %v6077_v35  ;;  %4616 = vmatpush1.bf16.msra.mxu1 %v6081_v38 }
 0x266   :  { %4586 = vmatprep.subr.bf16.mxu0 %v6085_v42  ;;  %4618 = vmatprep.subr.bf16.mxu1 %v6092_v47 }
 0x269   :  { %4588 = vmatpush1.bf16.msra.mxu0 %v6096_v50  ;;  %4620 = vmatpush1.bf16.msra.mxu1 %v6100_v54 }
 0x26a   :  { %4590 = vmatprep.subr.bf16.mxu0 %v6104_v58  ;;  %4622 = vmatprep.subr.bf16.mxu1 %v6108_v61 }
 0x26d   :  { %4592 = vmatpush1.bf16.msra.mxu0 %v6115_v2  ;;  %4624 = vmatpush1.bf16.msra.mxu1 %v6119_v5 }
 0x26e   :  { %4594 = vmatprep.subr.bf16.mxu0 %v6123_v8  ;;  %4626 = vmatprep.subr.bf16.mxu1 %v6127_v11 }
 0x271   :  { %4596 = vmatpush1.bf16.msra.mxu0 %v6134_v15  ;;  %4628 = vmatpush1.bf16.msra.mxu1 %v6138_v19 }
 0x272   :  { %4598 = vmatprep.subr.bf16.mxu0 %v6142_v24  ;;  %4630 = vmatprep.subr.bf16.mxu1 %v6146_v28 }
 0x275   :  { %4600 = vmatpush1.bf16.msra.mxu0 %v6153_v33  ;;  %4632 = vmatpush1.bf16.msra.mxu1 %v6157_v39 }
 0x276   :  { %4602 = vmatprep.subr.bf16.mxu0 %v6161_v43  ;;  %4634 = vmatprep.subr.bf16.mxu1 %v6165_v46 }
 0x279   :  { %4604 = vmatpush1.bf16.msra.mxu0 %v6172_v52  ;;  %4636 = vmatpush1.bf16.msra.mxu1 %v6176_v56 }
 0x27a   :  { %4606 = vmatprep.subr.bf16.mxu0 %v6180_v60  ;;  %4638 = vmatprep.subr.bf16.mxu1 %v6184_v1 }
 0x27d   :  { %4608 = vmatpush1.bf16.msra.mxu0 %v6193_v4  ;;  %4640 = vmatpush1.bf16.msra.mxu1 %v6197_v6 }
 0x27e   :  { %4642 = vmatprep.subr.bf16.mxu0 %v6057_v17  ;;  %4674 = vmatprep.subr.bf16.mxu1 %v6059_v21 }
 0x333   :  { %v873_v62 = vpop.f32.mrb[4].mxu0  ;;  %v944_v32 = vpop.f32.mrb[4].mxu1 }
 0x334   :  { %v5549_v36 = vadd.f32 %v873_v62, %v6258_v16  ;;  %v875_v41 = vpop.f32.mrb[5].mxu0  ;;  %v946_v44 = vpop.f32.mrb[5].mxu1  ;;  %v5565_v48 = vadd.f32 %v944_v32, %v6266_v20 }
 0x335   :  { %v5550_v45 = vadd.f32 %v875_v41, %v6262_v18  ;;  %v5566_v49 = vadd.f32 %v946_v44, %v6274_v40 }
 0x336   :  { %5639 = vtanh.f32 %v5549_v36 }
 0x337   :  { %5641 = vtanh.f32 %v5550_v45 }
 0x338   :  { %5643 = vtanh.f32 %v5565_v48 }
 0x339   :  { %5645 = vtanh.f32 %v5566_v49 }
 0x340   :  { %v5640_v51 = vpop.eup %5639 }
 0x341   :  { %v957_v53 = vmul.f32 0.5, %v5640_v51  ;;  %v5642_v55 = vpop.eup %5641 }
 0x342   :  { %v959_v59 = vmul.f32 0.5, %v5642_v55  ;;  %v5644_v63 = vpop.eup %5643 }
 0x343   :  { %v958_v57 = vadd.f32 0.5, %v957_v53  ;;  %v5646_v30 = vpop.eup %5645 }
 0x344   :  { %v960_v7 = vadd.f32 0.5, %v959_v59  ;;  %v961_v31 = vmul.f32 0.5, %v5646_v30 }
 0x345   :  { %v964_v23 = vmul.f32 %v5644_v63, %v958_v57 }
 0x346   :  { %v963_v26 = vmul.f32 %v960_v7, %v6319_v12  ;;  %v962_v62 = vadd.f32 0.5, %v961_v31 }
 0x348   :  { %v6361_v27 = vadd.f32 %v964_v23, %v963_v26 }
 0x34a   :  { %5647 = vtanh.f32 %v6361_v27 }
 0x354   :  { %v5648_v32 = vpop.eup %5647 }
 0x355   :  { %v967_v36 = vmul.f32 %v5648_v32, %v962_v62 }
 0x357   :  { %1037 = vmatmul.mubr.f32.vlgmr.msra.gmra.mrb[6].mxu0 %v967_v36  ;;  %1108 = vmatmul.mubr.f32.vlgmr.msra.gmra.mrb[6].mxu1 %v967_v36 }
 0x358   :  { %4644 = vmatpush1.bf16.msra.mxu0 %v6061_v22  ;;  %4676 = vmatpush1.bf16.msra.mxu1 %v6064_v25 }
 0x359   :  { %4646 = vmatprep.subr.bf16.mxu0 %v6068_v29  ;;  %4678 = vmatprep.subr.bf16.mxu1 %v6075_v34 }
 0x35a   :  { %1201 = vmatprep.mubr.f32.mxu0 %v5905_v0  ;;  %1272 = vmatprep.mubr.f32.mxu1 %v5905_v0 }
 0x35c   :  { %4648 = vmatpush1.bf16.msra.mxu0 %v6077_v35  ;;  %4680 = vmatpush1.bf16.msra.mxu1 %v6081_v38 }
 0x35d   :  { %4650 = vmatprep.subr.bf16.mxu0 %v6085_v42  ;;  %4682 = vmatprep.subr.bf16.mxu1 %v6092_v47 }
 0x360   :  { %4652 = vmatpush1.bf16.msra.mxu0 %v6096_v50  ;;  %4684 = vmatpush1.bf16.msra.mxu1 %v6100_v54 }
 0x361   :  { %4654 = vmatprep.subr.bf16.mxu0 %v6104_v58  ;;  %4686 = vmatprep.subr.bf16.mxu1 %v6108_v61 }
 0x364   :  { %4656 = vmatpush1.bf16.msra.mxu0 %v6115_v2  ;;  %4688 = vmatpush1.bf16.msra.mxu1 %v6119_v5 }
 0x365   :  { %4658 = vmatprep.subr.bf16.mxu0 %v6123_v8  ;;  %4690 = vmatprep.subr.bf16.mxu1 %v6127_v11 }
 0x368   :  { %4660 = vmatpush1.bf16.msra.mxu0 %v6134_v15  ;;  %4692 = vmatpush1.bf16.msra.mxu1 %v6138_v19 }
 0x369   :  { %4662 = vmatprep.subr.bf16.mxu0 %v6142_v24  ;;  %4694 = vmatprep.subr.bf16.mxu1 %v6146_v28 }
 0x36c   :  { %4664 = vmatpush1.bf16.msra.mxu0 %v6153_v33  ;;  %4696 = vmatpush1.bf16.msra.mxu1 %v6157_v39 }
 0x36d   :  { %4666 = vmatprep.subr.bf16.mxu0 %v6161_v43  ;;  %4698 = vmatprep.subr.bf16.mxu1 %v6165_v46 }
 0x370   :  { %4668 = vmatpush1.bf16.msra.mxu0 %v6172_v52  ;;  %4700 = vmatpush1.bf16.msra.mxu1 %v6176_v56 }
 0x371   :  { %4670 = vmatprep.subr.bf16.mxu0 %v6180_v60  ;;  %4702 = vmatprep.subr.bf16.mxu1 %v6184_v1 }
 0x374   :  { %4672 = vmatpush1.bf16.msra.mxu0 %v6193_v4  ;;  %4704 = vmatpush1.bf16.msra.mxu1 %v6197_v6 }
 0x375   :  { %4706 = vmatprep.subr.bf16.mxu0 %v6057_v17  ;;  %4738 = vmatprep.subr.bf16.mxu1 %v6059_v21 }
 0x42a   :  { %v1038_v12 = vpop.f32.mrb[6].mxu0  ;;  %v1109_v41 = vpop.f32.mrb[6].mxu1 }
 0x42b   :  { %v5551_v44 = vadd.f32 %v1038_v12, %v6258_v16  ;;  %v1040_v45 = vpop.f32.mrb[7].mxu0  ;;  %v1111_v48 = vpop.f32.mrb[7].mxu1  ;;  %v5567_v51 = vadd.f32 %v1109_v41, %v6266_v20 }
 0x42c   :  { %v5552_v49 = vadd.f32 %v1040_v45, %v6262_v18  ;;  %v5568_v53 = vadd.f32 %v1111_v48, %v6274_v40 }
 0x42d   :  { %5649 = vtanh.f32 %v5551_v44 }
 0x42e   :  { %5651 = vtanh.f32 %v5552_v49 }
 0x42f   :  { %5653 = vtanh.f32 %v5567_v51 }
 0x430   :  { %5655 = vtanh.f32 %v5568_v53 }
 0x437   :  { %v5650_v55 = vpop.eup %5649 }
 0x438   :  { %v1122_v57 = vmul.f32 0.5, %v5650_v55  ;;  %v5652_v59 = vpop.eup %5651 }
 0x439   :  { %v1124_v7 = vmul.f32 0.5, %v5652_v59  ;;  %v5654_v23 = vpop.eup %5653 }
 0x43a   :  { %v1123_v63 = vadd.f32 0.5, %v1122_v57  ;;  %v5656_v32 = vpop.eup %5655 }
 0x43b   :  { %v1125_v26 = vadd.f32 0.5, %v1124_v7  ;;  %v1126_v36 = vmul.f32 0.5, %v5656_v32 }
 0x43c   :  { %v1129_v30 = vmul.f32 %v5654_v23, %v1123_v63 }
 0x43d   :  { %v1128_v31 = vmul.f32 %v1125_v26, %v6361_v27  ;;  %v1127_v12 = vadd.f32 0.5, %v1126_v36 }
 0x43f   :  { %v6403_v62 = vadd.f32 %v1129_v30, %v1128_v31 }
 0x441   :  { %5657 = vtanh.f32 %v6403_v62 }
 0x44b   :  { %v5658_v41 = vpop.eup %5657 }
 0x44c   :  { %v1132_v44 = vmul.f32 %v5658_v41, %v1127_v12 }
 0x44e   :  { %1202 = vmatmul.mubr.f32.vlgmr.msra.gmra.mrb[8].mxu0 %v1132_v44  ;;  %1273 = vmatmul.mubr.f32.vlgmr.msra.gmra.mrb[8].mxu1 %v1132_v44 }
 0x44f   :  { %4708 = vmatpush1.bf16.msra.mxu0 %v6061_v22  ;;  %4740 = vmatpush1.bf16.msra.mxu1 %v6064_v25 }
 0x450   :  { %4710 = vmatprep.subr.bf16.mxu0 %v6068_v29  ;;  %4742 = vmatprep.subr.bf16.mxu1 %v6075_v34 }
 0x451   :  { %1366 = vmatprep.mubr.f32.mxu0 %v5905_v0  ;;  %1437 = vmatprep.mubr.f32.mxu1 %v5905_v0 }
 0x453   :  { %4712 = vmatpush1.bf16.msra.mxu0 %v6077_v35  ;;  %4744 = vmatpush1.bf16.msra.mxu1 %v6081_v38 }
 0x454   :  { %4714 = vmatprep.subr.bf16.mxu0 %v6085_v42  ;;  %4746 = vmatprep.subr.bf16.mxu1 %v6092_v47 }
 0x457   :  { %4716 = vmatpush1.bf16.msra.mxu0 %v6096_v50  ;;  %4748 = vmatpush1.bf16.msra.mxu1 %v6100_v54 }
 0x458   :  { %4718 = vmatprep.subr.bf16.mxu0 %v6104_v58  ;;  %4750 = vmatprep.subr.bf16.mxu1 %v6108_v61 }
 0x45b   :  { %4720 = vmatpush1.bf16.msra.mxu0 %v6115_v2  ;;  %4752 = vmatpush1.bf16.msra.mxu1 %v6119_v5 }
 0x45c   :  { %4722 = vmatprep.subr.bf16.mxu0 %v6123_v8  ;;  %4754 = vmatprep.subr.bf16.mxu1 %v6127_v11 }
 0x45f   :  { %4724 = vmatpush1.bf16.msra.mxu0 %v6134_v15  ;;  %4756 = vmatpush1.bf16.msra.mxu1 %v6138_v19 }
 0x460   :  { %4726 = vmatprep.subr.bf16.mxu0 %v6142_v24  ;;  %4758 = vmatprep.subr.bf16.mxu1 %v6146_v28 }
 0x463   :  { %4728 = vmatpush1.bf16.msra.mxu0 %v6153_v33  ;;  %4760 = vmatpush1.bf16.msra.mxu1 %v6157_v39 }
 0x464   :  { %4730 = vmatprep.subr.bf16.mxu0 %v6161_v43  ;;  %4762 = vmatprep.subr.bf16.mxu1 %v6165_v46 }
 0x467   :  { %4732 = vmatpush1.bf16.msra.mxu0 %v6172_v52  ;;  %4764 = vmatpush1.bf16.msra.mxu1 %v6176_v56 }
 0x468   :  { %4734 = vmatprep.subr.bf16.mxu0 %v6180_v60  ;;  %4766 = vmatprep.subr.bf16.mxu1 %v6184_v1 }
 0x46b   :  { %4736 = vmatpush1.bf16.msra.mxu0 %v6193_v4  ;;  %4768 = vmatpush1.bf16.msra.mxu1 %v6197_v6 }
 0x46c   :  { %4770 = vmatprep.subr.bf16.mxu0 %v6057_v17  ;;  %4802 = vmatprep.subr.bf16.mxu1 %v6059_v21 }
 0x521   :  { %v1203_v27 = vpop.f32.mrb[8].mxu0  ;;  %v1274_v45 = vpop.f32.mrb[8].mxu1 }
 0x522   :  { %v5553_v48 = vadd.f32 %v1203_v27, %v6258_v16  ;;  %v1205_v49 = vpop.f32.mrb[9].mxu0  ;;  %v1276_v51 = vpop.f32.mrb[9].mxu1  ;;  %v5569_v55 = vadd.f32 %v1274_v45, %v6266_v20 }
 0x523   :  { %v5554_v53 = vadd.f32 %v1205_v49, %v6262_v18  ;;  %v5570_v57 = vadd.f32 %v1276_v51, %v6274_v40 }
 0x524   :  { %5659 = vtanh.f32 %v5553_v48 }
 0x525   :  { %5661 = vtanh.f32 %v5554_v53 }
 0x526   :  { %5663 = vtanh.f32 %v5569_v55 }
 0x527   :  { %5665 = vtanh.f32 %v5570_v57 }
 0x52e   :  { %v5660_v59 = vpop.eup %5659 }
 0x52f   :  { %v1287_v63 = vmul.f32 0.5, %v5660_v59  ;;  %v5662_v7 = vpop.eup %5661 }
 0x530   :  { %v1289_v26 = vmul.f32 0.5, %v5662_v7  ;;  %v5664_v30 = vpop.eup %5663 }
 0x531   :  { %v1288_v23 = vadd.f32 0.5, %v1287_v63  ;;  %v5666_v41 = vpop.eup %5665 }
 0x532   :  { %v1290_v31 = vadd.f32 0.5, %v1289_v26  ;;  %v1291_v44 = vmul.f32 0.5, %v5666_v41 }
 0x533   :  { %v1294_v32 = vmul.f32 %v5664_v30, %v1288_v23 }
 0x534   :  { %v1293_v36 = vmul.f32 %v1290_v31, %v6403_v62  ;;  %v1292_v27 = vadd.f32 0.5, %v1291_v44 }
 0x536   :  { %v6445_v12 = vadd.f32 %v1294_v32, %v1293_v36 }
 0x538   :  { %5667 = vtanh.f32 %v6445_v12 }
 0x542   :  { %v5668_v45 = vpop.eup %5667 }
 0x543   :  { %v1297_v48 = vmul.f32 %v5668_v45, %v1292_v27 }
 0x545   :  { %1367 = vmatmul.mubr.f32.vlgmr.msra.gmra.mrb[10].mxu0 %v1297_v48  ;;  %1438 = vmatmul.mubr.f32.vlgmr.msra.gmra.mrb[10].mxu1 %v1297_v48 }
 0x546   :  { %4772 = vmatpush1.bf16.msra.mxu0 %v6061_v22  ;;  %4804 = vmatpush1.bf16.msra.mxu1 %v6064_v25 }
 0x547   :  { %4774 = vmatprep.subr.bf16.mxu0 %v6068_v29  ;;  %4806 = vmatprep.subr.bf16.mxu1 %v6075_v34 }
 0x548   :  { %1531 = vmatprep.mubr.f32.mxu0 %v5905_v0  ;;  %1602 = vmatprep.mubr.f32.mxu1 %v5905_v0 }
 0x54a   :  { %4776 = vmatpush1.bf16.msra.mxu0 %v6077_v35  ;;  %4808 = vmatpush1.bf16.msra.mxu1 %v6081_v38 }
 0x54b   :  { %4778 = vmatprep.subr.bf16.mxu0 %v6085_v42  ;;  %4810 = vmatprep.subr.bf16.mxu1 %v6092_v47 }
 0x54e   :  { %4780 = vmatpush1.bf16.msra.mxu0 %v6096_v50  ;;  %4812 = vmatpush1.bf16.msra.mxu1 %v6100_v54 }
 0x54f   :  { %4782 = vmatprep.subr.bf16.mxu0 %v6104_v58  ;;  %4814 = vmatprep.subr.bf16.mxu1 %v6108_v61 }
 0x552   :  { %4784 = vmatpush1.bf16.msra.mxu0 %v6115_v2  ;;  %4816 = vmatpush1.bf16.msra.mxu1 %v6119_v5 }
 0x553   :  { %4786 = vmatprep.subr.bf16.mxu0 %v6123_v8  ;;  %4818 = vmatprep.subr.bf16.mxu1 %v6127_v11 }
 0x556   :  { %4788 = vmatpush1.bf16.msra.mxu0 %v6134_v15  ;;  %4820 = vmatpush1.bf16.msra.mxu1 %v6138_v19 }
 0x557   :  { %4790 = vmatprep.subr.bf16.mxu0 %v6142_v24  ;;  %4822 = vmatprep.subr.bf16.mxu1 %v6146_v28 }
 0x55a   :  { %4792 = vmatpush1.bf16.msra.mxu0 %v6153_v33  ;;  %4824 = vmatpush1.bf16.msra.mxu1 %v6157_v39 }
 0x55b   :  { %4794 = vmatprep.subr.bf16.mxu0 %v6161_v43  ;;  %4826 = vmatprep.subr.bf16.mxu1 %v6165_v46 }
 0x55e   :  { %4796 = vmatpush1.bf16.msra.mxu0 %v6172_v52  ;;  %4828 = vmatpush1.bf16.msra.mxu1 %v6176_v56 }
 0x55f   :  { %4798 = vmatprep.subr.bf16.mxu0 %v6180_v60  ;;  %4830 = vmatprep.subr.bf16.mxu1 %v6184_v1 }
 0x562   :  { %4800 = vmatpush1.bf16.msra.mxu0 %v6193_v4  ;;  %4832 = vmatpush1.bf16.msra.mxu1 %v6197_v6 }
 0x563   :  { %4834 = vmatprep.subr.bf16.mxu0 %v6057_v17  ;;  %4866 = vmatprep.subr.bf16.mxu1 %v6059_v21 }
 0x618   :  { %v1368_v62 = vpop.f32.mrb[10].mxu0  ;;  %v1439_v49 = vpop.f32.mrb[10].mxu1 }
 0x619   :  { %v5555_v51 = vadd.f32 %v1368_v62, %v6258_v16  ;;  %v1370_v53 = vpop.f32.mrb[11].mxu0  ;;  %v1441_v55 = vpop.f32.mrb[11].mxu1  ;;  %v5571_v59 = vadd.f32 %v1439_v49, %v6266_v20  ;;  %v1796_v49 = vld [vmem:[#allocation7 + $0x10] sm:$0xff] }
 0x61a   :  { %v5556_v57 = vadd.f32 %v1370_v53, %v6262_v18  ;;  %v5572_v63 = vadd.f32 %v1441_v55, %v6274_v40  ;;  %v1800_v53 = vld [vmem:[#allocation7 + $0x30] sm:$0xff] }
 0x61b   :  { %5669 = vtanh.f32 %v5555_v51  ;;  %v4903_v55 = vpack.c.bf16 %v1800_v53, %v1796_v49  ;;  %v2006_v49 = vld [vmem:[#allocation9 + $0x128] sm:$0xff] }
 0x61c   :  { %5671 = vtanh.f32 %v5556_v57  ;;  %v1970_v57 = vld [vmem:[#allocation9 + $0x8] sm:$0xff] }
 0x61d   :  { %5673 = vtanh.f32 %v5571_v59  ;;  %v1974_v59 = vld [vmem:[#allocation9 + $0x28] sm:$0xff] }
 0x61e   :  { %5675 = vtanh.f32 %v5572_v63  ;;  %v1972_v63 = vld [vmem:[#allocation9 + $0x18] sm:$0xff] }
 0x625   :  { %v5670_v7 = vpop.eup %5669 }
 0x626   :  { %v1452_v23 = vmul.f32 0.5, %v5670_v7  ;;  %v5672_v17 = vpop.eup %5671  ;;  %v6528_v7 = vpack.c.bf16 %v1974_v59, %v1970_v57  ;;  %v2001_v57 = vld [vmem:[#allocation9 + $0x100] sm:$0xff] }
 0x627   :  { %v1454_v21 = vmul.f32 0.5, %v5672_v17  ;;  %v5674_v30 = vpop.eup %5673  ;;  %v1969_v17 = vld [vmem:[#allocation9] sm:$0xff] }
 0x628   :  { %v1453_v26 = vadd.f32 0.5, %v1452_v23  ;;  %v5676_v44 = vpop.eup %5675  ;;  %v1976_v23 = vld [vmem:[#allocation9 + $0x38] sm:$0xff]  ;;  %v2005_v59 = vld [vmem:[#allocation9 + $0x120] sm:$0xff] }
 0x629   :  { %v1455_v31 = vadd.f32 0.5, %v1454_v21  ;;  %v1456_v27 = vmul.f32 0.5, %v5676_v44  ;;  %v6530_v21 = vpack.c.bf16 %v1976_v23, %v1972_v63  ;;  %v1982_v44 = vld [vmem:[#allocation9 + $0x68] sm:$0xff]  ;;  %v6586_v23 = vpack.c.bf16 %v2005_v59, %v2001_v57  ;;  %v2025_v57 = vld [vmem:[#allocation9 + $0x1c0] sm:$0xff] }
 0x62a   :  { %v1459_v32 = vmul.f32 %v5674_v30, %v1453_v26  ;;  %v1973_v26 = vld [vmem:[#allocation9 + $0x20] sm:$0xff] }
 0x62b   :  { %v1458_v36 = vmul.f32 %v1455_v31, %v6445_v12  ;;  %v1457_v45 = vadd.f32 0.5, %v1456_v27  ;;  %v1798_v12 = vld [vmem:[#allocation7 + $0x20] sm:$0xff]  ;;  %v6532_v30 = vpack.c.bf16 %v1973_v26, %v1969_v17  ;;  %v1971_v31 = vld [vmem:[#allocation9 + $0x10] sm:$0xff]  ;;  %v1980_v27 = vld [vmem:[#allocation9 + $0x58] sm:$0xff] }
 0x62c   :  { %v2003_v17 = vld [vmem:[#allocation9 + $0x110] sm:$0xff]  ;;  %v2029_v59 = vld [vmem:[#allocation9 + $0x1e0] sm:$0xff] }
 0x62d   :  { %v1460_v41 = vadd.f32 %v1459_v32, %v1458_v36  ;;  %v1975_v32 = vld [vmem:[#allocation9 + $0x30] sm:$0xff] }
 0x62e   :  { %v6537_v36 = vpack.c.bf16 %v1975_v32, %v1971_v31  ;;  %v2007_v26 = vld [vmem:[#allocation9 + $0x130] sm:$0xff]  ;;  %v2010_v32 = vld [vmem:[#allocation9 + $0x148] sm:$0xff] }
 0x62f   :  { %5677 = vtanh.f32 %v1460_v41  ;;  %v6589_v31 = vpack.c.bf16 %v2007_v26, %v2003_v17  ;;  %v6622_v26 = vpack.c.bf16 %v2029_v59, %v2025_v57 }
 0x639   :  { %v5678_v48 = vpop.eup %5677 }
 0x63a   :  { %v1462_v62 = vmul.f32 %v5678_v48, %v1457_v45  ;;  %v1984_v48 = vld [vmem:[#allocation9 + $0x78] sm:$0xff] }
 0x63c   :  { %1532 = vmatmul.mubr.f32.vlgmr.msra.gmra.mrb[12].mxu0 %v1462_v62  ;;  %1603 = vmatmul.mubr.f32.vlgmr.msra.gmra.mrb[12].mxu1 %v1462_v62  ;;  %v1977_v62 = vld [vmem:[#allocation9 + $0x40] sm:$0xff] }
 0x63d   :  { %4836 = vmatpush1.bf16.msra.mxu0 %v6061_v22  ;;  %4868 = vmatpush1.bf16.msra.mxu1 %v6064_v25 }
 0x63e   :  { %4838 = vmatprep.subr.bf16.mxu0 %v6068_v29  ;;  %4870 = vmatprep.subr.bf16.mxu1 %v6075_v34 }
 0x63f   :  { %1696 = vmatprep.mubr.f32.mxu0 %v5905_v0  ;;  %1767 = vmatprep.mubr.f32.mxu1 %v5905_v0 }
 0x641   :  { %4840 = vmatpush1.bf16.msra.mxu0 %v6077_v35  ;;  %4872 = vmatpush1.bf16.msra.mxu1 %v6081_v38 }
 0x642   :  { %4842 = vmatprep.subr.bf16.mxu0 %v6085_v42  ;;  %4874 = vmatprep.subr.bf16.mxu1 %v6092_v47 }
 0x645   :  { %4844 = vmatpush1.bf16.msra.mxu0 %v6096_v50  ;;  %4876 = vmatpush1.bf16.msra.mxu1 %v6100_v54 }
 0x646   :  { %4846 = vmatprep.subr.bf16.mxu0 %v6104_v58  ;;  %4878 = vmatprep.subr.bf16.mxu1 %v6108_v61 }
 0x649   :  { %4848 = vmatpush1.bf16.msra.mxu0 %v6115_v2  ;;  %4880 = vmatpush1.bf16.msra.mxu1 %v6119_v5 }
 0x64a   :  { %4850 = vmatprep.subr.bf16.mxu0 %v6123_v8  ;;  %4882 = vmatprep.subr.bf16.mxu1 %v6127_v11 }
 0x64d   :  { %4852 = vmatpush1.bf16.msra.mxu0 %v6134_v15  ;;  %4884 = vmatpush1.bf16.msra.mxu1 %v6138_v19 }
 0x64e   :  { %4854 = vmatprep.subr.bf16.mxu0 %v6142_v24  ;;  %4886 = vmatprep.subr.bf16.mxu1 %v6146_v28 }
 0x651   :  { %4856 = vmatpush1.bf16.msra.mxu0 %v6153_v33  ;;  %4888 = vmatpush1.bf16.msra.mxu1 %v6157_v39 }
 0x652   :  { %4858 = vmatprep.subr.bf16.mxu0 %v6161_v43  ;;  %4890 = vmatprep.subr.bf16.mxu1 %v6165_v46  ;;  %v1795_v46 = vld [vmem:[#allocation7 + $0x8] sm:$0xff] }
 0x655   :  { %4860 = vmatpush1.bf16.msra.mxu0 %v6172_v52  ;;  %4892 = vmatpush1.bf16.msra.mxu1 %v6176_v56  ;;  %v1799_v52 = vld [vmem:[#allocation7 + $0x28] sm:$0xff]  ;;  %v1797_v56 = vld [vmem:[#allocation7 + $0x18] sm:$0xff] }
 0x656   :  { %4862 = vmatprep.subr.bf16.mxu0 %v6180_v60  ;;  %4894 = vmatprep.subr.bf16.mxu1 %v6184_v1  ;;  %v4897_v60 = vpack.c.bf16 %v1799_v52, %v1795_v46  ;;  %v1801_v1 = vld [vmem:[#allocation7 + $0x38] sm:$0xff]  ;;  %v1993_v46 = vld [vmem:[#allocation9 + $0xc0] sm:$0xff] }
 0x657   :  { %v1997_v52 = vld [vmem:[#allocation9 + $0xe0] sm:$0xff] }
 0x659   :  { %4864 = vmatpush1.bf16.msra.mxu0 %v6193_v4  ;;  %4896 = vmatpush1.bf16.msra.mxu1 %v6197_v6  ;;  %v4901_v4 = vpack.c.bf16 %v1801_v1, %v1797_v56  ;;  %v1794_v6 = vld [vmem:[#allocation7] sm:$0xff]  ;;  %v1995_v1 = vld [vmem:[#allocation9 + $0xd0] sm:$0xff] }
 0x65a   :  { %4898 = vmatprep.subr.bf16.mxu0 %v4897_v60  ;;  %v4899_v51 = vpack.c.bf16 %v1798_v12, %v1794_v6  ;;  %v6574_v60 = vpack.c.bf16 %v1997_v52, %v1993_v46  ;;  %v2002_v12 = vld [vmem:[#allocation9 + $0x108] sm:$0xff]  ;;  %v2019_v46 = vld [vmem:[#allocation9 + $0x190] sm:$0xff] }
 0x65b   :  { %4902 = vmatprep.subr.bf16.mxu1 %v4901_v4  ;;  %v1999_v4 = vld [vmem:[#allocation9 + $0xf0] sm:$0xff]  ;;  %v6582_v53 = vpack.c.bf16 %v2006_v49, %v2002_v12  ;;  %v2030_v12 = vld [vmem:[#allocation9 + $0x1e8] sm:$0xff]  ;;  %v2028_v49 = vld [vmem:[#allocation9 + $0x1d8] sm:$0xff] }
 0x65c   :  { %v6577_v6 = vpack.c.bf16 %v1999_v4, %v1995_v1  ;;  %v2023_v52 = vld [vmem:[#allocation9 + $0x1b0] sm:$0xff]  ;;  %v2026_v4 = vld [vmem:[#allocation9 + $0x1c8] sm:$0xff] }
 0x65d   :  { %v6613_v1 = vpack.c.bf16 %v2023_v52, %v2019_v46 }
 0x70f   :  { %v1533_v22 = vpop.f32.mrb[12].mxu0  ;;  %v1604_v25 = vpop.f32.mrb[12].mxu1 }
 0x710   :  { %v5557_v29 = vadd.f32 %v1533_v22, %v6258_v16  ;;  %v1535_v34 = vpop.f32.mrb[13].mxu0  ;;  %v1606_v35 = vpop.f32.mrb[13].mxu1  ;;  %v5573_v42 = vadd.f32 %v1604_v25, %v6266_v20  ;;  %v1981_v22 = vld [vmem:[#allocation9 + $0x60] sm:$0xff]  ;;  %v6546_v25 = vpack.c.bf16 %v1984_v48, %v1980_v27  ;;  %v2016_v48 = vld [vmem:[#allocation9 + $0x178] sm:$0xff] }
 0x711   :  { %v5558_v38 = vadd.f32 %v1535_v34, %v6262_v18  ;;  %v5574_v47 = vadd.f32 %v1606_v35, %v6274_v40  ;;  %v1979_v34 = vld [vmem:[#allocation9 + $0x50] sm:$0xff] }
 0x712   :  { %5679 = vtanh.f32 %v5557_v29  ;;  %v6548_v29 = vpack.c.bf16 %v1981_v22, %v1977_v62  ;;  %v1983_v35 = vld [vmem:[#allocation9 + $0x70] sm:$0xff]  ;;  %v2009_v62 = vld [vmem:[#allocation9 + $0x140] sm:$0xff] }
 0x713   :  { %5681 = vtanh.f32 %v5558_v38  ;;  %v1986_v38 = vld [vmem:[#allocation9 + $0x88] sm:$0xff]  ;;  %v2013_v22 = vld [vmem:[#allocation9 + $0x160] sm:$0xff] }
 0x714   :  { %5683 = vtanh.f32 %v5573_v42  ;;  %v1990_v42 = vld [vmem:[#allocation9 + $0xa8] sm:$0xff] }
 0x715   :  { %5685 = vtanh.f32 %v5574_v47  ;;  %v1988_v47 = vld [vmem:[#allocation9 + $0x98] sm:$0xff] }
 0x71c   :  { %v5680_v50 = vpop.eup %5679 }
 0x71d   :  { %v1617_v54 = vmul.f32 0.5, %v5680_v50  ;;  %v5682_v58 = vpop.eup %5681  ;;  %v6558_v50 = vpack.c.bf16 %v1990_v42, %v1986_v38  ;;  %v2011_v38 = vld [vmem:[#allocation9 + $0x150] sm:$0xff] }
 0x71e   :  { %v1619_v2 = vmul.f32 0.5, %v5682_v58  ;;  %v5684_v5 = vpop.eup %5683  ;;  %v1985_v58 = vld [vmem:[#allocation9 + $0x80] sm:$0xff]  ;;  %v2015_v42 = vld [vmem:[#allocation9 + $0x170] sm:$0xff] }
 0x71f   :  { %v1618_v61 = vadd.f32 0.5, %v1617_v54  ;;  %v5686_v24 = vpop.eup %5685  ;;  %v1992_v54 = vld [vmem:[#allocation9 + $0xb8] sm:$0xff] }
 0x720   :  { %v1620_v8 = vadd.f32 0.5, %v1619_v2  ;;  %v1621_v28 = vmul.f32 0.5, %v5686_v24  ;;  %v6560_v2 = vpack.c.bf16 %v1992_v54, %v1988_v47  ;;  %v1994_v24 = vld [vmem:[#allocation9 + $0xc8] sm:$0xff]  ;;  %v6601_v47 = vpack.c.bf16 %v2015_v42, %v2011_v38 }
 0x721   :  { %v1624_v11 = vmul.f32 %v5684_v5, %v1618_v61  ;;  %v1989_v61 = vld [vmem:[#allocation9 + $0xa0] sm:$0xff]  ;;  %v2018_v54 = vld [vmem:[#allocation9 + $0x188] sm:$0xff] }
 0x722   :  { %v1623_v15 = vmul.f32 %v1620_v8, %v1460_v41  ;;  %v1622_v33 = vadd.f32 0.5, %v1621_v28  ;;  %v1978_v41 = vld [vmem:[#allocation9 + $0x48] sm:$0xff]  ;;  %v6562_v5 = vpack.c.bf16 %v1989_v61, %v1985_v58  ;;  %v1987_v8 = vld [vmem:[#allocation9 + $0x90] sm:$0xff]  ;;  %v2020_v61 = vld [vmem:[#allocation9 + $0x198] sm:$0xff] }
 0x723   :  { %v6544_v45 = vpack.c.bf16 %v1982_v44, %v1978_v41  ;;  %v1998_v28 = vld [vmem:[#allocation9 + $0xe8] sm:$0xff]  ;;  %v2012_v44 = vld [vmem:[#allocation9 + $0x158] sm:$0xff] }
 0x724   :  { %v6523_v19 = vadd.f32 %v1624_v11, %v1623_v15  ;;  %v1991_v11 = vld [vmem:[#allocation9 + $0xb0] sm:$0xff]  ;;  %v2014_v41 = vld [vmem:[#allocation9 + $0x168] sm:$0xff] }
 0x725   :  { %v6565_v15 = vpack.c.bf16 %v1991_v11, %v1987_v8  ;;  %v6594_v27 = vpack.c.bf16 %v2014_v41, %v2010_v32  ;;  %v2022_v58 = vld [vmem:[#allocation9 + $0x1a8] sm:$0xff]  ;;  %v2024_v11 = vld [vmem:[#allocation9 + $0x1b8] sm:$0xff]  ;;  %v2027_v32 = vld [vmem:[#allocation9 + $0x1d0] sm:$0xff] }
 0x726   :  { %5687 = vtanh.f32 %v6523_v19  ;;  %v6606_v8 = vpack.c.bf16 %v2022_v58, %v2018_v54  ;;  %v2031_v41 = vld [vmem:[#allocation9 + $0x1f0] sm:$0xff] }
 0x730   :  { %v5688_v39 = vpop.eup %5687 }
 0x731   :  { %v1627_v43 = vmul.f32 %v5688_v39, %v1622_v33  ;;  %v1996_v33 = vld [vmem:[#allocation9 + $0xd8] sm:$0xff]  ;;  %v6570_v39 = vpack.c.bf16 %v1998_v28, %v1994_v24  ;;  %v2017_v24 = vld [vmem:[#allocation9 + $0x180] sm:$0xff] }
 0x732   :  { %v2021_v28 = vld [vmem:[#allocation9 + $0x1a0] sm:$0xff] }
 0x733   :  { %1697 = vmatmul.mubr.f32.vlgmr.msra.gmra.mrb[14].mxu0 %v1627_v43  ;;  %1768 = vmatmul.mubr.f32.vlgmr.msra.gmra.mrb[14].mxu1 %v1627_v43  ;;  %v2000_v43 = vld [vmem:[#allocation9 + $0xf8] sm:$0xff] }
 0x734   :  { %1891 = vmatprep.mubr.f32.mxu0 %v5905_v0  ;;  %1962 = vmatprep.mubr.f32.mxu1 %v5905_v0  ;;  %v6572_v56 = vpack.c.bf16 %v2000_v43, %v1996_v33  ;;  %v6608_v33 = vpack.c.bf16 %v2024_v11, %v2020_v61  ;;  %v6610_v43 = vpack.c.bf16 %v2021_v28, %v2017_v24 }
 0x735   :  { %4900 = vmatpush1.bf16.msra.mxu0 %v4899_v51  ;;  %4904 = vmatpush1.bf16.msra.mxu1 %v4903_v55  ;;  %v2004_v51 = vld [vmem:[#allocation9 + $0x118] sm:$0xff] }
 0x736   :  { %4906 = vmatprep.subr.bf16.mxu0 %v6528_v7  ;;  %4938 = vmatprep.subr.bf16.mxu1 %v6530_v21  ;;  %v2008_v55 = vld [vmem:[#allocation9 + $0x138] sm:$0xff] }
 0x737   :  { %v6584_v63 = vpack.c.bf16 %v2008_v55, %v2004_v51  ;;  %v6618_v51 = vpack.c.bf16 %v2030_v12, %v2026_v4  ;;  %v2032_v55 = vld [vmem:[#allocation9 + $0x1f8] sm:$0xff] }
 0x738   :  { %4234 = vmatmul.mubr.msk.f32.vlgmr.msra.gmra.mrb[16].mxu0 %vm126_vm0, %v6191_v3  ;;  %4235 = vmatmul.mubr.msk.f32.vlgmr.msra.gmra.mrb[16].mxu1 %vm126_vm0, %v6191_v3  ;;  %v6553_v3 = vpack.c.bf16 %v1983_v35, %v1979_v34  ;;  %v6596_v34 = vpack.c.bf16 %v2016_v48, %v2012_v44  ;;  %v6598_v35 = vpack.c.bf16 %v2013_v22, %v2009_v62 }
 0x739   :  { %4908 = vmatpush1.bf16.msra.mxu0 %v6532_v30  ;;  %4940 = vmatpush1.bf16.msra.mxu1 %v6537_v36  ;;  %v6620_v17 = vpack.c.bf16 %v2032_v55, %v2028_v49  ;;  %v6625_v44 = vpack.c.bf16 %v2031_v41, %v2027_v32 }
 0x73a   :  { %2097 = vmatprep.mubr.f32.mxu0 %v5905_v0  ;;  %2168 = vmatprep.mubr.f32.mxu1 %v5905_v0 }
 0x73b   :  { %4910 = vmatprep.subr.bf16.mxu0 %v6544_v45  ;;  %4942 = vmatprep.subr.bf16.mxu1 %v6546_v25 }
 0x73d   :  { %4912 = vmatpush1.bf16.msra.mxu0 %v6548_v29  ;;  %4944 = vmatpush1.bf16.msra.mxu1 %v6553_v3 }
 0x73e   :  { %4914 = vmatprep.subr.bf16.mxu0 %v6558_v50  ;;  %4946 = vmatprep.subr.bf16.mxu1 %v6560_v2 }
 0x741   :  { %4916 = vmatpush1.bf16.msra.mxu0 %v6562_v5  ;;  %4948 = vmatpush1.bf16.msra.mxu1 %v6565_v15 }
 0x742   :  { %4918 = vmatprep.subr.bf16.mxu0 %v6570_v39  ;;  %4950 = vmatprep.subr.bf16.mxu1 %v6572_v56 }
 0x745   :  { %4920 = vmatpush1.bf16.msra.mxu0 %v6574_v60  ;;  %4952 = vmatpush1.bf16.msra.mxu1 %v6577_v6 }
 0x746   :  { %4922 = vmatprep.subr.bf16.mxu0 %v6582_v53  ;;  %4954 = vmatprep.subr.bf16.mxu1 %v6584_v63 }
 0x749   :  { %4924 = vmatpush1.bf16.msra.mxu0 %v6586_v23  ;;  %4956 = vmatpush1.bf16.msra.mxu1 %v6589_v31 }
 0x74a   :  { %4926 = vmatprep.subr.bf16.mxu0 %v6594_v27  ;;  %4958 = vmatprep.subr.bf16.mxu1 %v6596_v34 }
 0x74d   :  { %4928 = vmatpush1.bf16.msra.mxu0 %v6598_v35  ;;  %4960 = vmatpush1.bf16.msra.mxu1 %v6601_v47 }
 0x74e   :  { %4930 = vmatprep.subr.bf16.mxu0 %v6606_v8  ;;  %4962 = vmatprep.subr.bf16.mxu1 %v6608_v33 }
 0x751   :  { %4932 = vmatpush1.bf16.msra.mxu0 %v6610_v43  ;;  %4964 = vmatpush1.bf16.msra.mxu1 %v6613_v1 }
 0x752   :  { %4934 = vmatprep.subr.bf16.mxu0 %v6618_v51  ;;  %4966 = vmatprep.subr.bf16.mxu1 %v6620_v17 }
 0x755   :  { %4936 = vmatpush1.bf16.msra.mxu0 %v6622_v26  ;;  %4968 = vmatpush1.bf16.msra.mxu1 %v6625_v44 }
 0x756   :  { %4970 = vmatprep.subr.bf16.mxu0 %v6528_v7  ;;  %5002 = vmatprep.subr.bf16.mxu1 %v6530_v21 }
 0x806   :  { %v1698_v48 = vpop.f32.mrb[14].mxu0  ;;  %v1769_v62 = vpop.f32.mrb[14].mxu1 }
 0x807   :  { %v5559_v22 = vadd.f32 %v1698_v48, %v6258_v16  ;;  %v1700_v38 = vpop.f32.mrb[15].mxu0  ;;  %v1771_v42 = vpop.f32.mrb[15].mxu1  ;;  %v5575_v58 = vadd.f32 %v1769_v62, %v6266_v20  ;;  %v1802_v62 = vld [vmem:[%s7072_s6] sm:$0xf] }
 0x808   :  { %v5560_v54 = vadd.f32 %v1700_v38, %v6262_v18  ;;  %v5576_v61 = vadd.f32 %v1771_v42, %v6274_v40  ;;  %v1811_v38 = vrot.slane %v1802_v62, %v112_v13  ;;  %v1815_v42 = vrot.slane %v1802_v62, %v116_v14 }
 0x809   :  { %5689 = vtanh.f32 %v5559_v22  ;;  %v1807_v22 = vrot.slane %v1802_v62, %v108_v10  ;;  %v1819_v14 = vrot.slane %v1802_v62, %v120_v37 }
 0x80a   :  { %5691 = vtanh.f32 %v5560_v54 }
 0x80b   :  { %5693 = vtanh.f32 %v5575_v58  ;;  %v1964_v41 = vpop.f32.mrb[16].mxu1 }
 0x80c   :  { %5695 = vtanh.f32 %v5576_v61  ;;  %v1966_v48 = vpop.f32.mrb[17].mxu1 }
 0x813   :  { %v5690_v11 = vpop.eup %5689 }
 0x814   :  { %v1782_v24 = vmul.f32 0.5, %v5690_v11  ;;  %v5692_v28 = vpop.eup %5691 }
 0x815   :  { %v1784_v52 = vmul.f32 0.5, %v5692_v28  ;;  %v5694_v4 = vpop.eup %5693 }
 0x816   :  { %v1783_v46 = vadd.f32 0.5, %v1782_v24  ;;  %v5696_v18 = vpop.eup %5695  ;;  %v6687_v24 = vadd.f32 %v1964_v41, %v1815_v42 }
 0x817   :  { %v1785_v12 = vadd.f32 0.5, %v1784_v52  ;;  %v1786_v20 = vmul.f32 0.5, %v5696_v18 }
 0x818   :  { %v1789_v16 = vmul.f32 %v5694_v4, %v1783_v46  ;;  %v6694_v4 = vadd.f32 %v1966_v48, %v1819_v14 }
 0x819   :  { %v1788_v49 = vmul.f32 %v1785_v12, %v6523_v19  ;;  %v1787_v57 = vadd.f32 0.5, %v1786_v20  ;;  %v1893_v19 = vpop.f32.mrb[16].mxu0 }
 0x81a   :  { %v1895_v32 = vpop.f32.mrb[17].mxu0  ;;  %v6683_v54 = vadd.f32 %v1893_v19, %v1807_v22 }
 0x81b   :  { %v6637_v55 = vadd.f32 %v1789_v16, %v1788_v49  ;;  %v6685_v58 = vadd.f32 %v1895_v32, %v1811_v38 }
 0x81d   :  { %5697 = vtanh.f32 %v6637_v55 }
 0x827   :  { %v5698_v59 = vpop.eup %5697 }
 0x828   :  { %v1792_v40 = vmul.f32 %v5698_v59, %v1787_v57 }
 0x82a   :  { %2098 = vmatmul.mubr.f32.vlgmr.msra.gmra.mrb[18].mxu0 %v1792_v40  ;;  %2169 = vmatmul.mubr.f32.vlgmr.msra.gmra.mrb[18].mxu1 %v1792_v40 }
 0x82b   :  { %4972 = vmatpush1.bf16.msra.mxu0 %v6532_v30  ;;  %5004 = vmatpush1.bf16.msra.mxu1 %v6537_v36 }
 0x82c   :  { %4974 = vmatprep.subr.bf16.mxu0 %v6544_v45  ;;  %5006 = vmatprep.subr.bf16.mxu1 %v6546_v25 }
 0x82d   :  { %2323 = vmatprep.mubr.f32.mxu0 %v5905_v0  ;;  %2394 = vmatprep.mubr.f32.mxu1 %v5905_v0 }
 0x82f   :  { %4976 = vmatpush1.bf16.msra.mxu0 %v6548_v29  ;;  %5008 = vmatpush1.bf16.msra.mxu1 %v6553_v3 }
 0x830   :  { %4978 = vmatprep.subr.bf16.mxu0 %v6558_v50  ;;  %5010 = vmatprep.subr.bf16.mxu1 %v6560_v2 }
 0x833   :  { %4980 = vmatpush1.bf16.msra.mxu0 %v6562_v5  ;;  %5012 = vmatpush1.bf16.msra.mxu1 %v6565_v15 }
 0x834   :  { %4982 = vmatprep.subr.bf16.mxu0 %v6570_v39  ;;  %5014 = vmatprep.subr.bf16.mxu1 %v6572_v56 }
 0x837   :  { %4984 = vmatpush1.bf16.msra.mxu0 %v6574_v60  ;;  %5016 = vmatpush1.bf16.msra.mxu1 %v6577_v6 }
 0x838   :  { %4986 = vmatprep.subr.bf16.mxu0 %v6582_v53  ;;  %5018 = vmatprep.subr.bf16.mxu1 %v6584_v63 }
 0x83b   :  { %4988 = vmatpush1.bf16.msra.mxu0 %v6586_v23  ;;  %5020 = vmatpush1.bf16.msra.mxu1 %v6589_v31 }
 0x83c   :  { %4990 = vmatprep.subr.bf16.mxu0 %v6594_v27  ;;  %5022 = vmatprep.subr.bf16.mxu1 %v6596_v34 }
 0x83f   :  { %4992 = vmatpush1.bf16.msra.mxu0 %v6598_v35  ;;  %5024 = vmatpush1.bf16.msra.mxu1 %v6601_v47 }
 0x840   :  { %4994 = vmatprep.subr.bf16.mxu0 %v6606_v8  ;;  %5026 = vmatprep.subr.bf16.mxu1 %v6608_v33 }
 0x843   :  { %4996 = vmatpush1.bf16.msra.mxu0 %v6610_v43  ;;  %5028 = vmatpush1.bf16.msra.mxu1 %v6613_v1 }
 0x844   :  { %4998 = vmatprep.subr.bf16.mxu0 %v6618_v51  ;;  %5030 = vmatprep.subr.bf16.mxu1 %v6620_v17 }
 0x847   :  { %5000 = vmatpush1.bf16.msra.mxu0 %v6622_v26  ;;  %5032 = vmatpush1.bf16.msra.mxu1 %v6625_v44 }
 0x848   :  { %5034 = vmatprep.subr.bf16.mxu0 %v6528_v7  ;;  %5066 = vmatprep.subr.bf16.mxu1 %v6530_v21 }
 0x8fd   :  { %v2099_v61 = vpop.f32.mrb[18].mxu0  ;;  %v2170_v11 = vpop.f32.mrb[18].mxu1 }
 0x8fe   :  { %v2175_v28 = vadd.f32 %v2099_v61, %v6683_v54  ;;  %v2101_v46 = vpop.f32.mrb[19].mxu0  ;;  %v2172_v52 = vpop.f32.mrb[19].mxu1  ;;  %v2177_v13 = vadd.f32 %v2170_v11, %v6687_v24 }
 0x8ff   :  { %v2176_v10 = vadd.f32 %v2101_v46, %v6685_v58  ;;  %v2178_v12 = vadd.f32 %v2172_v52, %v6694_v4 }
 0x900   :  { %5699 = vtanh.f32 %v2175_v28 }
 0x901   :  { %5701 = vtanh.f32 %v2176_v10 }
 0x902   :  { %5703 = vtanh.f32 %v2177_v13 }
 0x903   :  { %5705 = vtanh.f32 %v2178_v12 }
 0x90a   :  { %v5700_v16 = vpop.eup %5699 }
 0x90b   :  { %v2183_v49 = vmul.f32 0.5, %v5700_v16  ;;  %v5702_v18 = vpop.eup %5701 }
 0x90c   :  { %v2185_v57 = vmul.f32 0.5, %v5702_v18  ;;  %v5704_v59 = vpop.eup %5703 }
 0x90d   :  { %v2184_v20 = vadd.f32 0.5, %v2183_v49  ;;  %v5706_v9 = vpop.eup %5705 }
 0x90e   :  { %v2186_v40 = vadd.f32 0.5, %v2185_v57  ;;  %v2187_v37 = vmul.f32 0.5, %v5706_v9 }
 0x90f   :  { %v2190_v19 = vmul.f32 %v5704_v59, %v2184_v20 }
 0x910   :  { %v2189_v32 = vmul.f32 %v2186_v40, %v6637_v55  ;;  %v2188_v48 = vadd.f32 0.5, %v2187_v37  ;;  %v2875_v37 = vld [vmem:[#allocation9 + $0x10] sm:$0xff] }
 0x912   :  { %v6698_v41 = vadd.f32 %v2190_v19, %v2189_v32 }
 0x914   :  { %5707 = vtanh.f32 %v6698_v41 }
 0x91e   :  { %v5708_v62 = vpop.eup %5707 }
 0x91f   :  { %v6701_v22 = vmul.f32 %v5708_v62, %v2188_v48  ;;  %v2879_v48 = vld [vmem:[#allocation9 + $0x30] sm:$0xff] }
 0x920   :  { %v6800_v62 = vpack.c.bf16 %v2879_v48, %v2875_v37  ;;  %v2918_v37 = vld [vmem:[#allocation9 + $0x168] sm:$0xff]  ;;  %v2916_v48 = vld [vmem:[#allocation9 + $0x158] sm:$0xff] }
 0x921   :  { %2324 = vmatmul.mubr.f32.vlgmr.msra.gmra.mrb[20].mxu0 %v6701_v22  ;;  %2395 = vmatmul.mubr.f32.vlgmr.msra.gmra.mrb[20].mxu1 %v6701_v22 }
 0x922   :  { %5036 = vmatpush1.bf16.msra.mxu0 %v6532_v30  ;;  %5068 = vmatpush1.bf16.msra.mxu1 %v6537_v36 }
 0x923   :  { %5038 = vmatprep.subr.bf16.mxu0 %v6544_v45  ;;  %5070 = vmatprep.subr.bf16.mxu1 %v6546_v25 }
 0x924   :  { %2549 = vmatprep.mubr.f32.mxu0 %v5905_v0  ;;  %2620 = vmatprep.mubr.f32.mxu1 %v5905_v0 }
 0x926   :  { %5040 = vmatpush1.bf16.msra.mxu0 %v6548_v29  ;;  %5072 = vmatpush1.bf16.msra.mxu1 %v6553_v3 }
 0x927   :  { %5042 = vmatprep.subr.bf16.mxu0 %v6558_v50  ;;  %5074 = vmatprep.subr.bf16.mxu1 %v6560_v2 }
 0x92a   :  { %5044 = vmatpush1.bf16.msra.mxu0 %v6562_v5  ;;  %5076 = vmatpush1.bf16.msra.mxu1 %v6565_v15 }
 0x92b   :  { %5046 = vmatprep.subr.bf16.mxu0 %v6570_v39  ;;  %5078 = vmatprep.subr.bf16.mxu1 %v6572_v56 }
 0x92e   :  { %5048 = vmatpush1.bf16.msra.mxu0 %v6574_v60  ;;  %5080 = vmatpush1.bf16.msra.mxu1 %v6577_v6 }
 0x92f   :  { %5050 = vmatprep.subr.bf16.mxu0 %v6582_v53  ;;  %5082 = vmatprep.subr.bf16.mxu1 %v6584_v63 }
 0x932   :  { %5052 = vmatpush1.bf16.msra.mxu0 %v6586_v23  ;;  %5084 = vmatpush1.bf16.msra.mxu1 %v6589_v31 }
 0x933   :  { %5054 = vmatprep.subr.bf16.mxu0 %v6594_v27  ;;  %5086 = vmatprep.subr.bf16.mxu1 %v6596_v34 }
 0x936   :  { %5056 = vmatpush1.bf16.msra.mxu0 %v6598_v35  ;;  %5088 = vmatpush1.bf16.msra.mxu1 %v6601_v47 }
 0x937   :  { %5058 = vmatprep.subr.bf16.mxu0 %v6606_v8  ;;  %5090 = vmatprep.subr.bf16.mxu1 %v6608_v33 }
 0x93a   :  { %5060 = vmatpush1.bf16.msra.mxu0 %v6610_v43  ;;  %5092 = vmatpush1.bf16.msra.mxu1 %v6613_v1 }
 0x93b   :  { %5062 = vmatprep.subr.bf16.mxu0 %v6618_v51  ;;  %5094 = vmatprep.subr.bf16.mxu1 %v6620_v17 }
 0x93e   :  { %5064 = vmatpush1.bf16.msra.mxu0 %v6622_v26  ;;  %5096 = vmatpush1.bf16.msra.mxu1 %v6625_v44 }
 0x93f   :  { %5098 = vmatprep.subr.bf16.mxu0 %v6528_v7  ;;  %5130 = vmatprep.subr.bf16.mxu1 %v6530_v21 }
 0x9f4   :  { %v2325_v55 = vpop.f32.mrb[20].mxu0  ;;  %v2396_v38 = vpop.f32.mrb[20].mxu1 }
 0x9f5   :  { %v2401_v42 = vadd.f32 %v2325_v55, %v6683_v54  ;;  %v2327_v61 = vpop.f32.mrb[21].mxu0  ;;  %v2398_v11 = vpop.f32.mrb[21].mxu1  ;;  %v2403_v46 = vadd.f32 %v2396_v38, %v6687_v24  ;;  %v2882_v55 = vld [vmem:[#allocation9 + $0x48] sm:$0xff] }
 0x9f6   :  { %v2402_v28 = vadd.f32 %v2327_v61, %v6685_v58  ;;  %v2404_v52 = vadd.f32 %v2398_v11, %v6694_v4  ;;  %v2886_v38 = vld [vmem:[#allocation9 + $0x68] sm:$0xff]  ;;  %v2888_v11 = vld [vmem:[#allocation9 + $0x78] sm:$0xff] }
 0x9f7   :  { %5709 = vtanh.f32 %v2401_v42  ;;  %v2884_v42 = vld [vmem:[#allocation9 + $0x58] sm:$0xff]  ;;  %v6805_v61 = vpack.c.bf16 %v2886_v38, %v2882_v55 }
 0x9f8   :  { %5711 = vtanh.f32 %v2402_v28  ;;  %v2881_v28 = vld [vmem:[#allocation9 + $0x40] sm:$0xff]  ;;  %v2920_v38 = vld [vmem:[#allocation9 + $0x178] sm:$0xff] }
 0x9f9   :  { %5713 = vtanh.f32 %v2403_v46  ;;  %v2885_v46 = vld [vmem:[#allocation9 + $0x60] sm:$0xff] }
 0x9fa   :  { %5715 = vtanh.f32 %v2404_v52  ;;  %v6807_v52 = vpack.c.bf16 %v2888_v11, %v2884_v42  ;;  %v2913_v42 = vld [vmem:[#allocation9 + $0x140] sm:$0xff] }
 0x9fb   :  { %v2917_v11 = vld [vmem:[#allocation9 + $0x160] sm:$0xff] }
 0xa01   :  { %v5710_v10 = vpop.eup %5709 }
 0xa02   :  { %v2409_v13 = vmul.f32 0.5, %v5710_v10  ;;  %v5712_v7 = vpop.eup %5711  ;;  %v6809_v10 = vpack.c.bf16 %v2885_v46, %v2881_v28  ;;  %v6855_v28 = vpack.c.bf16 %v2920_v38, %v2916_v48  ;;  %v6857_v46 = vpack.c.bf16 %v2917_v11, %v2913_v42 }
 0xa03   :  { %v2411_v21 = vmul.f32 0.5, %v5712_v7  ;;  %v5714_v12 = vpop.eup %5713  ;;  %v2887_v7 = vld [vmem:[#allocation9 + $0x70] sm:$0xff] }
 0xa04   :  { %v2410_v14 = vadd.f32 0.5, %v2409_v13  ;;  %v5716_v57 = vpop.eup %5715  ;;  %v2883_v13 = vld [vmem:[#allocation9 + $0x50] sm:$0xff] }
 0xa05   :  { %v2412_v16 = vadd.f32 0.5, %v2411_v21  ;;  %v2413_v59 = vmul.f32 0.5, %v5716_v57  ;;  %v2890_v21 = vld [vmem:[#allocation9 + $0x88] sm:$0xff]  ;;  %v2893_v57 = vld [vmem:[#allocation9 + $0xa0] sm:$0xff] }
 0xa06   :  { %v2416_v49 = vmul.f32 %v5714_v12, %v2410_v14  ;;  %v6812_v14 = vpack.c.bf16 %v2887_v7, %v2883_v13  ;;  %v2894_v12 = vld [vmem:[#allocation9 + $0xa8] sm:$0xff]  ;;  %v2915_v13 = vld [vmem:[#allocation9 + $0x150] sm:$0xff] }
 0xa07   :  { %v2415_v18 = vmul.f32 %v2412_v16, %v6698_v41  ;;  %v2414_v40 = vadd.f32 0.5, %v2413_v59  ;;  %v2892_v16 = vld [vmem:[#allocation9 + $0x98] sm:$0xff]  ;;  %v2919_v7 = vld [vmem:[#allocation9 + $0x170] sm:$0xff] }
 0xa09   :  { %v2417_v20 = vadd.f32 %v2416_v49, %v2415_v18  ;;  %v6817_v49 = vpack.c.bf16 %v2894_v12, %v2890_v21  ;;  %v2896_v18 = vld [vmem:[#allocation9 + $0xb8] sm:$0xff]  ;;  %v6860_v21 = vpack.c.bf16 %v2919_v7, %v2915_v13  ;;  %v2922_v12 = vld [vmem:[#allocation9 + $0x188] sm:$0xff] }
 0xa0a   :  { %v6819_v59 = vpack.c.bf16 %v2896_v18, %v2892_v16  ;;  %v2926_v16 = vld [vmem:[#allocation9 + $0x1a8] sm:$0xff]  ;;  %v2924_v18 = vld [vmem:[#allocation9 + $0x198] sm:$0xff] }
 0xa0b   :  { %5717 = vtanh.f32 %v2417_v20 }
 0xa15   :  { %v5718_v19 = vpop.eup %5717 }
 0xa16   :  { %v6744_v32 = vmul.f32 %v5718_v19, %v2414_v40  ;;  %v2891_v19 = vld [vmem:[#allocation9 + $0x90] sm:$0xff] }
 0xa18   :  { %2550 = vmatmul.mubr.f32.vlgmr.msra.gmra.mrb[22].mxu0 %v6744_v32  ;;  %2621 = vmatmul.mubr.f32.vlgmr.msra.gmra.mrb[22].mxu1 %v6744_v32 }
 0xa19   :  { %5100 = vmatpush1.bf16.msra.mxu0 %v6532_v30  ;;  %5132 = vmatpush1.bf16.msra.mxu1 %v6537_v36 }
 0xa1a   :  { %5102 = vmatprep.subr.bf16.mxu0 %v6544_v45  ;;  %5134 = vmatprep.subr.bf16.mxu1 %v6546_v25 }
 0xa1b   :  { %2775 = vmatprep.mubr.f32.mxu0 %v5905_v0  ;;  %2846 = vmatprep.mubr.f32.mxu1 %v5905_v0 }
 0xa1d   :  { %5104 = vmatpush1.bf16.msra.mxu0 %v6548_v29  ;;  %5136 = vmatpush1.bf16.msra.mxu1 %v6553_v3 }
 0xa1e   :  { %5106 = vmatprep.subr.bf16.mxu0 %v6558_v50  ;;  %5138 = vmatprep.subr.bf16.mxu1 %v6560_v2 }
 0xa21   :  { %5108 = vmatpush1.bf16.msra.mxu0 %v6562_v5  ;;  %5140 = vmatpush1.bf16.msra.mxu1 %v6565_v15 }
 0xa22   :  { %5110 = vmatprep.subr.bf16.mxu0 %v6570_v39  ;;  %5142 = vmatprep.subr.bf16.mxu1 %v6572_v56 }
 0xa25   :  { %5112 = vmatpush1.bf16.msra.mxu0 %v6574_v60  ;;  %5144 = vmatpush1.bf16.msra.mxu1 %v6577_v6 }
 0xa26   :  { %5114 = vmatprep.subr.bf16.mxu0 %v6582_v53  ;;  %5146 = vmatprep.subr.bf16.mxu1 %v6584_v63 }
 0xa29   :  { %5116 = vmatpush1.bf16.msra.mxu0 %v6586_v23  ;;  %5148 = vmatpush1.bf16.msra.mxu1 %v6589_v31 }
 0xa2a   :  { %5118 = vmatprep.subr.bf16.mxu0 %v6594_v27  ;;  %5150 = vmatprep.subr.bf16.mxu1 %v6596_v34 }
 0xa2d   :  { %5120 = vmatpush1.bf16.msra.mxu0 %v6598_v35  ;;  %5152 = vmatpush1.bf16.msra.mxu1 %v6601_v47 }
 0xa2e   :  { %5122 = vmatprep.subr.bf16.mxu0 %v6606_v8  ;;  %5154 = vmatprep.subr.bf16.mxu1 %v6608_v33  ;;  %v2874_v33 = vld [vmem:[#allocation9 + $0x8] sm:$0xff] }
 0xa31   :  { %5124 = vmatpush1.bf16.msra.mxu0 %v6610_v43  ;;  %5156 = vmatpush1.bf16.msra.mxu1 %v6613_v1  ;;  %v2878_v43 = vld [vmem:[#allocation9 + $0x28] sm:$0xff]  ;;  %v2876_v1 = vld [vmem:[#allocation9 + $0x18] sm:$0xff] }
 0xa32   :  { %5126 = vmatprep.subr.bf16.mxu0 %v6618_v51  ;;  %5158 = vmatprep.subr.bf16.mxu1 %v6620_v17  ;;  %v6793_v51 = vpack.c.bf16 %v2878_v43, %v2874_v33  ;;  %v2880_v17 = vld [vmem:[#allocation9 + $0x38] sm:$0xff] }
 0xa33   :  { %v6795_v41 = vpack.c.bf16 %v2880_v17, %v2876_v1  ;;  %v2907_v1 = vld [vmem:[#allocation9 + $0x110] sm:$0xff] }
 0xa34   :  { %v2911_v17 = vld [vmem:[#allocation9 + $0x130] sm:$0xff] }
 0xa35   :  { %5128 = vmatpush1.bf16.msra.mxu0 %v6622_v26  ;;  %5160 = vmatpush1.bf16.msra.mxu1 %v6625_v44  ;;  %v2873_v26 = vld [vmem:[#allocation9] sm:$0xff] }
 0xa36   :  { %v2877_v44 = vld [vmem:[#allocation9 + $0x20] sm:$0xff]  ;;  %5162 = vmatprep.subr.bf16.mxu0 %v6793_v51  ;;  %5194 = vmatprep.subr.bf16.mxu1 %v6795_v41 }
 0xa37   :  { %v6797_v9 = vpack.c.bf16 %v2877_v44, %v2873_v26  ;;  %v6848_v26 = vpack.c.bf16 %v2911_v17, %v2907_v1  ;;  %v2914_v44 = vld [vmem:[#allocation9 + $0x148] sm:$0xff]  ;;  %v2931_v1 = vld [vmem:[#allocation9 + $0x1d0] sm:$0xff] }
 0xa38   :  { %v6853_v55 = vpack.c.bf16 %v2918_v37, %v2914_v44  ;;  %v2935_v17 = vld [vmem:[#allocation9 + $0x1f0] sm:$0xff] }
 0xa39   :  { %v6884_v44 = vpack.c.bf16 %v2935_v17, %v2931_v1 }
 0xaeb   :  { %v2551_v30 = vpop.f32.mrb[22].mxu0  ;;  %v2622_v36 = vpop.f32.mrb[22].mxu1 }
 0xaec   :  { %v2627_v45 = vadd.f32 %v2551_v30, %v6683_v54  ;;  %v2553_v25 = vpop.f32.mrb[23].mxu0  ;;  %v2624_v29 = vpop.f32.mrb[23].mxu1  ;;  %v2629_v50 = vadd.f32 %v2622_v36, %v6687_v24  ;;  %v2895_v30 = vld [vmem:[#allocation9 + $0xb0] sm:$0xff] }
 0xaed   :  { %v2628_v3 = vadd.f32 %v2553_v25, %v6685_v58  ;;  %v2630_v2 = vadd.f32 %v2624_v29, %v6694_v4  ;;  %v6824_v36 = vpack.c.bf16 %v2895_v30, %v2891_v19  ;;  %v2902_v25 = vld [vmem:[#allocation9 + $0xe8] sm:$0xff]  ;;  %v2900_v29 = vld [vmem:[#allocation9 + $0xd8] sm:$0xff]  ;;  %v2921_v19 = vld [vmem:[#allocation9 + $0x180] sm:$0xff] }
 0xaee   :  { %5719 = vtanh.f32 %v2627_v45  ;;  %v2898_v45 = vld [vmem:[#allocation9 + $0xc8] sm:$0xff]  ;;  %v2925_v30 = vld [vmem:[#allocation9 + $0x1a0] sm:$0xff] }
 0xaef   :  { %5721 = vtanh.f32 %v2628_v3  ;;  %v6829_v3 = vpack.c.bf16 %v2902_v25, %v2898_v45  ;;  %v6869_v25 = vpack.c.bf16 %v2925_v30, %v2921_v19 }
 0xaf0   :  { %5723 = vtanh.f32 %v2629_v50  ;;  %v2904_v50 = vld [vmem:[#allocation9 + $0xf8] sm:$0xff] }
 0xaf1   :  { %5725 = vtanh.f32 %v2630_v2  ;;  %v2897_v2 = vld [vmem:[#allocation9 + $0xc0] sm:$0xff] }
 0xaf8   :  { %v5720_v5 = vpop.eup %5719 }
 0xaf9   :  { %v2635_v15 = vmul.f32 0.5, %v5720_v5  ;;  %v5722_v39 = vpop.eup %5721  ;;  %v2901_v5 = vld [vmem:[#allocation9 + $0xe0] sm:$0xff] }
 0xafa   :  { %v2637_v60 = vmul.f32 0.5, %v5722_v39  ;;  %v5724_v6 = vpop.eup %5723  ;;  %v6833_v39 = vpack.c.bf16 %v2901_v5, %v2897_v2  ;;  %v2930_v5 = vld [vmem:[#allocation9 + $0x1c8] sm:$0xff] }
 0xafb   :  { %v2636_v56 = vadd.f32 0.5, %v2635_v15  ;;  %v5726_v27 = vpop.eup %5725  ;;  %v6831_v15 = vpack.c.bf16 %v2904_v50, %v2900_v29  ;;  %v2923_v29 = vld [vmem:[#allocation9 + $0x190] sm:$0xff] }
 0xafc   :  { %v2638_v53 = vadd.f32 0.5, %v2637_v60  ;;  %v2639_v34 = vmul.f32 0.5, %v5726_v27  ;;  %v2903_v60 = vld [vmem:[#allocation9 + $0xf0] sm:$0xff] }
 0xafd   :  { %v2642_v63 = vmul.f32 %v5724_v6, %v2636_v56  ;;  %v2899_v56 = vld [vmem:[#allocation9 + $0xd0] sm:$0xff] }
 0xafe   :  { %v2641_v23 = vmul.f32 %v2638_v53, %v2417_v20  ;;  %v2640_v35 = vadd.f32 0.5, %v2639_v34  ;;  %v2889_v20 = vld [vmem:[#allocation9 + $0x80] sm:$0xff]  ;;  %v6836_v6 = vpack.c.bf16 %v2903_v60, %v2899_v56  ;;  %v2906_v53 = vld [vmem:[#allocation9 + $0x108] sm:$0xff]  ;;  %v2912_v34 = vld [vmem:[#allocation9 + $0x138] sm:$0xff] }
 0xaff   :  { %v6821_v40 = vpack.c.bf16 %v2893_v57, %v2889_v20  ;;  %v6865_v20 = vpack.c.bf16 %v2926_v16, %v2922_v12  ;;  %v2928_v57 = vld [vmem:[#allocation9 + $0x1b8] sm:$0xff]  ;;  %v2927_v50 = vld [vmem:[#allocation9 + $0x1b0] sm:$0xff]  ;;  %v2934_v56 = vld [vmem:[#allocation9 + $0x1e8] sm:$0xff] }
 0xb00   :  { %v6784_v31 = vadd.f32 %v2642_v63, %v2641_v23  ;;  %v2910_v63 = vld [vmem:[#allocation9 + $0x128] sm:$0xff]  ;;  %v2908_v23 = vld [vmem:[#allocation9 + $0x118] sm:$0xff]  ;;  %v6867_v45 = vpack.c.bf16 %v2928_v57, %v2924_v18  ;;  %v6872_v2 = vpack.c.bf16 %v2927_v50, %v2923_v29 }
 0xb01   :  { %v6841_v27 = vpack.c.bf16 %v2910_v63, %v2906_v53  ;;  %v6843_v33 = vpack.c.bf16 %v2912_v34, %v2908_v23  ;;  %v2932_v60 = vld [vmem:[#allocation9 + $0x1d8] sm:$0xff]  ;;  %v6877_v53 = vpack.c.bf16 %v2934_v56, %v2930_v5  ;;  %v2929_v23 = vld [vmem:[#allocation9 + $0x1c0] sm:$0xff] }
 0xb02   :  { %5727 = vtanh.f32 %v6784_v31  ;;  %v2936_v63 = vld [vmem:[#allocation9 + $0x1f8] sm:$0xff]  ;;  %v2933_v34 = vld [vmem:[#allocation9 + $0x1e0] sm:$0xff] }
 0xb0c   :  { %v5728_v47 = vpop.eup %5727 }
 0xb0d   :  { %v6787_v8 = vmul.f32 %v5728_v47, %v2640_v35  ;;  %v2905_v35 = vld [vmem:[#allocation9 + $0x100] sm:$0xff] }
 0xb0e   :  { %v2909_v47 = vld [vmem:[#allocation9 + $0x120] sm:$0xff] }
 0xb0f   :  { %2776 = vmatmul.mubr.f32.vlgmr.msra.gmra.mrb[24].mxu0 %v6787_v8  ;;  %2847 = vmatmul.mubr.f32.vlgmr.msra.gmra.mrb[24].mxu1 %v6787_v8  ;;  %v6845_v43 = vpack.c.bf16 %v2909_v47, %v2905_v35  ;;  %v6879_v35 = vpack.c.bf16 %v2936_v63, %v2932_v60  ;;  %v6881_v47 = vpack.c.bf16 %v2933_v34, %v2929_v23 }
 0xb10   :  { %3001 = vmatprep.mubr.f32.mxu0 %v5905_v0  ;;  %3072 = vmatprep.mubr.f32.mxu1 %v5905_v0 }
 0xb11   :  { %5164 = vmatpush1.bf16.msra.mxu0 %v6797_v9  ;;  %5196 = vmatpush1.bf16.msra.mxu1 %v6800_v62 }
 0xb12   :  { %5166 = vmatprep.subr.bf16.mxu0 %v6805_v61  ;;  %5198 = vmatprep.subr.bf16.mxu1 %v6807_v52 }
 0xb15   :  { %5168 = vmatpush1.bf16.msra.mxu0 %v6809_v10  ;;  %5200 = vmatpush1.bf16.msra.mxu1 %v6812_v14 }
 0xb16   :  { %5170 = vmatprep.subr.bf16.mxu0 %v6817_v49  ;;  %5202 = vmatprep.subr.bf16.mxu1 %v6819_v59 }
 0xb19   :  { %5172 = vmatpush1.bf16.msra.mxu0 %v6821_v40  ;;  %5204 = vmatpush1.bf16.msra.mxu1 %v6824_v36 }
 0xb1a   :  { %5174 = vmatprep.subr.bf16.mxu0 %v6829_v3  ;;  %5206 = vmatprep.subr.bf16.mxu1 %v6831_v15 }
 0xb1d   :  { %5176 = vmatpush1.bf16.msra.mxu0 %v6833_v39  ;;  %5208 = vmatpush1.bf16.msra.mxu1 %v6836_v6 }
 0xb1e   :  { %5178 = vmatprep.subr.bf16.mxu0 %v6841_v27  ;;  %5210 = vmatprep.subr.bf16.mxu1 %v6843_v33 }
 0xb21   :  { %5180 = vmatpush1.bf16.msra.mxu0 %v6845_v43  ;;  %5212 = vmatpush1.bf16.msra.mxu1 %v6848_v26 }
 0xb22   :  { %5182 = vmatprep.subr.bf16.mxu0 %v6853_v55  ;;  %5214 = vmatprep.subr.bf16.mxu1 %v6855_v28 }
 0xb25   :  { %5184 = vmatpush1.bf16.msra.mxu0 %v6857_v46  ;;  %5216 = vmatpush1.bf16.msra.mxu1 %v6860_v21 }
 0xb26   :  { %5186 = vmatprep.subr.bf16.mxu0 %v6865_v20  ;;  %5218 = vmatprep.subr.bf16.mxu1 %v6867_v45 }
 0xb29   :  { %5188 = vmatpush1.bf16.msra.mxu0 %v6869_v25  ;;  %5220 = vmatpush1.bf16.msra.mxu1 %v6872_v2 }
 0xb2a   :  { %5190 = vmatprep.subr.bf16.mxu0 %v6877_v53  ;;  %5222 = vmatprep.subr.bf16.mxu1 %v6879_v35 }
 0xb2d   :  { %5192 = vmatpush1.bf16.msra.mxu0 %v6881_v47  ;;  %5224 = vmatpush1.bf16.msra.mxu1 %v6884_v44 }
 0xb2e   :  { %5226 = vmatprep.subr.bf16.mxu0 %v6793_v51  ;;  %5258 = vmatprep.subr.bf16.mxu1 %v6795_v41 }
 0xbe2   :  { %v2777_v37 = vpop.f32.mrb[24].mxu0  ;;  %v2848_v48 = vpop.f32.mrb[24].mxu1 }
 0xbe3   :  { %v2853_v38 = vadd.f32 %v2777_v37, %v6683_v54  ;;  %v2779_v42 = vpop.f32.mrb[25].mxu0  ;;  %v2850_v11 = vpop.f32.mrb[25].mxu1  ;;  %v2855_v7 = vadd.f32 %v2848_v48, %v6687_v24 }
 0xbe4   :  { %v2854_v13 = vadd.f32 %v2779_v42, %v6685_v58  ;;  %v2856_v12 = vadd.f32 %v2850_v11, %v6694_v4 }
 0xbe5   :  { %5729 = vtanh.f32 %v2853_v38 }
 0xbe6   :  { %5731 = vtanh.f32 %v2854_v13 }
 0xbe7   :  { %5733 = vtanh.f32 %v2855_v7 }
 0xbe8   :  { %5735 = vtanh.f32 %v2856_v12 }
 0xbef   :  { %v5730_v16 = vpop.eup %5729 }
 0xbf0   :  { %v2861_v18 = vmul.f32 0.5, %v5730_v16  ;;  %v5732_v57 = vpop.eup %5731 }
 0xbf1   :  { %v2863_v30 = vmul.f32 0.5, %v5732_v57  ;;  %v5734_v29 = vpop.eup %5733 }
 0xbf2   :  { %v2862_v19 = vadd.f32 0.5, %v2861_v18  ;;  %v5736_v63 = vpop.eup %5735 }
 0xbf3   :  { %v2864_v50 = vadd.f32 0.5, %v2863_v30  ;;  %v2865_v23 = vmul.f32 0.5, %v5736_v63 }
 0xbf4   :  { %v2868_v5 = vmul.f32 %v5734_v29, %v2862_v19 }
 0xbf5   :  { %v2867_v56 = vmul.f32 %v2864_v50, %v6784_v31  ;;  %v2866_v34 = vadd.f32 0.5, %v2865_v23 }
 0xbf7   :  { %v6896_v60 = vadd.f32 %v2868_v5, %v2867_v56 }
 0xbf9   :  { %5737 = vtanh.f32 %v6896_v60 }
 0xc03   :  { %v5738_v1 = vpop.eup %5737 }
 0xc04   :  { %v6899_v17 = vmul.f32 %v5738_v1, %v2866_v34 }
 0xc06   :  { %3002 = vmatmul.mubr.f32.vlgmr.msra.gmra.mrb[26].mxu0 %v6899_v17  ;;  %3073 = vmatmul.mubr.f32.vlgmr.msra.gmra.mrb[26].mxu1 %v6899_v17 }
 0xc07   :  { %5228 = vmatpush1.bf16.msra.mxu0 %v6797_v9  ;;  %5260 = vmatpush1.bf16.msra.mxu1 %v6800_v62 }
 0xc08   :  { %5230 = vmatprep.subr.bf16.mxu0 %v6805_v61  ;;  %5262 = vmatprep.subr.bf16.mxu1 %v6807_v52 }
 0xc09   :  { %3227 = vmatprep.mubr.f32.mxu0 %v5905_v0  ;;  %3298 = vmatprep.mubr.f32.mxu1 %v5905_v0 }
 0xc0b   :  { %5232 = vmatpush1.bf16.msra.mxu0 %v6809_v10  ;;  %5264 = vmatpush1.bf16.msra.mxu1 %v6812_v14 }
 0xc0c   :  { %5234 = vmatprep.subr.bf16.mxu0 %v6817_v49  ;;  %5266 = vmatprep.subr.bf16.mxu1 %v6819_v59 }
 0xc0f   :  { %5236 = vmatpush1.bf16.msra.mxu0 %v6821_v40  ;;  %5268 = vmatpush1.bf16.msra.mxu1 %v6824_v36 }
 0xc10   :  { %5238 = vmatprep.subr.bf16.mxu0 %v6829_v3  ;;  %5270 = vmatprep.subr.bf16.mxu1 %v6831_v15 }
 0xc13   :  { %5240 = vmatpush1.bf16.msra.mxu0 %v6833_v39  ;;  %5272 = vmatpush1.bf16.msra.mxu1 %v6836_v6 }
 0xc14   :  { %5242 = vmatprep.subr.bf16.mxu0 %v6841_v27  ;;  %5274 = vmatprep.subr.bf16.mxu1 %v6843_v33 }
 0xc17   :  { %5244 = vmatpush1.bf16.msra.mxu0 %v6845_v43  ;;  %5276 = vmatpush1.bf16.msra.mxu1 %v6848_v26 }
 0xc18   :  { %5246 = vmatprep.subr.bf16.mxu0 %v6853_v55  ;;  %5278 = vmatprep.subr.bf16.mxu1 %v6855_v28 }
 0xc1b   :  { %5248 = vmatpush1.bf16.msra.mxu0 %v6857_v46  ;;  %5280 = vmatpush1.bf16.msra.mxu1 %v6860_v21 }
 0xc1c   :  { %5250 = vmatprep.subr.bf16.mxu0 %v6865_v20  ;;  %5282 = vmatprep.subr.bf16.mxu1 %v6867_v45 }
 0xc1f   :  { %5252 = vmatpush1.bf16.msra.mxu0 %v6869_v25  ;;  %5284 = vmatpush1.bf16.msra.mxu1 %v6872_v2 }
 0xc20   :  { %5254 = vmatprep.subr.bf16.mxu0 %v6877_v53  ;;  %5286 = vmatprep.subr.bf16.mxu1 %v6879_v35 }
 0xc23   :  { %5256 = vmatpush1.bf16.msra.mxu0 %v6881_v47  ;;  %5288 = vmatpush1.bf16.msra.mxu1 %v6884_v44 }
 0xc24   :  { %5290 = vmatprep.subr.bf16.mxu0 %v6793_v51  ;;  %5322 = vmatprep.subr.bf16.mxu1 %v6795_v41 }
 0xcd9   :  { %v3003_v31 = vpop.f32.mrb[26].mxu0  ;;  %v3074_v37 = vpop.f32.mrb[26].mxu1 }
 0xcda   :  { %v3079_v48 = vadd.f32 %v3003_v31, %v6683_v54  ;;  %v3005_v38 = vpop.f32.mrb[27].mxu0  ;;  %v3076_v42 = vpop.f32.mrb[27].mxu1  ;;  %v3081_v13 = vadd.f32 %v3074_v37, %v6687_v24 }
 0xcdb   :  { %v3080_v11 = vadd.f32 %v3005_v38, %v6685_v58  ;;  %v3082_v7 = vadd.f32 %v3076_v42, %v6694_v4 }
 0xcdc   :  { %5739 = vtanh.f32 %v3079_v48 }
 0xcdd   :  { %5741 = vtanh.f32 %v3080_v11 }
 0xcde   :  { %5743 = vtanh.f32 %v3081_v13 }
 0xcdf   :  { %5745 = vtanh.f32 %v3082_v7 }
 0xce6   :  { %v5740_v12 = vpop.eup %5739 }
 0xce7   :  { %v3087_v16 = vmul.f32 0.5, %v5740_v12  ;;  %v5742_v18 = vpop.eup %5741 }
 0xce8   :  { %v3089_v19 = vmul.f32 0.5, %v5742_v18  ;;  %v5744_v30 = vpop.eup %5743 }
 0xce9   :  { %v3088_v57 = vadd.f32 0.5, %v3087_v16  ;;  %v5746_v63 = vpop.eup %5745 }
 0xcea   :  { %v3090_v29 = vadd.f32 0.5, %v3089_v19  ;;  %v3091_v23 = vmul.f32 0.5, %v5746_v63 }
 0xceb   :  { %v3094_v50 = vmul.f32 %v5744_v30, %v3088_v57 }
 0xcec   :  { %v3093_v5 = vmul.f32 %v3090_v29, %v6896_v60  ;;  %v3092_v34 = vadd.f32 0.5, %v3091_v23 }
 0xcee   :  { %v6942_v56 = vadd.f32 %v3094_v50, %v3093_v5 }
 0xcf0   :  { %5747 = vtanh.f32 %v6942_v56 }
 0xcfa   :  { %v5748_v1 = vpop.eup %5747 }
 0xcfb   :  { %v6945_v31 = vmul.f32 %v5748_v1, %v3092_v34 }
 0xcfd   :  { %3228 = vmatmul.mubr.f32.vlgmr.msra.gmra.mrb[28].mxu0 %v6945_v31  ;;  %3299 = vmatmul.mubr.f32.vlgmr.msra.gmra.mrb[28].mxu1 %v6945_v31 }
 0xcfe   :  { %5292 = vmatpush1.bf16.msra.mxu0 %v6797_v9  ;;  %5324 = vmatpush1.bf16.msra.mxu1 %v6800_v62 }
 0xcff   :  { %5294 = vmatprep.subr.bf16.mxu0 %v6805_v61  ;;  %5326 = vmatprep.subr.bf16.mxu1 %v6807_v52 }
 0xd00   :  { %3453 = vmatprep.mubr.f32.mxu0 %v5905_v0  ;;  %3524 = vmatprep.mubr.f32.mxu1 %v5905_v0 }
 0xd02   :  { %5296 = vmatpush1.bf16.msra.mxu0 %v6809_v10  ;;  %5328 = vmatpush1.bf16.msra.mxu1 %v6812_v14 }
 0xd03   :  { %5298 = vmatprep.subr.bf16.mxu0 %v6817_v49  ;;  %5330 = vmatprep.subr.bf16.mxu1 %v6819_v59 }
 0xd06   :  { %5300 = vmatpush1.bf16.msra.mxu0 %v6821_v40  ;;  %5332 = vmatpush1.bf16.msra.mxu1 %v6824_v36 }
 0xd07   :  { %5302 = vmatprep.subr.bf16.mxu0 %v6829_v3  ;;  %5334 = vmatprep.subr.bf16.mxu1 %v6831_v15 }
 0xd0a   :  { %5304 = vmatpush1.bf16.msra.mxu0 %v6833_v39  ;;  %5336 = vmatpush1.bf16.msra.mxu1 %v6836_v6 }
 0xd0b   :  { %5306 = vmatprep.subr.bf16.mxu0 %v6841_v27  ;;  %5338 = vmatprep.subr.bf16.mxu1 %v6843_v33 }
 0xd0e   :  { %5308 = vmatpush1.bf16.msra.mxu0 %v6845_v43  ;;  %5340 = vmatpush1.bf16.msra.mxu1 %v6848_v26 }
 0xd0f   :  { %5310 = vmatprep.subr.bf16.mxu0 %v6853_v55  ;;  %5342 = vmatprep.subr.bf16.mxu1 %v6855_v28 }
 0xd12   :  { %5312 = vmatpush1.bf16.msra.mxu0 %v6857_v46  ;;  %5344 = vmatpush1.bf16.msra.mxu1 %v6860_v21 }
 0xd13   :  { %5314 = vmatprep.subr.bf16.mxu0 %v6865_v20  ;;  %5346 = vmatprep.subr.bf16.mxu1 %v6867_v45 }
 0xd16   :  { %5316 = vmatpush1.bf16.msra.mxu0 %v6869_v25  ;;  %5348 = vmatpush1.bf16.msra.mxu1 %v6872_v2 }
 0xd17   :  { %5318 = vmatprep.subr.bf16.mxu0 %v6877_v53  ;;  %5350 = vmatprep.subr.bf16.mxu1 %v6879_v35 }
 0xd1a   :  { %5320 = vmatpush1.bf16.msra.mxu0 %v6881_v47  ;;  %5352 = vmatpush1.bf16.msra.mxu1 %v6884_v44 }
 0xd1b   :  { %5354 = vmatprep.subr.bf16.mxu0 %v6793_v51  ;;  %5386 = vmatprep.subr.bf16.mxu1 %v6795_v41 }
 0xdd0   :  { %v3229_v60 = vpop.f32.mrb[28].mxu0  ;;  %v3300_v37 = vpop.f32.mrb[28].mxu1 }
 0xdd1   :  { %v3305_v48 = vadd.f32 %v3229_v60, %v6683_v54  ;;  %v3231_v38 = vpop.f32.mrb[29].mxu0  ;;  %v3302_v42 = vpop.f32.mrb[29].mxu1  ;;  %v3307_v13 = vadd.f32 %v3300_v37, %v6687_v24  ;;  %v3804_v60 = vld [vmem:[#allocation10 + $0x98] sm:$0xff]  ;;  %v3835_v37 = vld [vmem:[#allocation10 + $0x190] sm:$0xff] }
 0xdd2   :  { %v3306_v11 = vadd.f32 %v3231_v38, %v6685_v58  ;;  %v3308_v7 = vadd.f32 %v3302_v42, %v6694_v4 }
 0xdd3   :  { %5749 = vtanh.f32 %v3305_v48  ;;  %v3836_v48 = vld [vmem:[#allocation10 + $0x198] sm:$0xff] }
 0xdd4   :  { %5751 = vtanh.f32 %v3306_v11 }
 0xdd5   :  { %5753 = vtanh.f32 %v3307_v13  ;;  %v3787_v13 = vld [vmem:[#allocation10 + $0x10] sm:$0xff] }
 0xdd6   :  { %5755 = vtanh.f32 %v3308_v7  ;;  %v3788_v7 = vld [vmem:[#allocation10 + $0x18] sm:$0xff] }
 0xddd   :  { %v5750_v12 = vpop.eup %5749 }
 0xdde   :  { %v3313_v16 = vmul.f32 0.5, %v5750_v12  ;;  %v5752_v51 = vpop.eup %5751 }
 0xddf   :  { %v3315_v41 = vmul.f32 0.5, %v5752_v51  ;;  %v5754_v57 = vpop.eup %5753  ;;  %v3820_v51 = vld [vmem:[#allocation10 + $0x118] sm:$0xff] }
 0xde0   :  { %v3314_v18 = vadd.f32 0.5, %v3313_v16  ;;  %v5756_v5 = vpop.eup %5755  ;;  %v3819_v16 = vld [vmem:[#allocation10 + $0x110] sm:$0xff] }
 0xde1   :  { %v3316_v19 = vadd.f32 0.5, %v3315_v41  ;;  %v3317_v63 = vmul.f32 0.5, %v5756_v5  ;;  %v5455_v5 = vpack.c.bf16 %v3820_v51, %v3819_v16  ;;  %v3845_v16 = vld [vmem:[#allocation10 + $0x1e0] sm:$0xff]  ;;  %v3846_v51 = vld [vmem:[#allocation10 + $0x1e8] sm:$0xff] }
 0xde2   :  { %v3320_v30 = vmul.f32 %v5754_v57, %v3314_v18  ;;  %v3805_v18 = vld [vmem:[#allocation10 + $0xa0] sm:$0xff]  ;;  %v5453_v57 = vpack.c.bf16 %v3836_v48, %v3835_v37  ;;  %v3796_v37 = vld [vmem:[#allocation10 + $0x58] sm:$0xff] }
 0xde3   :  { %v3319_v29 = vmul.f32 %v3316_v19, %v6942_v56  ;;  %v3318_v23 = vadd.f32 0.5, %v3317_v63  ;;  %v3806_v19 = vld [vmem:[#allocation10 + $0xa8] sm:$0xff]  ;;  %v3789_v63 = vld [vmem:[#allocation10 + $0x20] sm:$0xff] }
 0xde5   :  { %v6988_v50 = vadd.f32 %v3320_v30, %v3319_v29  ;;  %v3837_v30 = vld [vmem:[#allocation10 + $0x1a0] sm:$0xff]  ;;  %v3838_v29 = vld [vmem:[#allocation10 + $0x1a8] sm:$0xff] }
 0xde7   :  { %5757 = vtanh.f32 %v6988_v50 }
 0xdf1   :  { %v5758_v34 = vpop.eup %5757 }
 0xdf2   :  { %v6991_v1 = vmul.f32 %v5758_v34, %v3318_v23  ;;  %v3790_v23 = vld [vmem:[#allocation10 + $0x28] sm:$0xff]  ;;  %v5425_v34 = vpack.c.bf16 %v3806_v19, %v3805_v18 }
 0xdf3   :  { %v3798_v19 = vld [vmem:[#allocation10 + $0x68] sm:$0xff] }
 0xdf4   :  { %3454 = vmatmul.mubr.f32.vlgmr.msra.gmra.mrb[30].mxu0 %v6991_v1  ;;  %3525 = vmatmul.mubr.f32.vlgmr.msra.gmra.mrb[30].mxu1 %v6991_v1 }
 0xdf5   :  { %5356 = vmatpush1.bf16.msra.mxu0 %v6797_v9  ;;  %5388 = vmatpush1.bf16.msra.mxu1 %v6800_v62  ;;  %v3802_v9 = vld [vmem:[#allocation10 + $0x88] sm:$0xff]  ;;  %v3833_v62 = vld [vmem:[#allocation10 + $0x180] sm:$0xff] }
 0xdf6   :  { %5358 = vmatprep.subr.bf16.mxu0 %v6805_v61  ;;  %5390 = vmatprep.subr.bf16.mxu1 %v6807_v52  ;;  %v3834_v52 = vld [vmem:[#allocation10 + $0x188] sm:$0xff] }
 0xdf7   :  { %3679 = vmatprep.mubr.f32.mxu0 %v5905_v0  ;;  %3750 = vmatprep.mubr.f32.mxu1 %v5905_v0  ;;  %v3801_v0 = vld [vmem:[#allocation10 + $0x80] sm:$0xff] }
 0xdf8   :  { %v5417_v61 = vpack.c.bf16 %v3802_v9, %v3801_v0  ;;  %v5457_v0 = vpack.c.bf16 %v3838_v29, %v3837_v30  ;;  %v3821_v9 = vld [vmem:[#allocation10 + $0x120] sm:$0xff]  ;;  %v5473_v29 = vpack.c.bf16 %v3846_v51, %v3845_v16  ;;  %v3859_v16 = vld [vmem:[#allocation10 + $0x250] sm:$0xff]  ;;  %v3860_v51 = vld [vmem:[#allocation10 + $0x258] sm:$0xff] }
 0xdf9   :  { %5360 = vmatpush1.bf16.msra.mxu0 %v6809_v10  ;;  %5392 = vmatpush1.bf16.msra.mxu1 %v6812_v14  ;;  %v5449_v10 = vpack.c.bf16 %v3834_v52, %v3833_v62  ;;  %v3822_v62 = vld [vmem:[#allocation10 + $0x128] sm:$0xff]  ;;  %v3808_v52 = vld [vmem:[#allocation10 + $0xb8] sm:$0xff] }
 0xdfa   :  { %5362 = vmatprep.subr.bf16.mxu0 %v6817_v49  ;;  %5394 = vmatprep.subr.bf16.mxu1 %v6819_v59 }
 0xdfd   :  { %5364 = vmatpush1.bf16.msra.mxu0 %v6821_v40  ;;  %5396 = vmatpush1.bf16.msra.mxu1 %v6824_v36 }
 0xdfe   :  { %5366 = vmatprep.subr.bf16.mxu0 %v6829_v3  ;;  %5398 = vmatprep.subr.bf16.mxu1 %v6831_v15 }
 0xe01   :  { %5368 = vmatpush1.bf16.msra.mxu0 %v6833_v39  ;;  %5400 = vmatpush1.bf16.msra.mxu1 %v6836_v6 }
 0xe02   :  { %5370 = vmatprep.subr.bf16.mxu0 %v6841_v27  ;;  %5402 = vmatprep.subr.bf16.mxu1 %v6843_v33 }
 0xe05   :  { %5372 = vmatpush1.bf16.msra.mxu0 %v6845_v43  ;;  %5404 = vmatpush1.bf16.msra.mxu1 %v6848_v26 }
 0xe06   :  { %5374 = vmatprep.subr.bf16.mxu0 %v6853_v55  ;;  %5406 = vmatprep.subr.bf16.mxu1 %v6855_v28 }
 0xe09   :  { %5376 = vmatpush1.bf16.msra.mxu0 %v6857_v46  ;;  %5408 = vmatpush1.bf16.msra.mxu1 %v6860_v21 }
 0xe0a   :  { %5378 = vmatprep.subr.bf16.mxu0 %v6865_v20  ;;  %5410 = vmatprep.subr.bf16.mxu1 %v6867_v45 }
 0xe0d   :  { %5380 = vmatpush1.bf16.msra.mxu0 %v6869_v25  ;;  %5412 = vmatpush1.bf16.msra.mxu1 %v6872_v2  ;;  %v3785_v2 = vld [vmem:[#allocation10] sm:$0xff] }
 0xe0e   :  { %5382 = vmatprep.subr.bf16.mxu0 %v6877_v53  ;;  %5414 = vmatprep.subr.bf16.mxu1 %v6879_v35  ;;  %v3786_v53 = vld [vmem:[#allocation10 + $0x8] sm:$0xff]  ;;  %v3817_v35 = vld [vmem:[#allocation10 + $0x100] sm:$0xff] }
 0xe0f   :  { %v5419_v42 = vpack.c.bf16 %v3786_v53, %v3785_v2  ;;  %v3811_v2 = vld [vmem:[#allocation10 + $0xd0] sm:$0xff]  ;;  %v3812_v53 = vld [vmem:[#allocation10 + $0xd8] sm:$0xff] }
 0xe10   :  { %v5437_v48 = vpack.c.bf16 %v3812_v53, %v3811_v2  ;;  %v3854_v2 = vld [vmem:[#allocation10 + $0x228] sm:$0xff]  ;;  %v3871_v53 = vld [vmem:[#allocation10 + $0x2b0] sm:$0xff] }
 0xe11   :  { %5384 = vmatpush1.bf16.msra.mxu0 %v6881_v47  ;;  %5416 = vmatpush1.bf16.msra.mxu1 %v6884_v44  ;;  %v3818_v47 = vld [vmem:[#allocation10 + $0x108] sm:$0xff]  ;;  %v3803_v44 = vld [vmem:[#allocation10 + $0x90] sm:$0xff] }
 0xe12   :  { %5418 = vmatprep.subr.bf16.mxu0 %v5417_v61  ;;  %5450 = vmatprep.subr.bf16.mxu1 %v5449_v10  ;;  %v5451_v11 = vpack.c.bf16 %v3818_v47, %v3817_v35  ;;  %v5421_v41 = vpack.c.bf16 %v3804_v60, %v3803_v44  ;;  %v3807_v61 = vld [vmem:[#allocation10 + $0xb0] sm:$0xff]  ;;  %v3844_v47 = vld [vmem:[#allocation10 + $0x1d8] sm:$0xff] }
 0xe13   :  { %v3839_v10 = vld [vmem:[#allocation10 + $0x1b0] sm:$0xff] }
 0xe14   :  { %v3843_v35 = vld [vmem:[#allocation10 + $0x1d0] sm:$0xff] }
 0xe15   :  { %v3795_v60 = vld [vmem:[#allocation10 + $0x50] sm:$0xff] }
 0xe16   :  { %v5439_v18 = vpack.c.bf16 %v3796_v37, %v3795_v60  ;;  %v3856_v60 = vld [vmem:[#allocation10 + $0x238] sm:$0xff]  ;;  %v3873_v37 = vld [vmem:[#allocation10 + $0x2c0] sm:$0xff] }
 0xec7   :  { %v3455_v14 = vpop.f32.mrb[30].mxu0  ;;  %v3526_v49 = vpop.f32.mrb[30].mxu1 }
 0xec8   :  { %v3531_v59 = vadd.f32 %v3455_v14, %v6683_v54  ;;  %v3457_v40 = vpop.f32.mrb[31].mxu0  ;;  %v3528_v36 = vpop.f32.mrb[31].mxu1  ;;  %v3533_v15 = vadd.f32 %v3526_v49, %v6687_v24  ;;  %v3840_v14 = vld [vmem:[#allocation10 + $0x1b8] sm:$0xff]  ;;  %v5427_v49 = vpack.c.bf16 %v3790_v23, %v3789_v63  ;;  %v3815_v63 = vld [vmem:[#allocation10 + $0xf0] sm:$0xff] }
 0xec9   :  { %v3532_v3 = vadd.f32 %v3457_v40, %v6685_v58  ;;  %v3534_v39 = vadd.f32 %v3528_v36, %v6694_v4  ;;  %v3791_v40 = vld [vmem:[#allocation10 + $0x30] sm:$0xff]  ;;  %v3792_v36 = vld [vmem:[#allocation10 + $0x38] sm:$0xff] }
 0xeca   :  { %5759 = vtanh.f32 %v3531_v59  ;;  %v5459_v59 = vpack.c.bf16 %v3822_v62, %v3821_v9  ;;  %v3816_v23 = vld [vmem:[#allocation10 + $0xf8] sm:$0xff] }
 0xecb   :  { %5761 = vtanh.f32 %v3532_v3  ;;  %v3823_v3 = vld [vmem:[#allocation10 + $0x130] sm:$0xff] }
 0xecc   :  { %5763 = vtanh.f32 %v3533_v15  ;;  %v3824_v15 = vld [vmem:[#allocation10 + $0x138] sm:$0xff] }
 0xecd   :  { %5765 = vtanh.f32 %v3534_v39  ;;  %v3809_v39 = vld [vmem:[#allocation10 + $0xc0] sm:$0xff] }
 0xed4   :  { %v5760_v6 = vpop.eup %5759 }
 0xed5   :  { %v3539_v27 = vmul.f32 0.5, %v5760_v6  ;;  %v5762_v33 = vpop.eup %5761  ;;  %v3810_v6 = vld [vmem:[#allocation10 + $0xc8] sm:$0xff] }
 0xed6   :  { %v3541_v26 = vmul.f32 0.5, %v5762_v33  ;;  %v5764_v55 = vpop.eup %5763  ;;  %v3842_v33 = vld [vmem:[#allocation10 + $0x1c8] sm:$0xff] }
 0xed7   :  { %v3540_v43 = vadd.f32 0.5, %v3539_v27  ;;  %v5766_v45 = vpop.eup %5765  ;;  %v3841_v27 = vld [vmem:[#allocation10 + $0x1c0] sm:$0xff] }
 0xed8   :  { %v3542_v28 = vadd.f32 0.5, %v3541_v26  ;;  %v3543_v25 = vmul.f32 0.5, %v5766_v45  ;;  %v5463_v26 = vpack.c.bf16 %v3824_v15, %v3823_v3  ;;  %v3825_v45 = vld [vmem:[#allocation10 + $0x140] sm:$0xff] }
 0xed9   :  { %v3546_v46 = vmul.f32 %v5764_v55, %v3540_v43  ;;  %v5431_v43 = vpack.c.bf16 %v3792_v36, %v3791_v40  ;;  %v3793_v55 = vld [vmem:[#allocation10 + $0x40] sm:$0xff]  ;;  %v3866_v36 = vld [vmem:[#allocation10 + $0x288] sm:$0xff] }
 0xeda   :  { %v3545_v21 = vmul.f32 %v3542_v28, %v6988_v50  ;;  %v3544_v56 = vadd.f32 0.5, %v3543_v25  ;;  %v5423_v50 = vpack.c.bf16 %v3788_v7, %v3787_v13  ;;  %v3794_v28 = vld [vmem:[#allocation10 + $0x48] sm:$0xff]  ;;  %v3813_v13 = vld [vmem:[#allocation10 + $0xe0] sm:$0xff] }
 0xedb   :  { %v3826_v25 = vld [vmem:[#allocation10 + $0x148] sm:$0xff]  ;;  %v5435_v44 = vpack.c.bf16 %v3794_v28, %v3793_v55  ;;  %v3865_v40 = vld [vmem:[#allocation10 + $0x280] sm:$0xff]  ;;  %v3852_v55 = vld [vmem:[#allocation10 + $0x218] sm:$0xff] }
 0xedc   :  { %v7032_v20 = vadd.f32 %v3546_v46, %v3545_v21  ;;  %v5433_v46 = vpack.c.bf16 %v3810_v6, %v3809_v39  ;;  %v5465_v21 = vpack.c.bf16 %v3842_v33, %v3841_v27  ;;  %v3814_v7 = vld [vmem:[#allocation10 + $0xe8] sm:$0xff]  ;;  %v5481_v3 = vpack.c.bf16 %v3866_v36, %v3865_v40  ;;  %v3849_v15 = vld [vmem:[#allocation10 + $0x200] sm:$0xff]  ;;  %v3867_v6 = vld [vmem:[#allocation10 + $0x290] sm:$0xff] }
 0xedd   :  { %v5441_v30 = vpack.c.bf16 %v3814_v7, %v3813_v13  ;;  %v3850_v39 = vld [vmem:[#allocation10 + $0x208] sm:$0xff]  ;;  %v3868_v27 = vld [vmem:[#allocation10 + $0x298] sm:$0xff]  ;;  %v3869_v28 = vld [vmem:[#allocation10 + $0x2a0] sm:$0xff] }
 0xede   :  { %5767 = vtanh.f32 %v7032_v20  ;;  %v5483_v33 = vpack.c.bf16 %v3850_v39, %v3849_v15  ;;  %v3900_v40 = vld [vmem:[#allocation10 + $0x398] sm:$0xff]  ;;  %v3901_v15 = vld [vmem:[#allocation10 + $0x3a0] sm:$0xff]  ;;  %v3902_v39 = vld [vmem:[#allocation10 + $0x3a8] sm:$0xff] }
 0xee8   :  { %v5768_v38 = vpop.eup %5767 }
 0xee9   :  { %v7035_v12 = vmul.f32 %v5768_v38, %v3544_v56  ;;  %v5467_v56 = vpack.c.bf16 %v3826_v25, %v3825_v45  ;;  %v5469_v38 = vpack.c.bf16 %v3844_v47, %v3843_v35  ;;  %v3853_v25 = vld [vmem:[#allocation10 + $0x220] sm:$0xff]  ;;  %v3872_v35 = vld [vmem:[#allocation10 + $0x2b8] sm:$0xff] }
 0xeea   :  { %v5491_v47 = vpack.c.bf16 %v3854_v2, %v3853_v25  ;;  %v3906_v25 = vld [vmem:[#allocation10 + $0x3c8] sm:$0xff] }
 0xeeb   :  { %3680 = vmatmul.mubr.f32.vlgmr.msra.gmra.mrb[32].mxu0 %v7035_v12  ;;  %3751 = vmatmul.mubr.f32.vlgmr.msra.gmra.mrb[32].mxu1 %v7035_v12 }
 0xeec   :  { %5420 = vmatpush3.bf16.msra.mxu0 %v5419_v42  ;;  %5452 = vmatpush3.bf16.msra.mxu1 %v5451_v11  ;;  %v3827_v42 = vld [vmem:[#allocation10 + $0x150] sm:$0xff]  ;;  %v3828_v11 = vld [vmem:[#allocation10 + $0x158] sm:$0xff] }
 0xeed   :  { %3984 = vmatprep.mubr.f32.mxu0 %v6744_v32  ;;  %4054 = vmatprep.mubr.f32.mxu1 %v6899_v17  ;;  %v5429_v32 = vpack.c.bf16 %v3808_v52, %v3807_v61  ;;  %v5461_v17 = vpack.c.bf16 %v3840_v14, %v3839_v10  ;;  %v3799_v61 = vld [vmem:[#allocation10 + $0x70] sm:$0xff]  ;;  %v5445_v52 = vpack.c.bf16 %v3816_v23, %v3815_v63  ;;  %v3800_v14 = vld [vmem:[#allocation10 + $0x78] sm:$0xff] }
 0xeee   :  { %5422 = vmatprep.subr.bf16.mxu0 %v5421_v41  ;;  %5454 = vmatprep.subr.bf16.mxu1 %v5453_v57  ;;  %v5471_v41 = vpack.c.bf16 %v3828_v11, %v3827_v42  ;;  %v3797_v57 = vld [vmem:[#allocation10 + $0x60] sm:$0xff]  ;;  %v3875_v42 = vld [vmem:[#allocation10 + $0x2d0] sm:$0xff]  ;;  %v3876_v11 = vld [vmem:[#allocation10 + $0x2d8] sm:$0xff] }
 0xeef   :  { %v5443_v9 = vpack.c.bf16 %v3798_v19, %v3797_v57  ;;  %v5501_v7 = vpack.c.bf16 %v3876_v11, %v3875_v42  ;;  %v5503_v57 = vpack.c.bf16 %v3860_v51, %v3859_v16  ;;  %v3893_v42 = vld [vmem:[#allocation10 + $0x360] sm:$0xff]  ;;  %v3894_v11 = vld [vmem:[#allocation10 + $0x368] sm:$0xff]  ;;  %v3912_v16 = vld [vmem:[#allocation10 + $0x3f8] sm:$0xff] }
 0xef0   :  { %5424 = vmatpush3.bf16.msra.mxu0 %v5423_v50  ;;  %5456 = vmatpush3.bf16.msra.mxu1 %v5455_v5  ;;  %v3829_v50 = vld [vmem:[#allocation10 + $0x160] sm:$0xff]  ;;  %v3830_v5 = vld [vmem:[#allocation10 + $0x168] sm:$0xff] }
 0xef1   :  { %5426 = vmatprep.subr.bf16.mxu0 %v5425_v34  ;;  %5458 = vmatprep.subr.bf16.mxu1 %v5457_v0  ;;  %v3847_v34 = vld [vmem:[#allocation10 + $0x1f0] sm:$0xff]  ;;  %v3848_v0 = vld [vmem:[#allocation10 + $0x1f8] sm:$0xff]  ;;  %v5475_v62 = vpack.c.bf16 %v3830_v5, %v3829_v50 }
 0xef2   :  { %v5477_v10 = vpack.c.bf16 %v3848_v0, %v3847_v34  ;;  %v3879_v50 = vld [vmem:[#allocation10 + $0x2f0] sm:$0xff]  ;;  %v3880_v5 = vld [vmem:[#allocation10 + $0x2f8] sm:$0xff] }
 0xef3   :  { %v5509_v23 = vpack.c.bf16 %v3880_v5, %v3879_v50  ;;  %v3863_v34 = vld [vmem:[#allocation10 + $0x270] sm:$0xff]  ;;  %v3864_v0 = vld [vmem:[#allocation10 + $0x278] sm:$0xff] }
 0xef4   :  { %5428 = vmatpush3.bf16.msra.mxu0 %v5427_v49  ;;  %5460 = vmatpush3.bf16.msra.mxu1 %v5459_v59  ;;  %v3831_v49 = vld [vmem:[#allocation10 + $0x170] sm:$0xff]  ;;  %v3832_v59 = vld [vmem:[#allocation10 + $0x178] sm:$0xff] }
 0xef5   :  { %5430 = vmatprep.subr.bf16.mxu0 %v5429_v32  ;;  %5462 = vmatprep.subr.bf16.mxu1 %v5461_v17  ;;  %v5447_v32 = vpack.c.bf16 %v3800_v14, %v3799_v61  ;;  %v5479_v17 = vpack.c.bf16 %v3832_v59, %v3831_v49  ;;  %v3898_v61 = vld [vmem:[#allocation10 + $0x388] sm:$0xff]  ;;  %v3899_v59 = vld [vmem:[#allocation10 + $0x390] sm:$0xff] }
 0xef6   :  { %v3882_v14 = vld [vmem:[#allocation10 + $0x308] sm:$0xff]  ;;  %v5517_v36 = vpack.c.bf16 %v3900_v40, %v3899_v59 }
 0xef8   :  { %5432 = vmatpush3.bf16.msra.mxu0 %v5431_v43  ;;  %5464 = vmatpush3.bf16.msra.mxu1 %v5463_v26  ;;  %v5485_v43 = vpack.c.bf16 %v3868_v27, %v3867_v6  ;;  %v3851_v26 = vld [vmem:[#allocation10 + $0x210] sm:$0xff]  ;;  %v5521_v6 = vpack.c.bf16 %v3902_v39, %v3901_v15  ;;  %v3886_v27 = vld [vmem:[#allocation10 + $0x328] sm:$0xff] }
 0xef9   :  { %5434 = vmatprep.subr.bf16.mxu0 %v5433_v46  ;;  %5466 = vmatprep.subr.bf16.mxu1 %v5465_v21  ;;  %v3870_v46 = vld [vmem:[#allocation10 + $0x2a8] sm:$0xff]  ;;  %v5487_v21 = vpack.c.bf16 %v3852_v55, %v3851_v26  ;;  %v3904_v26 = vld [vmem:[#allocation10 + $0x3b8] sm:$0xff] }
 0xefa   :  { %v5489_v45 = vpack.c.bf16 %v3870_v46, %v3869_v28  ;;  %v3887_v28 = vld [vmem:[#allocation10 + $0x330] sm:$0xff]  ;;  %v3888_v46 = vld [vmem:[#allocation10 + $0x338] sm:$0xff] }
 0xefc   :  { %5436 = vmatpush3.bf16.msra.mxu0 %v5435_v44  ;;  %5468 = vmatpush3.bf16.msra.mxu1 %v5467_v56  ;;  %v5493_v44 = vpack.c.bf16 %v3872_v35, %v3871_v53  ;;  %v3855_v56 = vld [vmem:[#allocation10 + $0x230] sm:$0xff]  ;;  %v3889_v53 = vld [vmem:[#allocation10 + $0x340] sm:$0xff]  ;;  %v3890_v35 = vld [vmem:[#allocation10 + $0x348] sm:$0xff] }
 0xefd   :  { %5438 = vmatprep.subr.bf16.mxu0 %v5437_v48  ;;  %5470 = vmatprep.subr.bf16.mxu1 %v5469_v38  ;;  %v3858_v38 = vld [vmem:[#allocation10 + $0x248] sm:$0xff] }
 0xf00   :  { %5440 = vmatpush3.bf16.msra.mxu0 %v5439_v18  ;;  %5472 = vmatpush3.bf16.msra.mxu1 %v5471_v41  ;;  %v3877_v18 = vld [vmem:[#allocation10 + $0x2e0] sm:$0xff]  ;;  %v3878_v41 = vld [vmem:[#allocation10 + $0x2e8] sm:$0xff] }
 0xf01   :  { %5442 = vmatprep.subr.bf16.mxu0 %v5441_v30  ;;  %5474 = vmatprep.subr.bf16.mxu1 %v5473_v29  ;;  %v5505_v19 = vpack.c.bf16 %v3878_v41, %v3877_v18  ;;  %v3861_v30 = vld [vmem:[#allocation10 + $0x260] sm:$0xff]  ;;  %v3862_v29 = vld [vmem:[#allocation10 + $0x268] sm:$0xff]  ;;  %v3895_v18 = vld [vmem:[#allocation10 + $0x370] sm:$0xff] }
 0xf02   :  { %v5507_v63 = vpack.c.bf16 %v3862_v29, %v3861_v30  ;;  %v3896_v41 = vld [vmem:[#allocation10 + $0x378] sm:$0xff] }
 0xf04   :  { %5444 = vmatpush3.bf16.msra.mxu0 %v5443_v9  ;;  %5476 = vmatpush3.bf16.msra.mxu1 %v5475_v62  ;;  %v5511_v9 = vpack.c.bf16 %v3864_v0, %v3863_v34  ;;  %v3897_v62 = vld [vmem:[#allocation10 + $0x380] sm:$0xff] }
 0xf05   :  { %5446 = vmatprep.subr.bf16.mxu0 %v5445_v52  ;;  %5478 = vmatprep.subr.bf16.mxu1 %v5477_v10  ;;  %v5513_v52 = vpack.c.bf16 %v3898_v61, %v3897_v62  ;;  %v3881_v10 = vld [vmem:[#allocation10 + $0x300] sm:$0xff] }
 0xf06   :  { %v5515_v49 = vpack.c.bf16 %v3882_v14, %v3881_v10 }
 0xf08   :  { %5448 = vmatpush3.bf16.msra.mxu0 %v5447_v32  ;;  %5480 = vmatpush3.bf16.msra.mxu1 %v5479_v17  ;;  %v3883_v32 = vld [vmem:[#allocation10 + $0x310] sm:$0xff]  ;;  %v3884_v17 = vld [vmem:[#allocation10 + $0x318] sm:$0xff] }
 0xf09   :  { %5482 = vmatprep.subr.bf16.mxu0 %v5481_v3  ;;  %5514 = vmatprep.subr.bf16.mxu1 %v5513_v52  ;;  %v5519_v3 = vpack.c.bf16 %v3884_v17, %v3883_v32 }
 0xf0b   :  { %3985 = vmatmul.mubr.f32.vlgmr.msra.gmra.mrb[34].mxu0 %v6701_v22  ;;  %4055 = vmatmul.mubr.f32.vlgmr.msra.gmra.mrb[34].mxu1 %v6787_v8  ;;  %v3874_v22 = vld [vmem:[#allocation10 + $0x2c8] sm:$0xff]  ;;  %v5495_v8 = vpack.c.bf16 %v3856_v60, %v3855_v56  ;;  %v3908_v56 = vld [vmem:[#allocation10 + $0x3d8] sm:$0xff]  ;;  %v3891_v60 = vld [vmem:[#allocation10 + $0x350] sm:$0xff] }
 0xf0c   :  { %5484 = vmatpush3.bf16.msra.mxu0 %v5483_v33  ;;  %4124 = vmatprep.mubr.f32.mxu0 %v6991_v1  ;;  %v5497_v48 = vpack.c.bf16 %v3874_v22, %v3873_v37  ;;  %v3857_v1 = vld [vmem:[#allocation10 + $0x240] sm:$0xff]  ;;  %v3892_v22 = vld [vmem:[#allocation10 + $0x358] sm:$0xff] }
 0xf0d   :  { %5486 = vmatprep.subr.bf16.mxu0 %v5485_v43  ;;  %v5499_v13 = vpack.c.bf16 %v3858_v38, %v3857_v1  ;;  %5516 = vmatpush3.bf16.msra.mxu1 %v5515_v49  ;;  %v3903_v43 = vld [vmem:[#allocation10 + $0x3b0] sm:$0xff]  ;;  %v5535_v1 = vpack.c.bf16 %v3892_v22, %v3891_v60 }
 0xf0e   :  { %5518 = vmatprep.subr.bf16.mxu1 %v5517_v36  ;;  %v5525_v55 = vpack.c.bf16 %v3904_v26, %v3903_v43 }
 0xf10   :  { %5488 = vmatpush3.bf16.msra.mxu0 %v5487_v21  ;;  %v5527_v21 = vpack.c.bf16 %v3888_v46, %v3887_v28 }
 0xf11   :  { %5490 = vmatprep.subr.bf16.mxu0 %v5489_v45  ;;  %5520 = vmatpush3.bf16.msra.mxu1 %v5519_v3  ;;  %v3905_v45 = vld [vmem:[#allocation10 + $0x3c0] sm:$0xff] }
 0xf12   :  { %5522 = vmatprep.subr.bf16.mxu1 %v5521_v6  ;;  %v5529_v2 = vpack.c.bf16 %v3906_v25, %v3905_v45 }
 0xf14   :  { %5492 = vmatpush3.bf16.msra.mxu0 %v5491_v47  ;;  %v5531_v47 = vpack.c.bf16 %v3890_v35, %v3889_v53 }
 0xf15   :  { %5494 = vmatprep.subr.bf16.mxu0 %v5493_v44  ;;  %v3907_v44 = vld [vmem:[#allocation10 + $0x3d0] sm:$0xff] }
 0xf16   :  { %v5533_v37 = vpack.c.bf16 %v3908_v56, %v3907_v44 }
 0xf18   :  { %5496 = vmatpush3.bf16.msra.mxu0 %v5495_v8  ;;  %v3909_v8 = vld [vmem:[#allocation10 + $0x3e0] sm:$0xff] }
 0xf19   :  { %5498 = vmatprep.subr.bf16.mxu0 %v5497_v48  ;;  %v3910_v48 = vld [vmem:[#allocation10 + $0x3e8] sm:$0xff] }
 0xf1a   :  { %v5537_v38 = vpack.c.bf16 %v3910_v48, %v3909_v8 }
 0xf1c   :  { %5500 = vmatpush3.bf16.msra.mxu0 %v5499_v13  ;;  %v5539_v13 = vpack.c.bf16 %v3894_v11, %v3893_v42 }
 0xf1d   :  { %5502 = vmatprep.subr.bf16.mxu0 %v5501_v7  ;;  %v3911_v7 = vld [vmem:[#allocation10 + $0x3f0] sm:$0xff] }
 0xf1e   :  { %v5541_v51 = vpack.c.bf16 %v3912_v16, %v3911_v7 }
 0xf20   :  { %5504 = vmatpush3.bf16.msra.mxu0 %v5503_v57  ;;  %v5543_v57 = vpack.c.bf16 %v3896_v41, %v3895_v18 }
 0xf21   :  { %5506 = vmatprep.subr.bf16.mxu0 %v5505_v19 }
 0xf24   :  { %5508 = vmatpush3.bf16.msra.mxu0 %v5507_v63 }
 0xf25   :  { %5510 = vmatprep.subr.bf16.mxu0 %v5509_v23 }
 0xf28   :  { %5512 = vmatpush3.bf16.msra.mxu0 %v5511_v9 }
 0xf2b   :  { %4125 = vmatmul.mubr.f32.vlgmr.msra.gmra.mrb[36].mxu0 %v6945_v31  ;;  %v3885_v31 = vld [vmem:[#allocation10 + $0x320] sm:$0xff] }
 0xf2c   :  { %v5523_v33 = vpack.c.bf16 %v3886_v27, %v3885_v31 }
 0xf2e   :  { %5524 = vmatpush3.bf16.msra.mxu1 %v5523_v33 }
 0xf2f   :  { %5526 = vmatprep.subr.bf16.mxu1 %v5525_v55 }
 0xf32   :  { %5528 = vmatpush3.bf16.msra.mxu1 %v5527_v21 }
 0xf33   :  { %5530 = vmatprep.subr.bf16.mxu1 %v5529_v2 }
 0xf36   :  { %5532 = vmatpush3.bf16.msra.mxu1 %v5531_v47 }
 0xf37   :  { %5534 = vmatprep.subr.bf16.mxu1 %v5533_v37 }
 0xf3a   :  { %5536 = vmatpush3.bf16.msra.mxu1 %v5535_v1 }
 0xf3b   :  { %5538 = vmatprep.subr.bf16.mxu1 %v5537_v38 }
 0xf3e   :  { %5540 = vmatpush3.bf16.msra.mxu1 %v5539_v13 }
 0xf3f   :  { %5542 = vmatprep.subr.bf16.mxu1 %v5541_v51 }
 0xf42   :  { %5544 = vmatpush3.bf16.msra.mxu1 %v5543_v57 }
 0xfbe   :  { %v3681_v19 = vpop.f32.mrb[32].mxu0  ;;  %v3752_v30 = vpop.f32.mrb[32].mxu1 }
 0xfbf   :  { %v3757_v29 = vadd.f32 %v3681_v19, %v6683_v54  ;;  %v3683_v50 = vpop.f32.mrb[33].mxu0  ;;  %v3754_v5 = vpop.f32.mrb[33].mxu1  ;;  %v3759_v23 = vadd.f32 %v3752_v30, %v6687_v24 }
 0xfc0   :  { %v3758_v63 = vadd.f32 %v3683_v50, %v6685_v58  ;;  %v3760_v34 = vadd.f32 %v3754_v5, %v6694_v4  ;;  %v4236_v4 = vld [vmem:[%s7074_s8] ss:$0 sm:$0xff]  ;;  %s5867_s8 = scalar_lea.vmem %s4208_s2, 128 }
 0xfc1   :  { %5769 = vtanh.f32 %v3757_v29  ;;  %p5868_p4 = scmp.ne.s32.totalorder %s4208_s2, %s5867_s8  ;;  %p5873_p6 = scmp.lt.s32.totalorder %s5867_s8, %s5867_s8 }
 0xfc2   :  { %5771 = vtanh.f32 %v3758_v63 }
 0xfc3   :  { %5773 = vtanh.f32 %v3759_v23  ;;  %p5874_p7 = por %p5873_p6, %p5872_p5 }
 0xfc4   :  { %5775 = vtanh.f32 %v3760_v34 }
 0xfc5   :  { %p5875_p8 = pnand %p5874_p7, %p5868_p4 }
 0xfcb   :  { %v5770_v0 = vpop.eup %5769 }
 0xfcc   :  { %v3765_v9 = vmul.f32 0.5, %v5770_v0  ;;  %v5772_v62 = vpop.eup %5771 }
 0xfcd   :  { %v3767_v52 = vmul.f32 0.5, %v5772_v62  ;;  %v5774_v10 = vpop.eup %5773 }
 0xfce   :  { %v3766_v61 = vadd.f32 0.5, %v3765_v9  ;;  %v5776_v58 = vpop.eup %5775 }
 0xfcf   :  { %v3768_v14 = vadd.f32 0.5, %v3767_v52  ;;  %v3769_v40 = vmul.f32 0.5, %v5776_v58 }
 0xfd0   :  { %v3772_v54 = vmul.f32 %v5774_v10, %v3766_v61 }
 0xfd1   :  { %v3771_v49 = vmul.f32 %v3768_v14, %v7032_v20  ;;  %v3770_v32 = vadd.f32 0.5, %v3769_v40 }
 0xfd3   :  { %v3773_v59 = vadd.f32 %v3772_v54, %v3771_v49 }
 0xfd5   :  { %5777 = vtanh.f32 %v3773_v59 }
 0xfde   :  { %v4269_v24 = vpop.f32.mrb[34].mxu0  ;;  %v4304_v36 = vpop.f32.mrb[34].mxu1 }
 0xfdf   :  { %v4270_v17 = vpop.f32.mrb[35].mxu0  ;;  %v4305_v3 = vpop.f32.mrb[35].mxu1 }
 0xfe0   :  { %v5778_v15 = vpop.eup %5777  ;;  %v4271_v39 = vadd.f32 %v4270_v17, %v4269_v24  ;;  %v4306_v6 = vadd.f32 %v4305_v3, %v4304_v36 }
 0xfe1   :  { %v3775_v31 = vmul.f32 %v5778_v15, %v3770_v32 }
 0xfe2   :  { %v3987_v27 = vadd.f32 %v4271_v39, %v4236_v4 }
 0xfe3   :  { %4194 = vmatprep.mubr.f32.mxu1 %v3775_v31 }
 0xfe4   :  { %v4057_v20 = vadd.f32 %v4306_v6, %v3987_v27  ;;  %4195 = vmatmul.mubr.f32.vlgmr.msra.gmra.mrb[36].mxu1 %v7035_v12 }
 0xffe   :  { %v4339_v33 = vpop.f32.mrb[36].mxu0 }
 0xfff   :  { %v4340_v43 = vpop.f32.mrb[37].mxu0 }
0x1000   :  { %v4341_v26 = vadd.f32 %v4340_v43, %v4339_v33 }
0x1002   :  { %v4127_v55 = vadd.f32 %v4341_v26, %v4057_v20 }
0x10b7   :  { %v4374_v28 = vpop.f32.mrb[36].mxu1 }
0x10b8   :  { %v4375_v46 = vpop.f32.mrb[37].mxu1 }
0x10b9   :  { %v4376_v21 = vadd.f32 %v4375_v46, %v4374_v28 }
0x10bb   :  { %v4197_v45 = vadd.f32 %v4376_v21, %v4127_v55 }
0x10bd   :  { %4200 = vst [vmem:[#allocation12] sm:$0xff] %v4197_v45 }
0x10be   :  { %5878 = shalt.err (!%p5875_p8)
}
0x10bf   :  { %s5879_s28 = scalar_lea.hbm %s7075_s9, 128 }
0x10c0   :  { %p5880_p9 = scmp.ne.s32.totalorder %s7075_s9, %s5879_s28  ;;  %p5883_p10 = scmp.lt.u32.totalorder %s5879_s28, %s7075_s9 }
0x10c2   :  { %p5885_p11 = pnand %p5883_p10, %p5880_p9 }
0x10c4   :  { %5888 = shalt.err (!%p5885_p11)
}
0x10c5   :  { %4210 = dma.vmem_to_hbm [thread:$0]  %s4208_s2, 128, %s7075_s9, [#allocation6]  }
0x10c6   :  { %5895 = dma.done.wait [#allocation6], 128  }
0x10c7   :  { %5896 = vsyncadd [#allocation6], 4294967168 }
0x10c8   :  { %4214 = vsyncpa [#allocation5], 1 }
0x10c9   :  { %4215 = vsyncpa [#allocation8], 1 }
0x10ca   :  { %4216 = vsyncpa [#allocation11], 1 }
0x10cb   :  { %4217 = vsyncpa [#allocation6], 1 }

</bundles_post_ra>
